<compile_context>
chip_gen: v7x
topology: tpu7x:2x2x1
jax: 0.10.0
libtpu: 0.0.40
codegen_flags: <defaults>
</compile_context>

<pallas_src>
import jax
import jax.numpy as jnp
from jax.experimental import pallas as pl
from jax.experimental.pallas import tpu as pltpu

BN_EPS = 1e-5
LEAKY_SLOPE = 0.01          # nn.LeakyReLU() default negative_slope

# Sequence geometry is pinned by the module itself: SE_s hard-codes
# nn.Linear(245, 1), which forces the concat length to 245 and hence L_in = 253.
L_IN = 253                  # network input length
K_UNI = 9                   # stage-A/B convs unified to k=9, p=2 (lossless)
L_PAD_A = L_IN + 4          # 257
L_A = L_PAD_A - K_UNI + 1   # 249: conv1/conv2/conv3 output length
L_PAD_B = L_A + 4           # 253
L_B = L_PAD_B - K_UNI + 1   # 245: conv11..conv32 / concat / SE length
K_FIN = 5
STRIDE_FIN = 2
L_CF = L_B - K_FIN + 1                     # 241: stride-1 length of final conv
L_OUT = (L_B - K_FIN) // STRIDE_FIN + 1    # 121: final (stride-2) output length


def _leaky(y):
    return jnp.where(y >= 0.0, y, LEAKY_SLOPE * y)


# --------------------------------- fused kernel ---------------------------------

def _peak_fused_kernel(
    x_ref,            # (c1, 253)        input, one batch element
    wa_ref,           # (3*c2, 9*c1)     stacked conv1|conv2|conv3 (im2col layout)
    sa_ref, ba_ref,   # (3*c2, 1)        folded BN scale / shift, stage A
    wb_ref,           # (6*c2, 27*c2)    block-diag conv11..conv32 (im2col layout)
    sb_ref, bb_ref,   # (6*c2, 1)
    wc_ref,           # (6*c2, 6*c2)     SE channel-mixing Linear (no bias)
    wl_ref,           # (1, 245)         SE Linear(245, 1) weight as a row
    seb_ref,          # (6*c2, 1)        bl * row-sum(wc)  (folded SE bias)
    wf_ref,           # (c2, 30*c2)      final conv (im2col layout)
    sf_ref, bf_ref,   # (c2, 1)
    o_ref,            # (c2, 121)
    xpad_ref,         # scratch (c1, 257)
    ya_ref,           # scratch (3*c2, 253)
    xse_ref,          # scratch (6*c2, 245)
):
    # ---- stage A: conv1 | conv2 | conv3, stacked, unified to k=9 / p=2 ----
    xpad_ref[...] = jnp.zeros_like(xpad_ref)            # in-kernel "same" padding
    xpad_ref[:, pl.ds(2, L_IN)] = x_ref[...]
    col_a = jnp.concatenate(
        [xpad_ref[:, pl.ds(dk, L_A)] for dk in range(K_UNI)], axis=0)      # (9*c1, 249)
    ya = jnp.dot(wa_ref[...], col_a, preferred_element_type=jnp.float32)   # (3*c2, 249)
    ya = _leaky(ya * sa_ref[...] + ba_ref[...])

    # ---- stage B: conv11..conv32 as one block-diagonal conv on the stacked ----
    #      stage-A output; output rows are already in torch.cat order.
    ya_ref[...] = jnp.zeros_like(ya_ref)                # zero edges = padding 2
    ya_ref[:, pl.ds(2, L_A)] = ya
    col_b = jnp.concatenate(
        [ya_ref[:, pl.ds(dk, L_B)] for dk in range(K_UNI)], axis=0)        # (27*c2, 245)
    xcat = jnp.dot(wb_ref[...], col_b, preferred_element_type=jnp.float32)  # (6*c2, 245)
    xcat = _leaky(xcat * sb_ref[...] + bb_ref[...])

    # ---- SE_s: softmax over channels of  wc @ (xcat @ wl^T + bl) ----
    # Reassociated as (wc @ xcat) @ wl^T + bl*rowsum(wc): one real MXU matmul,
    # then a VPU multiply + lane reduction (no degenerate N=1 matmuls).
    # TODO(synk): PyTorch SE_s prints y.shape; debug print omitted.
    wx = jnp.dot(wc_ref[...], xcat, preferred_element_type=jnp.float32)    # (6*c2, 245)
    z = jnp.sum(wx * wl_ref[...], axis=1, keepdims=True) + seb_ref[...]    # (6*c2, 1)
    z = z - jnp.max(z, axis=0, keepdims=True)
    e = jnp.exp(z)
    sm = e * pl.reciprocal(jnp.sum(e, axis=0, keepdims=True), approx=True)
    xse_ref[...] = xcat * sm                                               # (6*c2, 245)

    # ---- final Conv(6*c2 -> c2, k=5, s=2, p=0) + BN + LeakyReLU ----
    # stride-1 conv on the MXU, then stride-2 subsampling as a matmul with a
    # 0/1 selection matrix (kept in-kernel; no HBM round trip, no strided slice).
    col_f = jnp.concatenate(
        [xse_ref[:, pl.ds(dk, L_CF)] for dk in range(K_FIN)], axis=0)      # (30*c2, 241)
    yf = jnp.dot(wf_ref[...], col_f, preferred_element_type=jnp.float32)   # (c2, 241)
    rows = jax.lax.broadcasted_iota(jnp.int32, (L_CF, L_OUT), 0)
    cols = jax.lax.broadcasted_iota(jnp.int32, (L_CF, L_OUT), 1)
    sel = (rows == STRIDE_FIN * cols).astype(jnp.float32)                  # (241, 121)
    yf = jnp.dot(yf, sel, preferred_element_type=jnp.float32)              # (c2, 121)
    o_ref[...] = _leaky(yf * sf_ref[...] + bf_ref[...])


# ------------------------------------ wrapper ------------------------------------

def _rep_spec(shape):
    """BlockSpec for an array that is fully resident (same block every step)."""
    zeros = (0,) * len(shape)
    return pl.BlockSpec(shape, lambda i: zeros)


def peak_forward(packed, x):
    """x: (B, c1, 253) float32  ->  (B, c2, 121) float32."""
    b, c1, l_in = x.shape
    assert l_in == L_IN, l_in
    c2 = packed["sf"].shape[0]

    return pl.pallas_call(
        _peak_fused_kernel,
        out_shape=jax.ShapeDtypeStruct((b, c2, L_OUT), jnp.float32),
        grid=(b,),
        in_specs=[
            pl.BlockSpec((None, c1, L_IN), lambda i: (i, 0, 0)),
            _rep_spec(packed["wa"].shape),
            _rep_spec(packed["sa"].shape),
            _rep_spec(packed["ba"].shape),
            _rep_spec(packed["wb"].shape),
            _rep_spec(packed["sb"].shape),
            _rep_spec(packed["bb"].shape),
            _rep_spec(packed["wc"].shape),
            _rep_spec(packed["wl"].shape),
            _rep_spec(packed["seb"].shape),
            _rep_spec(packed["wf"].shape),
            _rep_spec(packed["sf"].shape),
            _rep_spec(packed["bf"].shape),
        ],
        out_specs=pl.BlockSpec((None, c2, L_OUT), lambda i: (i, 0, 0)),
        scratch_shapes=[
            pltpu.VMEM((c1, L_PAD_A), jnp.float32),
            pltpu.VMEM((3 * c2, L_PAD_B), jnp.float32),
            pltpu.VMEM((6 * c2, L_B), jnp.float32),
        ],
        compiler_params=pltpu.CompilerParams(dimension_semantics=("parallel",)),
    )(x, packed["wa"], packed["sa"], packed["ba"],
      packed["wb"], packed["sb"], packed["bb"],
      packed["wc"], packed["wl"], packed["seb"],
      packed["wf"], packed["sf"], packed["bf"])


# ------------------------------ parameter packing ---------------------------------

def _fold_bn(p):
    inv_std = 1.0 / jnp.sqrt(p["rvar"] + BN_EPS)
    scale = p["gamma"] * inv_std
    shift = p["beta"] - p["rmean"] * scale
    return scale.astype(jnp.float32), shift.astype(jnp.float32)


def _pad_taps_to(w, k_target):
    """Zero-pad (c_out, c_in, k) symmetrically along taps: Conv1d(k, s=1, p) is
    exactly Conv1d(k_target, s=1, p + (k_target-k)//2) with zero extra taps."""
    pad = (k_target - w.shape[-1]) // 2
    return jnp.pad(w, ((0, 0), (0, 0), (pad, pad)))


def _im2col_weight(w):
    """(c_out, c_in, k) -> (c_out, k*c_in), matching tap-major im2col rows."""
    c_out, c_in, k = w.shape
    return jnp.transpose(w, (0, 2, 1)).reshape(c_out, k * c_in)


def pack_peak_params(params, c1, c2):
    # stage A: conv1 | conv2 | conv3, unified to k=9 / p=2 and stacked on C_out.
    names_a = ["conv1", "conv2", "conv3"]
    wa = jnp.concatenate([_pad_taps_to(params[n]["w"], K_UNI) for n in names_a], axis=0)
    sa, ba = zip(*[_fold_bn(params[n]) for n in names_a])

    # stage B: conv11..conv32 as one block-diagonal conv on the stacked stage-A
    # output (input block 0 = conv1 out, 1 = conv2 out, 2 = conv3 out); output
    # row order matches torch.cat((x11, x12, x21, x22, x31, x32), 1).
    names_b = [("conv11", 0), ("conv12", 0), ("conv21", 1),
               ("conv22", 1), ("conv31", 2), ("conv32", 2)]
    blocks = []
    for name, src in names_b:
        w9 = _pad_taps_to(params[name]["w"], K_UNI)                 # (c2, c2, 9)
        row = jnp.zeros((c2, 3 * c2, K_UNI), jnp.float32)
        row = row.at[:, src * c2:(src + 1) * c2, :].set(w9)
        blocks.append(row)
    wb = jnp.concatenate(blocks, axis=0)                            # (6*c2, 3*c2, 9)
    sb, bb = zip(*[_fold_bn(params[n]) for n, _ in names_b])

    sf, bf = _fold_bn(params["conv"])

    return {
        "wa": _im2col_weight(wa),                                    # (3*c2, 9*c1)
        "sa": jnp.concatenate(sa).reshape(3 * c2, 1),
        "ba": jnp.concatenate(ba).reshape(3 * c2, 1),
        "wb": _im2col_weight(wb),                                    # (6*c2, 27*c2)
        "sb": jnp.concatenate(sb).reshape(6 * c2, 1),
        "bb": jnp.concatenate(bb).reshape(6 * c2, 1),
        "wc": params["se_wc"].astype(jnp.float32),                   # (6*c2, 6*c2)
        "wl": params["se_wl"].reshape(1, L_B).astype(jnp.float32),   # (1, 245)
        "seb": (params["se_bl"].reshape(1, 1)
                * jnp.sum(params["se_wc"], axis=1, keepdims=True)).astype(jnp.float32),
        "wf": _im2col_weight(params["conv"]["w"]),                   # (c2, 30*c2)
        "sf": sf.reshape(c2, 1),
        "bf": bf.reshape(c2, 1),
    }


# ------------------------------ parameter init -------------------------------------

def _init_conv_params(key, c_in, c_out, k):
    k1, k2, k3, k4, k5 = jax.random.split(key, 5)
    return dict(
        w=0.1 * jax.random.normal(k1, (c_out, c_in, k), jnp.float32),
        gamma=1.0 + 0.1 * jax.random.normal(k2, (c_out,), jnp.float32),
        beta=0.1 * jax.random.normal(k3, (c_out,), jnp.float32),
        rmean=0.1 * jax.random.normal(k4, (c_out,), jnp.float32),
        rvar=1.0 + 0.1 * jax.random.uniform(k5, (c_out,), jnp.float32),
    )


def init_peak_params(key, c1, c2):
    keys = jax.random.split(key, 13)
    return {
        "conv1": _init_conv_params(keys[0], c1, c2, 5),
        "conv2": _init_conv_params(keys[1], c1, c2, 7),
        "conv3": _init_conv_params(keys[2], c1, c2, 9),
        "conv11": _init_conv_params(keys[3], c2, c2, 7),
        "conv12": _init_conv_params(keys[4], c2, c2, 9),
        "conv21": _init_conv_params(keys[5], c2, c2, 5),
        "conv22": _init_conv_params(keys[6], c2, c2, 9),
        "conv31": _init_conv_params(keys[7], c2, c2, 5),
        "conv32": _init_conv_params(keys[8], c2, c2, 7),
        "conv":   _init_conv_params(keys[9], 6 * c2, c2, 5),   # stride 2 in forward
        "se_wc": 0.1 * jax.random.normal(keys[10], (6 * c2, 6 * c2), jnp.float32),
        "se_wl": 0.1 * jax.random.normal(keys[11], (1, L_B), jnp.float32),
        "se_bl": 0.1 * jax.random.normal(keys[12], (1,), jnp.float32),
    }


if __name__ == "__main__":
    C1, C2, B = 16, 16, 2    # peak(c1=16, c2=16), as used by PeakNet with a=2
    key = jax.random.PRNGKey(0)
    pkey, xkey = jax.random.split(key)

    params = init_peak_params(pkey, C1, C2)
    packed = pack_peak_params(params, C1, C2)

    # L = 253 is forced by SE_s's hard-coded nn.Linear(245, 1).
    x = jax.random.normal(xkey, (B, C1, L_IN), jnp.float32)

    fwd = jax.jit(peak_forward)
    out = jax.block_until_ready(fwd(packed, x))

    assert out.shape == (B, C2, L_OUT), out.shape
    assert bool(jnp.all(jnp.isfinite(out)))
    print("KERNEL_OK")
</pallas_src>

<mosaic_0001>
module attributes {stable_mosaic.version = 11 : i64} {
  func.func @_peak_fused_kernel(%arg0: i32, %arg1: memref<1x16x253xf32, #tpu.memory_space<vmem>>, %arg2: memref<48x144xf32, #tpu.memory_space<vmem>>, %arg3: memref<48x1xf32, #tpu.memory_space<vmem>>, %arg4: memref<48x1xf32, #tpu.memory_space<vmem>>, %arg5: memref<96x432xf32, #tpu.memory_space<vmem>>, %arg6: memref<96x1xf32, #tpu.memory_space<vmem>>, %arg7: memref<96x1xf32, #tpu.memory_space<vmem>>, %arg8: memref<96x96xf32, #tpu.memory_space<vmem>>, %arg9: memref<1x245xf32, #tpu.memory_space<vmem>>, %arg10: memref<96x1xf32, #tpu.memory_space<vmem>>, %arg11: memref<16x480xf32, #tpu.memory_space<vmem>>, %arg12: memref<16x1xf32, #tpu.memory_space<vmem>>, %arg13: memref<16x1xf32, #tpu.memory_space<vmem>>, %arg14: memref<1x16x121xf32, #tpu.memory_space<vmem>>, %arg15: memref<16x257xf32, #tpu.memory_space<vmem>>, %arg16: memref<48x253xf32, #tpu.memory_space<vmem>>, %arg17: memref<96x245xf32, #tpu.memory_space<vmem>>) attributes {dimension_semantics = [#tpu.dimension_semantics<parallel>], iteration_bounds = array<i64: 2>, scalar_prefetch = 0 : i64, scratch_operands = 3 : i64, tpu.core_type = #tpu.core_type<tc>, window_params = [{transform_indices = @transform_0, window_bounds = array<i64: 1, 16, 253>}, {pipeline_mode = #tpu.pipeline_mode<synchronous>, transform_indices = @transform_1, window_bounds = array<i64: 48, 144>}, {pipeline_mode = #tpu.pipeline_mode<synchronous>, transform_indices = @transform_2, window_bounds = array<i64: 48, 1>}, {pipeline_mode = #tpu.pipeline_mode<synchronous>, transform_indices = @transform_3, window_bounds = array<i64: 48, 1>}, {pipeline_mode = #tpu.pipeline_mode<synchronous>, transform_indices = @transform_4, window_bounds = array<i64: 96, 432>}, {pipeline_mode = #tpu.pipeline_mode<synchronous>, transform_indices = @transform_5, window_bounds = array<i64: 96, 1>}, {pipeline_mode = #tpu.pipeline_mode<synchronous>, transform_indices = @transform_6, window_bounds = array<i64: 96, 1>}, {pipeline_mode = #tpu.pipeline_mode<synchronous>, transform_indices = @transform_7, window_bounds = array<i64: 96, 96>}, {pipeline_mode = #tpu.pipeline_mode<synchronous>, transform_indices = @transform_8, window_bounds = array<i64: 1, 245>}, {pipeline_mode = #tpu.pipeline_mode<synchronous>, transform_indices = @transform_9, window_bounds = array<i64: 96, 1>}, {pipeline_mode = #tpu.pipeline_mode<synchronous>, transform_indices = @transform_10, window_bounds = array<i64: 16, 480>}, {pipeline_mode = #tpu.pipeline_mode<synchronous>, transform_indices = @transform_11, window_bounds = array<i64: 16, 1>}, {pipeline_mode = #tpu.pipeline_mode<synchronous>, transform_indices = @transform_12, window_bounds = array<i64: 16, 1>}, {transform_indices = @transform_13, window_bounds = array<i64: 1, 16, 121>}]} {
    %cst = arith.constant 0.000000e+00 : f32
    %0 = vector.broadcast %cst : f32 to vector<16x257xf32>
    %c0 = arith.constant 0 : index
    %c0_0 = arith.constant 0 : index
    %1 = vector.load %arg15[%c0, %c0_0] : memref<16x257xf32, #tpu.memory_space<vmem>>, vector<16x257xf32>
    tpu.vector_store %arg15[%c0, %c0_0], %0 {strides = array<i32>} : memref<16x257xf32, #tpu.memory_space<vmem>>, vector<16x257xf32>,
    %c0_1 = arith.constant 0 : index
    %c0_2 = arith.constant 0 : index
    %c0_3 = arith.constant 0 : index
    %2 = vector.load %arg1[%c0_1, %c0_2, %c0_3] : memref<1x16x253xf32, #tpu.memory_space<vmem>>, vector<1x16x253xf32>
    %3 = vector.shape_cast %2 : vector<1x16x253xf32> to vector<16x253xf32>
    %c0_4 = arith.constant 0 : index
    %c2 = arith.constant 2 : index
    %4 = vector.load %arg15[%c0_4, %c2] : memref<16x257xf32, #tpu.memory_space<vmem>>, vector<16x253xf32>
    tpu.vector_store %arg15[%c0_4, %c2], %3 {strides = array<i32>} : memref<16x257xf32, #tpu.memory_space<vmem>>, vector<16x253xf32>,
    %c0_5 = arith.constant 0 : index
    %c0_6 = arith.constant 0 : index
    %5 = vector.load %arg15[%c0_5, %c0_6] : memref<16x257xf32, #tpu.memory_space<vmem>>, vector<16x249xf32>
    %c0_7 = arith.constant 0 : index
    %c1 = arith.constant 1 : index
    %6 = vector.load %arg15[%c0_7, %c1] : memref<16x257xf32, #tpu.memory_space<vmem>>, vector<16x249xf32>
    %c0_8 = arith.constant 0 : index
    %c2_9 = arith.constant 2 : index
    %7 = vector.load %arg15[%c0_8, %c2_9] : memref<16x257xf32, #tpu.memory_space<vmem>>, vector<16x249xf32>
    %c0_10 = arith.constant 0 : index
    %c3 = arith.constant 3 : index
    %8 = vector.load %arg15[%c0_10, %c3] : memref<16x257xf32, #tpu.memory_space<vmem>>, vector<16x249xf32>
    %c0_11 = arith.constant 0 : index
    %c4 = arith.constant 4 : index
    %9 = vector.load %arg15[%c0_11, %c4] : memref<16x257xf32, #tpu.memory_space<vmem>>, vector<16x249xf32>
    %c0_12 = arith.constant 0 : index
    %c5 = arith.constant 5 : index
    %10 = vector.load %arg15[%c0_12, %c5] : memref<16x257xf32, #tpu.memory_space<vmem>>, vector<16x249xf32>
    %c0_13 = arith.constant 0 : index
    %c6 = arith.constant 6 : index
    %11 = vector.load %arg15[%c0_13, %c6] : memref<16x257xf32, #tpu.memory_space<vmem>>, vector<16x249xf32>
    %c0_14 = arith.constant 0 : index
    %c7 = arith.constant 7 : index
    %12 = vector.load %arg15[%c0_14, %c7] : memref<16x257xf32, #tpu.memory_space<vmem>>, vector<16x249xf32>
    %c0_15 = arith.constant 0 : index
    %c8 = arith.constant 8 : index
    %13 = vector.load %arg15[%c0_15, %c8] : memref<16x257xf32, #tpu.memory_space<vmem>>, vector<16x249xf32>
    %14 = tpu.concatenate %5, %6, %7, %8, %9, %10, %11, %12, %13 in 0 : vector<16x249xf32>, vector<16x249xf32>, vector<16x249xf32>, vector<16x249xf32>, vector<16x249xf32>, vector<16x249xf32>, vector<16x249xf32>, vector<16x249xf32>, vector<16x249xf32> -> vector<144x249xf32>
    %c0_16 = arith.constant 0 : index
    %c0_17 = arith.constant 0 : index
    %15 = vector.load %arg2[%c0_16, %c0_17] : memref<48x144xf32, #tpu.memory_space<vmem>>, vector<48x144xf32>
    %cst_18 = arith.constant dense<0.000000e+00> : vector<48x249xf32>
    %16 = tpu.matmul %15, %14, %cst_18 {dimension_numbers = #tpu.dot_dimension_numbers<[1], [0], [0], [1], [0, 0, 1, 1], [], []>} : vector<48x144xf32>, vector<144x249xf32>, vector<48x249xf32> -> vector<48x249xf32>
    %c0_19 = arith.constant 0 : index
    %c0_20 = arith.constant 0 : index
    %17 = vector.load %arg3[%c0_19, %c0_20] : memref<48x1xf32, #tpu.memory_space<vmem>>, vector<48x1xf32>
    %18 = vector.broadcast %17 : vector<48x1xf32> to vector<48x249xf32>
    %19 = arith.mulf %16, %18 : vector<48x249xf32>
    %c0_21 = arith.constant 0 : index
    %c0_22 = arith.constant 0 : index
    %20 = vector.load %arg4[%c0_21, %c0_22] : memref<48x1xf32, #tpu.memory_space<vmem>>, vector<48x1xf32>
    %21 = vector.broadcast %20 : vector<48x1xf32> to vector<48x249xf32>
    %22 = arith.addf %19, %21 : vector<48x249xf32>
    %cst_23 = arith.constant 0.000000e+00 : f32
    %23 = vector.broadcast %cst_23 : f32 to vector<48x249xf32>
    %24 = arith.cmpf oge, %22, %23 : vector<48x249xf32>
    %cst_24 = arith.constant 0.00999999977 : f32
    %25 = vector.broadcast %cst_24 : f32 to vector<48x249xf32>
    %26 = arith.mulf %25, %22 : vector<48x249xf32>
    %27 = arith.select %24, %22, %26 : vector<48x249xi1>, vector<48x249xf32>
    %cst_25 = arith.constant 0.000000e+00 : f32
    %28 = vector.broadcast %cst_25 : f32 to vector<48x253xf32>
    %c0_26 = arith.constant 0 : index
    %c0_27 = arith.constant 0 : index
    %29 = vector.load %arg16[%c0_26, %c0_27] : memref<48x253xf32, #tpu.memory_space<vmem>>, vector<48x253xf32>
    tpu.vector_store %arg16[%c0_26, %c0_27], %28 {strides = array<i32>} : memref<48x253xf32, #tpu.memory_space<vmem>>, vector<48x253xf32>,
    %c0_28 = arith.constant 0 : index
    %c2_29 = arith.constant 2 : index
    %30 = vector.load %arg16[%c0_28, %c2_29] : memref<48x253xf32, #tpu.memory_space<vmem>>, vector<48x249xf32>
    tpu.vector_store %arg16[%c0_28, %c2_29], %27 {strides = array<i32>} : memref<48x253xf32, #tpu.memory_space<vmem>>, vector<48x249xf32>,
    %c0_30 = arith.constant 0 : index
    %c0_31 = arith.constant 0 : index
    %31 = vector.load %arg16[%c0_30, %c0_31] : memref<48x253xf32, #tpu.memory_space<vmem>>, vector<48x245xf32>
    %c0_32 = arith.constant 0 : index
    %c1_33 = arith.constant 1 : index
    %32 = vector.load %arg16[%c0_32, %c1_33] : memref<48x253xf32, #tpu.memory_space<vmem>>, vector<48x245xf32>
    %c0_34 = arith.constant 0 : index
    %c2_35 = arith.constant 2 : index
    %33 = vector.load %arg16[%c0_34, %c2_35] : memref<48x253xf32, #tpu.memory_space<vmem>>, vector<48x245xf32>
    %c0_36 = arith.constant 0 : index
    %c3_37 = arith.constant 3 : index
    %34 = vector.load %arg16[%c0_36, %c3_37] : memref<48x253xf32, #tpu.memory_space<vmem>>, vector<48x245xf32>
    %c0_38 = arith.constant 0 : index
    %c4_39 = arith.constant 4 : index
    %35 = vector.load %arg16[%c0_38, %c4_39] : memref<48x253xf32, #tpu.memory_space<vmem>>, vector<48x245xf32>
    %c0_40 = arith.constant 0 : index
    %c5_41 = arith.constant 5 : index
    %36 = vector.load %arg16[%c0_40, %c5_41] : memref<48x253xf32, #tpu.memory_space<vmem>>, vector<48x245xf32>
    %c0_42 = arith.constant 0 : index
    %c6_43 = arith.constant 6 : index
    %37 = vector.load %arg16[%c0_42, %c6_43] : memref<48x253xf32, #tpu.memory_space<vmem>>, vector<48x245xf32>
    %c0_44 = arith.constant 0 : index
    %c7_45 = arith.constant 7 : index
    %38 = vector.load %arg16[%c0_44, %c7_45] : memref<48x253xf32, #tpu.memory_space<vmem>>, vector<48x245xf32>
    %c0_46 = arith.constant 0 : index
    %c8_47 = arith.constant 8 : index
    %39 = vector.load %arg16[%c0_46, %c8_47] : memref<48x253xf32, #tpu.memory_space<vmem>>, vector<48x245xf32>
    %40 = tpu.concatenate %31, %32, %33, %34, %35, %36, %37, %38, %39 in 0 : vector<48x245xf32>, vector<48x245xf32>, vector<48x245xf32>, vector<48x245xf32>, vector<48x245xf32>, vector<48x245xf32>, vector<48x245xf32>, vector<48x245xf32>, vector<48x245xf32> -> vector<432x245xf32>
    %c0_48 = arith.constant 0 : index
    %c0_49 = arith.constant 0 : index
    %41 = vector.load %arg5[%c0_48, %c0_49] : memref<96x432xf32, #tpu.memory_space<vmem>>, vector<96x432xf32>
    %cst_50 = arith.constant dense<0.000000e+00> : vector<96x245xf32>
    %42 = tpu.matmul %41, %40, %cst_50 {dimension_numbers = #tpu.dot_dimension_numbers<[1], [0], [0], [1], [0, 0, 1, 1], [], []>} : vector<96x432xf32>, vector<432x245xf32>, vector<96x245xf32> -> vector<96x245xf32>
    %c0_51 = arith.constant 0 : index
    %c0_52 = arith.constant 0 : index
    %43 = vector.load %arg6[%c0_51, %c0_52] : memref<96x1xf32, #tpu.memory_space<vmem>>, vector<96x1xf32>
    %44 = vector.broadcast %43 : vector<96x1xf32> to vector<96x245xf32>
    %45 = arith.mulf %42, %44 : vector<96x245xf32>
    %c0_53 = arith.constant 0 : index
    %c0_54 = arith.constant 0 : index
    %46 = vector.load %arg7[%c0_53, %c0_54] : memref<96x1xf32, #tpu.memory_space<vmem>>, vector<96x1xf32>
    %47 = vector.broadcast %46 : vector<96x1xf32> to vector<96x245xf32>
    %48 = arith.addf %45, %47 : vector<96x245xf32>
    %cst_55 = arith.constant 0.000000e+00 : f32
    %49 = vector.broadcast %cst_55 : f32 to vector<96x245xf32>
    %50 = arith.cmpf oge, %48, %49 : vector<96x245xf32>
    %cst_56 = arith.constant 0.00999999977 : f32
    %51 = vector.broadcast %cst_56 : f32 to vector<96x245xf32>
    %52 = arith.mulf %51, %48 : vector<96x245xf32>
    %53 = arith.select %50, %48, %52 : vector<96x245xi1>, vector<96x245xf32>
    %c0_57 = arith.constant 0 : index
    %c0_58 = arith.constant 0 : index
    %54 = vector.load %arg8[%c0_57, %c0_58] : memref<96x96xf32, #tpu.memory_space<vmem>>, vector<96x96xf32>
    %cst_59 = arith.constant dense<0.000000e+00> : vector<96x245xf32>
    %55 = tpu.matmul %54, %53, %cst_59 {dimension_numbers = #tpu.dot_dimension_numbers<[1], [0], [0], [1], [0, 0, 1, 1], [], []>} : vector<96x96xf32>, vector<96x245xf32>, vector<96x245xf32> -> vector<96x245xf32>
    %c0_60 = arith.constant 0 : index
    %c0_61 = arith.constant 0 : index
    %56 = vector.load %arg9[%c0_60, %c0_61] : memref<1x245xf32, #tpu.memory_space<vmem>>, vector<1x245xf32>
    %57 = vector.broadcast %56 : vector<1x245xf32> to vector<96x245xf32>
    %58 = arith.mulf %55, %57 : vector<96x245xf32>
    %cst_62 = arith.constant dense<0.000000e+00> : vector<96xf32>
    %59 = vector.multi_reduction <add>, %58, %cst_62 [1] : vector<96x245xf32> to vector<96xf32>
    %60 = vector.shape_cast %59 : vector<96xf32> to vector<96x1xf32>
    %c0_63 = arith.constant 0 : index
    %c0_64 = arith.constant 0 : index
    %61 = vector.load %arg10[%c0_63, %c0_64] : memref<96x1xf32, #tpu.memory_space<vmem>>, vector<96x1xf32>
    %62 = arith.addf %60, %61 : vector<96x1xf32>
    %cst_65 = arith.constant dense<0xFF800000> : vector<1xf32>
    %63 = vector.multi_reduction <maximumf>, %62, %cst_65 [0] : vector<96x1xf32> to vector<1xf32>
    %64 = vector.shape_cast %63 : vector<1xf32> to vector<1x1xf32>
    %65 = vector.broadcast %64 : vector<1x1xf32> to vector<96x1xf32>
    %66 = arith.subf %62, %65 : vector<96x1xf32>
    %67 = math.exp %66 : vector<96x1xf32>
    %cst_66 = arith.constant dense<0.000000e+00> : vector<1xf32>
    %68 = vector.multi_reduction <add>, %67, %cst_66 [0] : vector<96x1xf32> to vector<1xf32>
    %69 = vector.shape_cast %68 : vector<1xf32> to vector<1x1xf32>
    %70 = tpu.reciprocal %69 {approx = true} : vector<1x1xf32> -> vector<1x1xf32>
    %71 = vector.broadcast %70 : vector<1x1xf32> to vector<96x1xf32>
    %72 = arith.mulf %67, %71 : vector<96x1xf32>
    %73 = vector.broadcast %72 : vector<96x1xf32> to vector<96x245xf32>
    %74 = arith.mulf %53, %73 : vector<96x245xf32>
    %c0_67 = arith.constant 0 : index
    %c0_68 = arith.constant 0 : index
    %75 = vector.load %arg17[%c0_67, %c0_68] : memref<96x245xf32, #tpu.memory_space<vmem>>, vector<96x245xf32>
    tpu.vector_store %arg17[%c0_67, %c0_68], %74 {strides = array<i32>} : memref<96x245xf32, #tpu.memory_space<vmem>>, vector<96x245xf32>,
    %c0_69 = arith.constant 0 : index
    %c0_70 = arith.constant 0 : index
    %76 = vector.load %arg17[%c0_69, %c0_70] : memref<96x245xf32, #tpu.memory_space<vmem>>, vector<96x241xf32>
    %c0_71 = arith.constant 0 : index
    %c1_72 = arith.constant 1 : index
    %77 = vector.load %arg17[%c0_71, %c1_72] : memref<96x245xf32, #tpu.memory_space<vmem>>, vector<96x241xf32>
    %c0_73 = arith.constant 0 : index
    %c2_74 = arith.constant 2 : index
    %78 = vector.load %arg17[%c0_73, %c2_74] : memref<96x245xf32, #tpu.memory_space<vmem>>, vector<96x241xf32>
    %c0_75 = arith.constant 0 : index
    %c3_76 = arith.constant 3 : index
    %79 = vector.load %arg17[%c0_75, %c3_76] : memref<96x245xf32, #tpu.memory_space<vmem>>, vector<96x241xf32>
    %c0_77 = arith.constant 0 : index
    %c4_78 = arith.constant 4 : index
    %80 = vector.load %arg17[%c0_77, %c4_78] : memref<96x245xf32, #tpu.memory_space<vmem>>, vector<96x241xf32>
    %81 = tpu.concatenate %76, %77, %78, %79, %80 in 0 : vector<96x241xf32>, vector<96x241xf32>, vector<96x241xf32>, vector<96x241xf32>, vector<96x241xf32> -> vector<480x241xf32>
    %c0_79 = arith.constant 0 : index
    %c0_80 = arith.constant 0 : index
    %82 = vector.load %arg11[%c0_79, %c0_80] : memref<16x480xf32, #tpu.memory_space<vmem>>, vector<16x480xf32>
    %cst_81 = arith.constant dense<0.000000e+00> : vector<16x241xf32>
    %83 = tpu.matmul %82, %81, %cst_81 {dimension_numbers = #tpu.dot_dimension_numbers<[1], [0], [0], [1], [0, 0, 1, 1], [], []>} : vector<16x480xf32>, vector<480x241xf32>, vector<16x241xf32> -> vector<16x241xf32>
    %84 = tpu.iota {dimensions = array<i32: 0>} : vector<241x121xi32>
    %85 = tpu.iota {dimensions = array<i32: 1>} : vector<241x121xi32>
    %c2_i32 = arith.constant 2 : i32
    %86 = vector.broadcast %c2_i32 : i32 to vector<241x121xi32>
    %87 = arith.muli %86, %85 : vector<241x121xi32>
    %88 = arith.cmpi eq, %84, %87 : vector<241x121xi32>
    %89 = arith.extui %88 : vector<241x121xi1> to vector<241x121xi32>
    %90 = arith.sitofp %89 : vector<241x121xi32> to vector<241x121xf32>
    %cst_82 = arith.constant dense<0.000000e+00> : vector<16x121xf32>
    %91 = tpu.matmul %83, %90, %cst_82 {dimension_numbers = #tpu.dot_dimension_numbers<[1], [0], [0], [1], [0, 0, 1, 1], [], []>} : vector<16x241xf32>, vector<241x121xf32>, vector<16x121xf32> -> vector<16x121xf32>
    %c0_83 = arith.constant 0 : index
    %c0_84 = arith.constant 0 : index
    %92 = vector.load %arg12[%c0_83, %c0_84] : memref<16x1xf32, #tpu.memory_space<vmem>>, vector<16x1xf32>
    %93 = vector.broadcast %92 : vector<16x1xf32> to vector<16x121xf32>
    %94 = arith.mulf %91, %93 : vector<16x121xf32>
    %c0_85 = arith.constant 0 : index
    %c0_86 = arith.constant 0 : index
    %95 = vector.load %arg13[%c0_85, %c0_86] : memref<16x1xf32, #tpu.memory_space<vmem>>, vector<16x1xf32>
    %96 = vector.broadcast %95 : vector<16x1xf32> to vector<16x121xf32>
    %97 = arith.addf %94, %96 : vector<16x121xf32>
    %cst_87 = arith.constant 0.000000e+00 : f32
    %98 = vector.broadcast %cst_87 : f32 to vector<16x121xf32>
    %99 = arith.cmpf oge, %97, %98 : vector<16x121xf32>
    %cst_88 = arith.constant 0.00999999977 : f32
    %100 = vector.broadcast %cst_88 : f32 to vector<16x121xf32>
    %101 = arith.mulf %100, %97 : vector<16x121xf32>
    %102 = arith.select %99, %97, %101 : vector<16x121xi1>, vector<16x121xf32>
    %c0_89 = arith.constant 0 : index
    %c0_90 = arith.constant 0 : index
    %c0_91 = arith.constant 0 : index
    %103 = vector.load %arg14[%c0_89, %c0_90, %c0_91] : memref<1x16x121xf32, #tpu.memory_space<vmem>>, vector<1x16x121xf32>
    %104 = vector.shape_cast %103 : vector<1x16x121xf32> to vector<16x121xf32>
    %105 = vector.shape_cast %102 : vector<16x121xf32> to vector<1x16x121xf32>
    tpu.vector_store %arg14[%c0_89, %c0_90, %c0_91], %105 {strides = array<i32>} : memref<1x16x121xf32, #tpu.memory_space<vmem>>, vector<1x16x121xf32>,
    return
  }
  func.func @transform_0(%arg0: i32) -> (i32, i32, i32) {
    %c0_i32 = arith.constant 0 : i32
    %c0_i32_0 = arith.constant 0 : i32
    %c0_i32_1 = arith.constant 0 : i32
    return %arg0, %c0_i32, %c0_i32_0 : i32, i32, i32
  }
  func.func @transform_1(%arg0: i32) -> (i32, i32) {
    %c0_i32 = arith.constant 0 : i32
    %c0_i32_0 = arith.constant 0 : i32
    %c0_i32_1 = arith.constant 0 : i32
    return %c0_i32, %c0_i32_0 : i32, i32
  }
  func.func @transform_2(%arg0: i32) -> (i32, i32) {
    %c0_i32 = arith.constant 0 : i32
    %c0_i32_0 = arith.constant 0 : i32
    %c0_i32_1 = arith.constant 0 : i32
    return %c0_i32, %c0_i32_0 : i32, i32
  }
  func.func @transform_3(%arg0: i32) -> (i32, i32) {
    %c0_i32 = arith.constant 0 : i32
    %c0_i32_0 = arith.constant 0 : i32
    %c0_i32_1 = arith.constant 0 : i32
    return %c0_i32, %c0_i32_0 : i32, i32
  }
  func.func @transform_4(%arg0: i32) -> (i32, i32) {
    %c0_i32 = arith.constant 0 : i32
    %c0_i32_0 = arith.constant 0 : i32
    %c0_i32_1 = arith.constant 0 : i32
    return %c0_i32, %c0_i32_0 : i32, i32
  }
  func.func @transform_5(%arg0: i32) -> (i32, i32) {
    %c0_i32 = arith.constant 0 : i32
    %c0_i32_0 = arith.constant 0 : i32
    %c0_i32_1 = arith.constant 0 : i32
    return %c0_i32, %c0_i32_0 : i32, i32
  }
  func.func @transform_6(%arg0: i32) -> (i32, i32) {
    %c0_i32 = arith.constant 0 : i32
    %c0_i32_0 = arith.constant 0 : i32
    %c0_i32_1 = arith.constant 0 : i32
    return %c0_i32, %c0_i32_0 : i32, i32
  }
  func.func @transform_7(%arg0: i32) -> (i32, i32) {
    %c0_i32 = arith.constant 0 : i32
    %c0_i32_0 = arith.constant 0 : i32
    %c0_i32_1 = arith.constant 0 : i32
    return %c0_i32, %c0_i32_0 : i32, i32
  }
  func.func @transform_8(%arg0: i32) -> (i32, i32) {
    %c0_i32 = arith.constant 0 : i32
    %c0_i32_0 = arith.constant 0 : i32
    %c0_i32_1 = arith.constant 0 : i32
    return %c0_i32, %c0_i32_0 : i32, i32
  }
  func.func @transform_9(%arg0: i32) -> (i32, i32) {
    %c0_i32 = arith.constant 0 : i32
    %c0_i32_0 = arith.constant 0 : i32
    %c0_i32_1 = arith.constant 0 : i32
    return %c0_i32, %c0_i32_0 : i32, i32
  }
  func.func @transform_10(%arg0: i32) -> (i32, i32) {
    %c0_i32 = arith.constant 0 : i32
    %c0_i32_0 = arith.constant 0 : i32
    %c0_i32_1 = arith.constant 0 : i32
    return %c0_i32, %c0_i32_0 : i32, i32
  }
  func.func @transform_11(%arg0: i32) -> (i32, i32) {
    %c0_i32 = arith.constant 0 : i32
    %c0_i32_0 = arith.constant 0 : i32
    %c0_i32_1 = arith.constant 0 : i32
    return %c0_i32, %c0_i32_0 : i32, i32
  }
  func.func @transform_12(%arg0: i32) -> (i32, i32) {
    %c0_i32 = arith.constant 0 : i32
    %c0_i32_0 = arith.constant 0 : i32
    %c0_i32_1 = arith.constant 0 : i32
    return %c0_i32, %c0_i32_0 : i32, i32
  }
  func.func @transform_13(%arg0: i32) -> (i32, i32, i32) {
    %c0_i32 = arith.constant 0 : i32
    %c0_i32_0 = arith.constant 0 : i32
    %c0_i32_1 = arith.constant 0 : i32
    return %arg0, %c0_i32, %c0_i32_0 : i32, i32, i32
  }
}

</mosaic_0001>

<bundles_post_ra>
// kernel: peak_forward.1
= control target key start
LH: loop header
LB: loop body
LE: loop exit
PB: predicated region body
PF: predicated region fallthrough
CT: control target
= control target key end

     0   :  { %s6037_s0 = inlined_call_operand.vmem [shape: f32[2,16,253], index: 0, kind: input, shape index: {}]   ;;  %s6038_s1 = inlined_call_operand.hbm [shape: f32[48,144], index: 1, kind: input, shape index: {}]   ;;  %s6039_s2 = inlined_call_operand.vmem [shape: f32[48,1], index: 2, kind: input, shape index: {}]   ;;  %s6040_s3 = inlined_call_operand.vmem [shape: f32[48,1], index: 3, kind: input, shape index: {}]   ;;  %s6041_s4 = inlined_call_operand.vmem [shape: f32[96,432], index: 4, kind: input, shape index: {}]   ;;  %s6042_s5 = inlined_call_operand.vmem [shape: f32[96,1], index: 5, kind: input, shape index: {}]   ;;  %s6043_s6 = inlined_call_operand.vmem [shape: f32[96,1], index: 6, kind: input, shape index: {}]   ;;  %s6044_s7 = inlined_call_operand.hbm [shape: f32[96,96], index: 7, kind: input, shape index: {}]   ;;  %s6045_s8 = inlined_call_operand.vmem [shape: f32[1,245], index: 8, kind: input, shape index: {}]   ;;  %s6046_s9 = inlined_call_operand.vmem [shape: f32[96,1], index: 9, kind: input, shape index: {}]   ;;  %s6047_s10 = inlined_call_operand.hbm [shape: f32[16,480], index: 10, kind: input, shape index: {}]   ;;  %s6048_s11 = inlined_call_operand.vmem [shape: f32[16,1], index: 11, kind: input, shape index: {}]   ;;  %s6049_s12 = inlined_call_operand.vmem [shape: f32[16,1], index: 12, kind: input, shape index: {}]   ;;  %s6050_s13 = inlined_call_operand.hbm [shape: f32[2,16,121], index: 13, kind: output, shape index: {}]  }
   0x1   :  { %6074 = sst [smem:[#allocation25_spill]] %s6044_s7 }
   0x2   :  { %6075 = sst [smem:[#allocation26_spill]] %s6050_s13 }
   0x3   :  { %18 = vsyncpa [#allocation6], 0 }
   0x4   :  { %19 = vsyncpa [#allocation9], 0 }
   0x5   :  { %20 = vsyncpa [#allocation7], 0 }
   0x6   :  { %22 = vsyncpa [#allocation7 + $0x1], 0  ;;  %s4812_s25 = smov 0   ;;  %s4814_s26 = smov 0  }
   0x7   :  { %s4816_s27 = smov 0   ;;  %s4818_s28 = smov 0  }
   0x8 LB: > { %6076 = sst [smem:[#allocation15_spill]] %s4703_s25  ;;  %s4833_s29 = sadd.s32 4294967295, %s4715_s28   ;;  %s4715_s28 = sphi %s4818_s28, %s6111_s28   ;;  %s4711_s27 = sphi %s4816_s27, %s6113_s27   ;;  %s4707_s26 = sphi %s4814_s26, %s6115_s26   ;;  %s4703_s25 = sphi %s4812_s25, %s6114_s25  }
   0x9   : > { %6077 = sst [smem:[#allocation16_spill]] %s4711_s27  ;;  %s3400_s30 = sadd.s32 4294967294, %s4715_s28  }
   0xa   : > { %6078 = sst [smem:[#allocation17_spill]] %s4715_s28  ;;  %s4837_s14 = sadd.s32 1, %s4715_s28  }
   0xb   : > { %6079 = sst [smem:[#allocation18_spill]] %s4837_s14  ;;  %s313_s15 = sadd.s32 1, %s4711_s27 }
   0xc   : > { %s310_s16 = ssub.s32 %s4715_s28, %s4837_s14  ;;  %p323_p0 = scmp.ne.s32.totalorder %s4711_s27, %s4707_s26 }
   0xd   : > { %p311_p1 = scmp.eq.s32.totalorder %s310_s16, 0  ;;  %p324_p2 = scmp.eq.s32.totalorder %s4833_s29, 1 }
   0xe   : > { %p329_p3 = scmp.ne.s32.totalorder %s4707_s26, %s4703_s25  ;;  %p330_p4 = scmp.eq.s32.totalorder %s3400_s30, 1 }
   0xf   : > { %s4848_s17 = scalar_select %p311_p1, %s4711_s27, %s313_s15  }
  0x10   : > { %p4850_p5 = por %p324_p2, %p323_p0  ;;  %p4854_p6 = por %p330_p4, %p329_p3 }
  0x11   : > { %6080 = sst [smem:[#allocation19_spill]] %s4848_s17  ;;  %p3401_p7 = scmp.ge.s32.totalorder %s4715_s28, 1 }
  0x12   : > { %s6081_s18 = scalar_select %p4850_p5, 1, 0 }
  0x13   : > { %s6083_s19 = scalar_select %p4854_p6, 1, 0 }
  0x14   : > { %6082 = sst [smem:[#allocation20_spill]] %s6081_s18  ;;  %p337_p8 = scmp.lt.s32.totalorder %s4715_s28, 3 }
  0x15   : > { %6084 = sst [smem:[#allocation21_spill]] %s6083_s19  ;;  %p6055_p9 = scmp.eq.s32.totalorder %s4833_s29, 0 }
  0x16   : > { %p4861_p10 = pnand %p3401_p7, %p337_p8  ;;  %s4717_s21 = smov [#allocation8]  }
  0x17   : > { %s377_s22 = sshll.u32 %s4717_s21, 4  ;;  %s4718_s24 = smov [#allocation5]   ;;  %s378_s22 = int_to_ptr.vmem [resolvable:$true] %s377_s22 }
  0x18   : > { %s6085_s20 = scalar_select %p4861_p10, 1, 0 }
  0x19   : > { %p3891_p11 = pneg %p4861_p10  ;;  %s349_s30 = sshll.u32 %s4718_s24, 4  ;;  %s4873_s30 = int_to_ptr.vmem [resolvable:$true] %s349_s30 }
  0x1a   : > { %s6087_s7 = sld [smem:[#allocation25_spill]] }
  0x1b   : > { %p4869_p12 = pnand %p6055_p9, %p3891_p11 }
  0x1d   : > { %p4883_p0 = pneg %p4869_p12 }
  0x20   : > { %s4561_s17 = scalar_lea.hbm %s6087_s7, 1536 }
  0x21   : > { %p4562_p13 = scmp.ne.s32.totalorder %s6087_s7, %s4561_s17  ;;  %p4568_p3 = scmp.lt.u32.totalorder %s4561_s17, %s6087_s7 }
  0x23   : > { %p4564_p1 = pnand %p4883_p0, %p4562_p13 }
  0x25   : > { %p4565_p2 = pneg %p4564_p1 }
  0x27   : > { %p4570_p4 = pnand %p4568_p3, %p4565_p2 }
  0x29   : > { %4573 = shalt.err (!%p4570_p4)
}
  0x2a   : > { %s4574_s15 = scalar_lea.vmem %s378_s22, 1536  ;;  %p4582_p9 = scmp.lt.s32.totalorder %s378_s22, %s378_s22 }
  0x2b   : > { %p4575_p7 = scmp.ne.s32.totalorder %s378_s22, %s4574_s15  ;;  %p4583_p6 = scmp.lt.s32.totalorder %s4574_s15, %s4574_s15 }
  0x2d   : > { %p4577_p8 = pnand %p4575_p7, %p4883_p0  ;;  %p4584_p5 = por %p4583_p6, %p4582_p9 }
  0x2f   : > { %p4578_p11 = pneg %p4577_p8 }
  0x31   : > { %p4585_p10 = pnand %p4584_p5, %p4578_p11 }
  0x33   : > { %4588 = shalt.err (!%p4585_p10)
}
  0x34   : > { %s4719_s27 = smov 128   ;;  %s4720_s14 = smov 8  }
  0x35   : > { %3897 = dma.hbm_to_vmem [thread:$0]  (!%p4869_p12), %s6087_s7, 1536, %s378_s22, [#allocation9], %s4719_s27, %s4719_s27, %s4720_s14  }
  0x36   : > { %s4589_s25 = scalar_lea.hbm %s6038_s1, 1536 }
  0x37   : > { %p4590_p13 = scmp.ne.s32.totalorder %s6038_s1, %s4589_s25  ;;  %p4596_p9 = scmp.lt.u32.totalorder %s4589_s25, %s6038_s1 }
  0x39   : > { %p4592_p5 = pnand %p4590_p13, %p4883_p0 }
  0x3b   : > { %p4593_p6 = pneg %p4592_p5 }
  0x3d   : > { %p4598_p10 = pnand %p4596_p9, %p4593_p6 }
  0x3f   : > { %4601 = shalt.err (!%p4598_p10)
}
  0x40   : > { %s4602_s22 = scalar_lea.vmem %s4873_s30, 1536  ;;  %p4610_p4 = scmp.lt.s32.totalorder %s4873_s30, %s4873_s30 }
  0x41   : > { %p4603_p1 = scmp.ne.s32.totalorder %s4873_s30, %s4602_s22  ;;  %p4611_p7 = scmp.lt.s32.totalorder %s4602_s22, %s4602_s22 }
  0x43   : > { %p4605_p2 = pnand %p4603_p1, %p4883_p0  ;;  %p4612_p8 = por %p4611_p7, %p4610_p4 }
  0x45   : > { %p4606_p3 = pneg %p4605_p2 }
  0x47   : > { %p4613_p11 = pnand %p4612_p8, %p4606_p3 }
  0x49   : > { %4616 = shalt.err (!%p4613_p11)
}
  0x4a   : > { %s4721_s13 = smov 256   ;;  %s4722_s25 = smov 16  }
  0x4b   : > { %3894 = dma.hbm_to_vmem [thread:$0]  (!%p4869_p12), %s6038_s1, 1536, %s4873_s30, [#allocation6], %s4721_s13, %s4721_s13, %s4722_s25  }
  0x4c   : > { %s4723_s27 = smov [#allocation10]   ;;  %s4617_s16 = scalar_lea.hbm %s6047_s10, 1024 }
  0x4d   : > { %s396_s14 = sshll.u32 %s4723_s27, 4  ;;  %p4618_p13 = scmp.ne.s32.totalorder %s6047_s10, %s4617_s16  ;;  %s397_s14 = int_to_ptr.vmem [resolvable:$true] %s396_s14 }
  0x4e   : > { %p4624_p9 = scmp.lt.u32.totalorder %s4617_s16, %s6047_s10 }
  0x4f   : > { %p4620_p5 = pnand %p4618_p13, %p4883_p0 }
  0x51   : > { %p4621_p6 = pneg %p4620_p5 }
  0x53   : > { %p4626_p10 = pnand %p4624_p9, %p4621_p6 }
  0x55   : > { %4629 = shalt.err (!%p4626_p10)
}
  0x56   : > { %s4630_s30 = scalar_lea.vmem %s397_s14, 1024  ;;  %p4638_p4 = scmp.lt.s32.totalorder %s397_s14, %s397_s14 }
  0x57   : > { %p4631_p1 = scmp.ne.s32.totalorder %s397_s14, %s4630_s30  ;;  %p4639_p7 = scmp.lt.s32.totalorder %s4630_s30, %s4630_s30 }
  0x59   : > { %p4633_p2 = pnand %p4631_p1, %p4883_p0  ;;  %p4640_p8 = por %p4639_p7, %p4638_p4 }
  0x5b   : > { %p4634_p3 = pneg %p4633_p2 }
  0x5d   : > { %p4641_p11 = pnand %p4640_p8, %p4634_p3 }
  0x5f   : > { %4644 = shalt.err (!%p4641_p11)
}
  0x60   : > { %s4724_s13 = smov 512   ;;  %s4725_s25 = smov 32  }
  0x61   : > { %3900 = dma.hbm_to_vmem [thread:$0]  (!%p4869_p12), %s6047_s10, 1024, %s397_s14, [#allocation9], %s4724_s13, %s4724_s13, %s4725_s25  }
  0x62   : > { %p6089_p13 = scmp.ne.s32.totalorder %s6085_s20, 0 }
  0x64   : > { %426 = sbr.rel (%p6089_p13) target bundleno = 2555 (0x9fb), region = 72 }
  0x6b   : > { %p6090_p5 = scmp.eq.s32.totalorder %s4833_s29, 0 }
  0x6d   : > { %4690 = dma.done.wait (%p6090_p5), [#allocation6], 1536   ;;  %p6091_p0 = pmov %p6090_p5 }
  0x6f   : > { %4692 = vsyncadd (%p6091_p0), [#allocation6], 4294965760  ;;  %p6092_p6 = pmov %p6091_p0 }
  0x70   : > { %p6093_p9 = pmov %p6091_p0 }
  0x71   : > { %4694 = dma.done.wait (%p6092_p6), [#allocation9], 2560  }
  0x72   : > { %4696 = vsyncadd (%p6093_p9), [#allocation9], 4294964736  ;;  %p478_p10 = scmp.lt.s32.totalorder %s4833_s29, 1  ;;  %v6067_v0 = vmov 0.0   ;;  %vm485_vm0 = vcmask 7168   ;;  %s4727_s14 = smov 2  }
  0x73   : > { %487 = vst [vmem:[#allocation2 + $0x18] sm:$0xff] %v6067_v0  ;;  %483 = vst [vmem:[#allocation2] sm:$0xff] %v6067_v0  ;;  %vm513_vm1 = vcmask 1047568   ;;  %vm506_vm2 = vcmask 15360   ;;  %vm515_vm3 = vcmask 1039360   ;;  %s4728_s19 = smov 127  }
  0x74   : > { %484 = vst [vmem:[#allocation2 + $0x8] sm:$0xff] %v6067_v0  ;;  %488 = vst [vmem:[#allocation2 + $0x20] sm:$0xff] %v6067_v0  ;;  %s479_s20 = scalar_select %p478_p10, %s4833_s29, 1  ;;  %vm566_vm4 = vcmask 1022976   ;;  %v657_v21 = vld [vmem:[#allocation5 + $0x8] sm:$0xff]  ;;  %vm668_vm5 = vcmask 130048  }
  0x75   : > { %920 = vst [vmem:[#allocation3] sm:$0xff] %v6067_v0  ;;  %922 = vst [vmem:[#allocation3 + $0x10] sm:$0xff] %v6067_v0  ;;  %s4729_s17 = smov 126   ;;  %s4730_s16 = smov 125   ;;  %3413 = vmatprep.mubr.msk.f32.mxu0 %vm668_vm5, %v657_v21  ;;  %v788_v25 = vld [vmem:[%s6039_s2] sm:$0xff]  ;;  %v4736_v26 = vmov 0  }
  0x76   : > { %924 = vst [vmem:[#allocation3 + $0x20] sm:$0xff] %v6067_v0  ;;  %926 = vst [vmem:[#allocation3 + $0x30] sm:$0xff] %v6067_v0  ;;  %s3514_s23 = sshll.u32 %s479_s20, 5  ;;  %s4731_s24 = smov 124   ;;  %4053 = vset.pattern.permute.xlu1 %v4736_v26  ;;  %4054 = vset.pattern.permute.xlu0 %v4736_v26  ;;  %v789_v27 = vld [vmem:[%s6039_s2 + $0x8] sm:$0xff]  ;;  %v836_v28 = vld [vmem:[%s6040_s3] sm:$0xff] }
  0x77   : > { %928 = vst [vmem:[#allocation3 + $0x40] sm:$0xff] %v6067_v0  ;;  %930 = vst [vmem:[#allocation3 + $0x50] sm:$0xff] %v6067_v0  ;;  %s482_s27 = scalar_lea.vmem %s6037_s0, %s3514_s23  ;;  %s4732_s15 = smov 123   ;;  %v790_v29 = vld [vmem:[%s6039_s2 + $0x10] sm:$0xff]  ;;  %v837_v30 = vld [vmem:[%s6040_s3 + $0x8] sm:$0xff]  ;;  %vm551_vm6 = vcmask 1031168  }
  0x78   : > { %489 = vst.msk [vmem:[#allocation2 + $0x28] sm:$0xff] %vm485_vm0, %v6067_v0  ;;  %486 = vst.msk [vmem:[#allocation2 + $0x10] sm:$0xff] %vm485_vm0, %v6067_v0  ;;  %v492_v1 = vld [vmem:[%s482_s27 + $0x10] sm:$0xff]  ;;  %v490_v2 = vld [vmem:[%s482_s27] sm:$0xff]  ;;  %s4733_s22 = smov 122   ;;  %s6065_s30 = smov 121  }
  0x79   : > { %502 = vrot.lane.b32.xlu1 %v492_v1, %s4727_s14  ;;  %498 = vrot.lane.b32.xlu0 %v490_v2, %s4727_s14  ;;  %v493_v3 = vld [vmem:[%s482_s27 + $0x18] sm:$0xff]  ;;  %v491_v4 = vld [vmem:[%s482_s27 + $0x8] sm:$0xff]  ;;  %921 = vst.msk [vmem:[#allocation3 + $0x8] sm:$0xff] %vm566_vm4, %v6067_v0  ;;  %923 = vst.msk [vmem:[#allocation3 + $0x18] sm:$0xff] %vm566_vm4, %v6067_v0  ;;  %s6063_s13 = smov 120   ;;  %vm581_vm7 = vcmask 1014784  }
  0x7a   : > { %925 = vst.msk [vmem:[#allocation3 + $0x28] sm:$0xff] %vm566_vm4, %v6067_v0  ;;  %927 = vst.msk [vmem:[#allocation3 + $0x38] sm:$0xff] %vm566_vm4, %v6067_v0  ;;  %v838_v31 = vld [vmem:[%s6040_s3 + $0x10] sm:$0xff]  ;;  %v791_v32 = vld [vmem:[%s6039_s2 + $0x18] sm:$0xff]  ;;  %vm596_vm8 = vcmask 1006592   ;;  %vm611_vm9 = vcmask 998400  }
  0x7b   : > { %929 = vst.msk [vmem:[#allocation3 + $0x48] sm:$0xff] %vm566_vm4, %v6067_v0  ;;  %931 = vst.msk [vmem:[#allocation3 + $0x58] sm:$0xff] %vm566_vm4, %v6067_v0  ;;  %v792_v33 = vld [vmem:[%s6039_s2 + $0x20] sm:$0xff]  ;;  %v839_v34 = vld [vmem:[%s6040_s3 + $0x18] sm:$0xff]  ;;  %vm626_vm10 = vcmask 990208   ;;  %vm647_vm11 = vcmask 982016  }
  0x7c   : > { %v840_v35 = vld [vmem:[%s6040_s3 + $0x20] sm:$0xff]  ;;  %v793_v36 = vld [vmem:[%s6039_s2 + $0x28] sm:$0xff]  ;;  %s6094_s21 = smov 121  }
  0x7d   : > { %504 = vrot.lane.b32.xlu1 %v493_v3, %s4727_s14  ;;  %500 = vrot.lane.b32.xlu0 %v491_v4, %s4727_s14  ;;  %v841_v37 = vld [vmem:[%s6040_s3 + $0x28] sm:$0xff] }
  0x7f   : > { %v524_v19 = vld [vmem:[#allocation2 + $0x28] sm:$0xff]  ;;  %v523_v20 = vld [vmem:[#allocation2 + $0x10] sm:$0xff] }
  0xeb   : > { %v503_v5 = vpop.permute.xlu1 %502  ;;  %v499_v6 = vpop.permute.xlu0 %498 }
  0xec   : > { %517 = vst.msk [vmem:[#allocation2 + $0x18] sm:$0xff] %vm513_vm1, %v503_v5  ;;  %514 = vst.msk [vmem:[#allocation2] sm:$0xff] %vm513_vm1, %v499_v6 }
  0xef   : > { %v505_v7 = vpop.permute.xlu1 %504  ;;  %v501_v8 = vpop.permute.xlu0 %500 }
  0xf0   : > { %v508_v9 = vsel %vm506_vm2, %v503_v5, %v505_v7  ;;  %v507_v10 = vsel %vm506_vm2, %v499_v6, %v501_v8 }
  0xf1   : > { %518 = vst.msk [vmem:[#allocation2 + $0x20] sm:$0xff] %vm515_vm3, %v508_v9  ;;  %516 = vst.msk [vmem:[#allocation2 + $0x8] sm:$0xff] %vm515_vm3, %v507_v10 }
  0xf3   : > { %v521_v11 = vld [vmem:[#allocation2 + $0x18] sm:$0xff]  ;;  %v519_v12 = vld [vmem:[#allocation2] sm:$0xff] }
  0xf4   : > { %v3518_v18 = vpack.c.bf16 %v521_v11, %v519_v12  ;;  %v4048_v24 = vpack.i.bf16 %v521_v11, %v519_v12 }
  0xf8   : > { %v522_v13 = vld [vmem:[#allocation2 + $0x20] sm:$0xff]  ;;  %v520_v14 = vld [vmem:[#allocation2 + $0x8] sm:$0xff] }
  0xf9   : > { %v3973_v15 = vpack.i.bf16 %v522_v13, %v521_v11  ;;  %v3516_v16 = vpack.c.bf16 %v522_v13, %v520_v14  ;;  %v3968_v17 = vpack.i.bf16 %v520_v14, %v519_v12  ;;  %v4043_v22 = vpack.i.bf16 %v524_v19, %v522_v13 }
  0xfa   : > { %v4038_v23 = vpack.i.bf16 %v523_v20, %v520_v14 }
  0xfb   : > { %3974 = vrot.lane.b32.xlu1 %v3973_v15, %s4728_s19  ;;  %3517 = vmatprep.subr.bf16.mxu0 %v3516_v16 }
  0xfc   : > { %3969 = vrot.lane.b32.xlu0 %v3968_v17, %s4728_s19  ;;  %3519 = vmatpush1.bf16.msra.mxu0 %v3518_v18 }
  0xff   : > { %3984 = vrot.lane.b32.xlu1 %v3973_v15, %s4729_s17 }
 0x100   : > { %3979 = vrot.lane.b32.xlu0 %v3968_v17, %s4729_s17 }
 0x103   : > { %3994 = vrot.lane.b32.xlu1 %v3973_v15, %s4730_s16 }
 0x104   : > { %3989 = vrot.lane.b32.xlu0 %v3968_v17, %s4730_s16 }
 0x107   : > { %4004 = vrot.lane.b32.xlu1 %v3973_v15, %s4731_s24 }
 0x108   : > { %3999 = vrot.lane.b32.xlu0 %v3968_v17, %s4731_s24 }
 0x10b   : > { %4014 = vrot.lane.b32.xlu1 %v3973_v15, %s4732_s15 }
 0x10c   : > { %4009 = vrot.lane.b32.xlu0 %v3968_v17, %s4732_s15 }
 0x10f   : > { %4024 = vrot.lane.b32.xlu1 %v3973_v15, %s4733_s22 }
 0x110   : > { %4019 = vrot.lane.b32.xlu0 %v3968_v17, %s4733_s22 }
 0x113   : > { %4034 = vrot.lane.b32.xlu1 %v3973_v15, %s6065_s30 }
 0x114   : > { %4029 = vrot.lane.b32.xlu0 %v3968_v17, %s6065_s30  ;;  %s6104_s30 = sld [smem:[#allocation20_spill]] }
 0x117   : > { %4044 = vrot.lane.b32.xlu1 %v4043_v22, %s6063_s13 }
 0x118   : > { %4039 = vrot.lane.b32.xlu0 %v4038_v23, %s6063_s13 }
 0x11a   : > { %p6106_p1 = scmp.ne.s32.totalorder %s6104_s30, 0 }
 0x11b   : > { %796 = vperm.xlu1 %4053, %v788_v25  }
 0x11c   : > { %4049 = vrot.lane.b32.xlu0 %v4048_v24, %s6063_s13  ;;  %s3515_s13 = sshll.u32 %s4833_s29, 8 }
 0x11f   : > { %844 = vperm.xlu1 %4053, %v836_v28  }
 0x120   : > { %801 = vperm.xlu0 %4054, %v789_v27  }
 0x123   : > { %849 = vperm.xlu1 %4053, %v837_v30  }
 0x124   : > { %806 = vperm.xlu0 %4054, %v790_v29  }
 0x127   : > { %811 = vperm.xlu1 %4053, %v791_v32  }
 0x128   : > { %854 = vperm.xlu0 %4054, %v838_v31  }
 0x12b   : > { %859 = vperm.xlu1 %4053, %v839_v34  }
 0x12c   : > { %816 = vperm.xlu0 %4054, %v792_v33  }
 0x12f   : > { %821 = vperm.xlu1 %4053, %v793_v36  }
 0x130   : > { %864 = vperm.xlu0 %4054, %v840_v35  }
 0x133   : > { %869 = vperm.xlu1 %4053, %v841_v37  }
 0x16d   : > { %v3975_v38 = vpop.permute.xlu1 %3974 }
 0x16e   : > { %v3977_v39 = vunpack.i.h.bf16 %v3975_v38  ;;  %v3976_v40 = vunpack.i.l.bf16 %v3975_v38  ;;  %v3970_v41 = vpop.permute.xlu0 %3969 }
 0x16f   : > { %v3972_v42 = vunpack.i.h.bf16 %v3970_v41  ;;  %v3971_v43 = vunpack.i.l.bf16 %v3970_v41 }
 0x170   : > { %v538_v44 = vsel %vm515_vm3, %v3976_v40, %v3977_v39 }
 0x171   : > { %v3985_v45 = vpop.permute.xlu1 %3984  ;;  %v3520_v46 = vpack.c.bf16 %v3977_v39, %v3972_v42  ;;  %v537_v47 = vsel %vm515_vm3, %v3971_v43, %v3972_v42 }
 0x172   : > { %v3987_v48 = vunpack.i.h.bf16 %v3985_v45  ;;  %v3986_v49 = vunpack.i.l.bf16 %v3985_v45  ;;  %v3980_v50 = vpop.permute.xlu0 %3979  ;;  %v3522_v51 = vpack.c.bf16 %v538_v44, %v537_v47 }
 0x173   : > { %v3982_v52 = vunpack.i.h.bf16 %v3980_v50  ;;  %v3981_v53 = vunpack.i.l.bf16 %v3980_v50  ;;  %3521 = vmatprep.subr.bf16.mxu0 %v3520_v46 }
 0x174   : > { %3523 = vmatpush1.bf16.msra.mxu0 %v3522_v51  ;;  %v553_v54 = vsel %vm551_vm6, %v3986_v49, %v3987_v48 }
 0x175   : > { %v3995_v55 = vpop.permute.xlu1 %3994  ;;  %v3524_v56 = vpack.c.bf16 %v3987_v48, %v3982_v52  ;;  %v552_v57 = vsel %vm551_vm6, %v3981_v53, %v3982_v52 }
 0x176   : > { %v3997_v58 = vunpack.i.h.bf16 %v3995_v55  ;;  %v3996_v59 = vunpack.i.l.bf16 %v3995_v55  ;;  %v3990_v60 = vpop.permute.xlu0 %3989  ;;  %v3526_v61 = vpack.c.bf16 %v553_v54, %v552_v57 }
 0x177   : > { %v3992_v62 = vunpack.i.h.bf16 %v3990_v60  ;;  %v3991_v63 = vunpack.i.l.bf16 %v3990_v60  ;;  %3525 = vmatprep.subr.bf16.mxu0 %v3524_v56  ;;  %v656_v60 = vld [vmem:[#allocation5] sm:$0xff] }
 0x178   : > { %3527 = vmatpush1.bf16.msra.mxu0 %v3526_v61  ;;  %v568_v1 = vsel %vm566_vm4, %v3996_v59, %v3997_v58  ;;  %v659_v61 = vld [vmem:[#allocation5 + $0x18] sm:$0xff] }
 0x179   : > { %v4005_v2 = vpop.permute.xlu1 %4004  ;;  %v3528_v3 = vpack.c.bf16 %v3997_v58, %v3992_v62  ;;  %v567_v4 = vsel %vm566_vm4, %v3991_v63, %v3992_v62  ;;  %v658_v62 = vld [vmem:[#allocation5 + $0x10] sm:$0xff]  ;;  %v661_v63 = vld [vmem:[#allocation5 + $0x28] sm:$0xff] }
 0x17a   : > { %v4007_v5 = vunpack.i.h.bf16 %v4005_v2  ;;  %v4006_v6 = vunpack.i.l.bf16 %v4005_v2  ;;  %v4000_v7 = vpop.permute.xlu0 %3999  ;;  %v3530_v8 = vpack.c.bf16 %v568_v1, %v567_v4  ;;  %v660_v1 = vld [vmem:[#allocation5 + $0x20] sm:$0xff]  ;;  %v663_v2 = vld [vmem:[#allocation5 + $0x38] sm:$0xff]  ;;  %v665_v4 = vld [vmem:[#allocation5 + $0x48] sm:$0xff] }
 0x17b   : > { %v4002_v9 = vunpack.i.h.bf16 %v4000_v7  ;;  %v4001_v10 = vunpack.i.l.bf16 %v4000_v7  ;;  %3529 = vmatprep.subr.bf16.mxu0 %v3528_v3  ;;  %v662_v3 = vld [vmem:[#allocation5 + $0x30] sm:$0xff] }
 0x17c   : > { %3531 = vmatpush1.bf16.msra.mxu0 %v3530_v8  ;;  %v583_v11 = vsel %vm581_vm7, %v4006_v6, %v4007_v5  ;;  %v667_v6 = vld [vmem:[#allocation5 + $0x58] sm:$0xff]  ;;  %v666_v7 = vld [vmem:[#allocation5 + $0x50] sm:$0xff] }
 0x17d   : > { %v4015_v12 = vpop.permute.xlu1 %4014  ;;  %v3532_v13 = vpack.c.bf16 %v4007_v5, %v4002_v9  ;;  %v582_v14 = vsel %vm581_vm7, %v4001_v10, %v4002_v9  ;;  %v664_v5 = vld [vmem:[#allocation5 + $0x40] sm:$0xff] }
 0x17e   : > { %v4017_v15 = vunpack.i.h.bf16 %v4015_v12  ;;  %v4016_v16 = vunpack.i.l.bf16 %v4015_v12  ;;  %v4010_v17 = vpop.permute.xlu0 %4009  ;;  %v3534_v18 = vpack.c.bf16 %v583_v11, %v582_v14 }
 0x17f   : > { %v4012_v19 = vunpack.i.h.bf16 %v4010_v17  ;;  %v4011_v20 = vunpack.i.l.bf16 %v4010_v17  ;;  %3533 = vmatprep.subr.bf16.mxu0 %v3532_v13 }
 0x180   : > { %3535 = vmatpush1.bf16.msra.mxu0 %v3534_v18  ;;  %v598_v21 = vsel %vm596_vm8, %v4016_v16, %v4017_v15 }
 0x181   : > { %v4025_v22 = vpop.permute.xlu1 %4024  ;;  %v3536_v23 = vpack.c.bf16 %v4017_v15, %v4012_v19  ;;  %v597_v24 = vsel %vm596_vm8, %v4011_v20, %v4012_v19 }
 0x182   : > { %v4027_v25 = vunpack.i.h.bf16 %v4025_v22  ;;  %v4026_v26 = vunpack.i.l.bf16 %v4025_v22  ;;  %v4020_v27 = vpop.permute.xlu0 %4019  ;;  %v3538_v28 = vpack.c.bf16 %v598_v21, %v597_v24 }
 0x183   : > { %v4022_v29 = vunpack.i.h.bf16 %v4020_v27  ;;  %v4021_v30 = vunpack.i.l.bf16 %v4020_v27  ;;  %3537 = vmatprep.subr.bf16.mxu0 %v3536_v23 }
 0x184   : > { %3539 = vmatpush1.bf16.msra.mxu0 %v3538_v28  ;;  %v613_v31 = vsel %vm611_vm9, %v4026_v26, %v4027_v25 }
 0x185   : > { %v4035_v32 = vpop.permute.xlu1 %4034  ;;  %v3540_v33 = vpack.c.bf16 %v4027_v25, %v4022_v29  ;;  %v612_v34 = vsel %vm611_vm9, %v4021_v30, %v4022_v29 }
 0x186   : > { %v4037_v35 = vunpack.i.h.bf16 %v4035_v32  ;;  %v4036_v36 = vunpack.i.l.bf16 %v4035_v32  ;;  %v4030_v37 = vpop.permute.xlu0 %4029  ;;  %v3542_v38 = vpack.c.bf16 %v613_v31, %v612_v34 }
 0x187   : > { %v4032_v39 = vunpack.i.h.bf16 %v4030_v37  ;;  %v4031_v40 = vunpack.i.l.bf16 %v4030_v37  ;;  %3541 = vmatprep.subr.bf16.mxu0 %v3540_v33 }
 0x188   : > { %3543 = vmatpush1.bf16.msra.mxu0 %v3542_v38  ;;  %v628_v41 = vsel %vm626_vm10, %v4036_v36, %v4037_v35 }
 0x189   : > { %v4045_v42 = vpop.permute.xlu1 %4044  ;;  %v3544_v43 = vpack.c.bf16 %v4037_v35, %v4032_v39  ;;  %v627_v44 = vsel %vm626_vm10, %v4031_v40, %v4032_v39 }
 0x18a   : > { %v4047_v45 = vunpack.i.h.bf16 %v4045_v42  ;;  %v4046_v46 = vunpack.i.l.bf16 %v4045_v42  ;;  %v4040_v47 = vpop.permute.xlu0 %4039  ;;  %v3546_v48 = vpack.c.bf16 %v628_v41, %v627_v44 }
 0x18b   : > { %v4042_v49 = vunpack.i.h.bf16 %v4040_v47  ;;  %v4041_v50 = vunpack.i.l.bf16 %v4040_v47  ;;  %3545 = vmatprep.subr.bf16.mxu0 %v3544_v43 }
 0x18c   : > { %3547 = vmatpush1.bf16.msra.mxu0 %v3546_v48  ;;  %v651_v51 = vsel %vm647_vm11, %v4046_v46, %v4047_v45 }
 0x18d   : > { %v649_v52 = vsel %vm647_vm11, %v4041_v50, %v4042_v49 }
 0x18e   : > { %v4050_v53 = vpop.permute.xlu0 %4049  ;;  %v3548_v54 = vpack.c.bf16 %v651_v51, %v649_v52 }
 0x18f   : > { %v4052_v55 = vunpack.i.h.bf16 %v4050_v53  ;;  %v4051_v56 = vunpack.i.l.bf16 %v4050_v53 }
 0x190   : > { %3549 = vmatprep.subr.bf16.mxu0 %v3548_v54 }
 0x191   : > { %v648_v57 = vsel %vm647_vm11, %v4051_v56, %v4041_v50  ;;  %v650_v58 = vsel %vm647_vm11, %v4052_v55, %v4046_v46 }
 0x192   : > { %v3550_v59 = vpack.c.bf16 %v650_v58, %v648_v57 }
 0x194   : > { %3551 = vmatpush1.bf16.msra.mxu0 %v3550_v59 }
 0x197   : > { %752 = vmatmul.mubr.f32.vlgmr.msra.gmra.mrb[0].mxu0 %v656_v60 }
 0x198   : > { %3414 = vmatprep.mubr.msk.f32.mxu0 %vm668_vm5, %v659_v61 }
 0x19a   : > { %v797_v8 = vpop.permute.xlu1 %796 }
 0x19b   : > { %758 = vmatmul.mubr.f32.gmra.mrb[2].mxu0 %v658_v62 }
 0x19c   : > { %3415 = vmatprep.mubr.msk.f32.mxu0 %vm668_vm5, %v661_v63 }
 0x19e   : > { %v845_v9 = vpop.permute.xlu1 %844 }
 0x19f   : > { %764 = vmatmul.mubr.f32.gmra.mrb[4].mxu0 %v660_v1  ;;  %v802_v10 = vpop.permute.xlu0 %801 }
 0x1a0   : > { %3416 = vmatprep.mubr.msk.f32.mxu0 %vm668_vm5, %v663_v2 }
 0x1a2   : > { %v850_v11 = vpop.permute.xlu1 %849 }
 0x1a3   : > { %770 = vmatmul.mubr.f32.gmra.mrb[6].mxu0 %v662_v3  ;;  %v807_v12 = vpop.permute.xlu0 %806 }
 0x1a4   : > { %3417 = vmatprep.mubr.msk.f32.mxu0 %vm668_vm5, %v665_v4 }
 0x1a6   : > { %v812_v18 = vpop.permute.xlu1 %811 }
 0x1a7   : > { %776 = vmatmul.mubr.f32.gmra.mrb[8].mxu0 %v664_v5  ;;  %v855_v24 = vpop.permute.xlu0 %854 }
 0x1a8   : > { %3418 = vmatprep.mubr.msk.f32.mxu0 %vm668_vm5, %v667_v6 }
 0x1aa   : > { %v860_v35 = vpop.permute.xlu1 %859 }
 0x1ab   : > { %782 = vmatmul.mubr.f32.gmra.mrb[10].mxu0 %v666_v7  ;;  %v817_v40 = vpop.permute.xlu0 %816 }
 0x1ac   : > { %2094 = vmatprep.mubr.f32.mxu0 %v6067_v0 }
 0x1ae   : > { %v822_v51 = vpop.permute.xlu1 %821 }
 0x1af   : > { %v865_v58 = vpop.permute.xlu0 %864 }
 0x1b2   : > { %v870_v6 = vpop.permute.xlu1 %869 }
 0x26a   : > { %v753_v13 = vpop.f32.mrb[0].mxu0 }
 0x26b   : > { %v824_v14 = vmul.f32 %v797_v8, %v753_v13  ;;  %v755_v15 = vpop.f32.mrb[1].mxu0 }
 0x26c   : > { %v825_v16 = vmul.f32 %v797_v8, %v755_v15 }
 0x26d   : > { %v872_v17 = vadd.f32 %v845_v9, %v824_v14 }
 0x26e   : > { %v873_v19 = vadd.f32 %v845_v9, %v825_v16  ;;  %v759_v20 = vpop.f32.mrb[2].mxu0 }
 0x26f   : > { %v826_v21 = vmul.f32 %v802_v10, %v759_v20  ;;  %v761_v22 = vpop.f32.mrb[3].mxu0  ;;  %vm884_vm12 = vcmp.ge.f32.partialorder %v872_v17, 0.0  ;;  %v896_v23 = vmul.f32 0.01, %v872_v17 }
 0x270   : > { %v827_v25 = vmul.f32 %v802_v10, %v761_v22  ;;  %vm885_vm13 = vcmp.ge.f32.partialorder %v873_v19, 0.0  ;;  %v897_v26 = vmul.f32 0.01, %v873_v19 }
 0x271   : > { %v874_v27 = vadd.f32 %v850_v11, %v826_v21  ;;  %v908_v28 = vsel %vm884_vm12, %v872_v17, %v896_v23 }
 0x272   : > { %v875_v29 = vadd.f32 %v850_v11, %v827_v25  ;;  %944 = vrot.lane.b32.xlu0 %v908_v28, %s4727_s14  ;;  %v765_v30 = vpop.f32.mrb[4].mxu0  ;;  %v909_v31 = vsel %vm885_vm13, %v873_v19, %v897_v26 }
 0x273   : > { %v828_v32 = vmul.f32 %v807_v12, %v765_v30  ;;  %946 = vrot.lane.b32.xlu1 %v909_v31, %s4727_s14  ;;  %v767_v33 = vpop.f32.mrb[5].mxu0  ;;  %vm886_vm14 = vcmp.ge.f32.partialorder %v874_v27, 0.0  ;;  %v898_v34 = vmul.f32 0.01, %v874_v27 }
 0x274   : > { %v829_v36 = vmul.f32 %v807_v12, %v767_v33  ;;  %vm887_vm15 = vcmp.ge.f32.partialorder %v875_v29, 0.0  ;;  %v899_v37 = vmul.f32 0.01, %v875_v29 }
 0x275   : > { %v876_v38 = vadd.f32 %v855_v24, %v828_v32  ;;  %v910_v39 = vsel %vm886_vm14, %v874_v27, %v898_v34 }
 0x276   : > { %v877_v41 = vadd.f32 %v855_v24, %v829_v36  ;;  %948 = vrot.lane.b32.xlu0 %v910_v39, %s4727_s14  ;;  %v771_v42 = vpop.f32.mrb[6].mxu0  ;;  %v911_v43 = vsel %vm887_vm15, %v875_v29, %v899_v37 }
 0x277   : > { %v830_v44 = vmul.f32 %v812_v18, %v771_v42  ;;  %950 = vrot.lane.b32.xlu1 %v911_v43, %s4727_s14  ;;  %v773_v45 = vpop.f32.mrb[7].mxu0  ;;  %vm888_vm5 = vcmp.ge.f32.partialorder %v876_v38, 0.0  ;;  %v900_v46 = vmul.f32 0.01, %v876_v38 }
 0x278   : > { %v831_v47 = vmul.f32 %v812_v18, %v773_v45  ;;  %vm889_vm12 = vcmp.ge.f32.partialorder %v877_v41, 0.0  ;;  %v901_v48 = vmul.f32 0.01, %v877_v41 }
 0x279   : > { %v878_v49 = vadd.f32 %v860_v35, %v830_v44  ;;  %v912_v50 = vsel %vm888_vm5, %v876_v38, %v900_v46 }
 0x27a   : > { %v879_v52 = vadd.f32 %v860_v35, %v831_v47  ;;  %952 = vrot.lane.b32.xlu0 %v912_v50, %s4727_s14  ;;  %v777_v53 = vpop.f32.mrb[8].mxu0  ;;  %v913_v54 = vsel %vm889_vm12, %v877_v41, %v901_v48 }
 0x27b   : > { %v832_v55 = vmul.f32 %v817_v40, %v777_v53  ;;  %954 = vrot.lane.b32.xlu1 %v913_v54, %s4727_s14  ;;  %v779_v56 = vpop.f32.mrb[9].mxu0  ;;  %vm890_vm13 = vcmp.ge.f32.partialorder %v878_v49, 0.0  ;;  %v902_v57 = vmul.f32 0.01, %v878_v49 }
 0x27c   : > { %v833_v59 = vmul.f32 %v817_v40, %v779_v56  ;;  %vm891_vm14 = vcmp.ge.f32.partialorder %v879_v52, 0.0  ;;  %v903_v60 = vmul.f32 0.01, %v879_v52 }
 0x27d   : > { %v880_v61 = vadd.f32 %v865_v58, %v832_v55  ;;  %v914_v62 = vsel %vm890_vm13, %v878_v49, %v902_v57 }
 0x27e   : > { %v881_v63 = vadd.f32 %v865_v58, %v833_v59  ;;  %956 = vrot.lane.b32.xlu0 %v914_v62, %s4727_s14  ;;  %v783_v1 = vpop.f32.mrb[10].mxu0  ;;  %v915_v2 = vsel %vm891_vm14, %v879_v52, %v903_v60  ;;  %v1359_v59 = vld [vmem:[%s6041_s4 + $0x8] sm:$0xff]  ;;  %v1717_v60 = vld [vmem:[%s6042_s5] sm:$0xff] }
 0x27f   : > { %v834_v3 = vmul.f32 %v822_v51, %v783_v1  ;;  %958 = vrot.lane.b32.xlu1 %v915_v2, %s4727_s14  ;;  %v785_v4 = vpop.f32.mrb[11].mxu0  ;;  %vm892_vm15 = vcmp.ge.f32.partialorder %v880_v61, 0.0  ;;  %v904_v5 = vmul.f32 0.01, %v880_v61  ;;  %1507 = vmatprep.mubr.f32.mxu1 %v1359_v59  ;;  %v1718_v62 = vld [vmem:[%s6042_s5 + $0x8] sm:$0xff]  ;;  %v1815_v2 = vld [vmem:[%s6043_s6 + $0x10] sm:$0xff] }
 0x280   : > { %v835_v7 = vmul.f32 %v822_v51, %v785_v4  ;;  %vm893_vm5 = vcmp.ge.f32.partialorder %v881_v63, 0.0  ;;  %v905_v8 = vmul.f32 0.01, %v881_v63  ;;  %v1814_v1 = vld [vmem:[%s6043_s6 + $0x8] sm:$0xff] }
 0x281   : > { %v882_v9 = vadd.f32 %v870_v6, %v834_v3  ;;  %v916_v10 = vsel %vm892_vm15, %v880_v61, %v904_v5  ;;  %v1813_v61 = vld [vmem:[%s6043_s6] sm:$0xff]  ;;  %v1720_v3 = vld [vmem:[%s6042_s5 + $0x18] sm:$0xff] }
 0x282   : > { %v883_v11 = vadd.f32 %v870_v6, %v835_v7  ;;  %960 = vrot.lane.b32.xlu0 %v916_v10, %s4727_s14  ;;  %v917_v12 = vsel %vm893_vm5, %v881_v63, %v905_v8  ;;  %v1719_v63 = vld [vmem:[%s6042_s5 + $0x10] sm:$0xff]  ;;  %v1721_v7 = vld [vmem:[%s6042_s5 + $0x20] sm:$0xff]  ;;  %v1816_v8 = vld [vmem:[%s6043_s6 + $0x18] sm:$0xff] }
 0x283   : > { %962 = vrot.lane.b32.xlu1 %v917_v12, %s4727_s14  ;;  %vm894_vm12 = vcmp.ge.f32.partialorder %v882_v9, 0.0  ;;  %v906_v13 = vmul.f32 0.01, %v882_v9 }
 0x284   : > { %vm895_vm13 = vcmp.ge.f32.partialorder %v883_v11, 0.0  ;;  %v907_v14 = vmul.f32 0.01, %v883_v11 }
 0x285   : > { %v918_v15 = vsel %vm894_vm12, %v882_v9, %v906_v13  ;;  %v1817_v13 = vld [vmem:[%s6043_s6 + $0x20] sm:$0xff] }
 0x286   : > { %964 = vrot.lane.b32.xlu0 %v918_v15, %s4727_s14  ;;  %v919_v16 = vsel %vm895_vm13, %v883_v11, %v907_v14  ;;  %v1722_v14 = vld [vmem:[%s6042_s5 + $0x28] sm:$0xff] }
 0x287   : > { %966 = vrot.lane.b32.xlu1 %v919_v16, %s4727_s14 }
 0x2e4   : > { %v945_v17 = vpop.permute.xlu0 %944 }
 0x2e5   : > { %986 = vst.msk [vmem:[#allocation3] sm:$0xff] %vm513_vm1, %v945_v17  ;;  %v947_v18 = vpop.permute.xlu1 %946 }
 0x2e6   : > { %v968_v19 = vsel %vm506_vm2, %v945_v17, %v947_v18 }
 0x2e7   : > { %987 = vst.msk [vmem:[#allocation3 + $0x8] sm:$0xff] %vm596_vm8, %v968_v19 }
 0x2e8   : > { %v949_v20 = vpop.permute.xlu0 %948 }
 0x2e9   : > { %988 = vst.msk [vmem:[#allocation3 + $0x10] sm:$0xff] %vm513_vm1, %v949_v20  ;;  %v951_v21 = vpop.permute.xlu1 %950 }
 0x2ea   : > { %v969_v22 = vsel %vm506_vm2, %v949_v20, %v951_v21  ;;  %v1723_v21 = vld [vmem:[%s6042_s5 + $0x30] sm:$0xff] }
 0x2eb   : > { %989 = vst.msk [vmem:[#allocation3 + $0x18] sm:$0xff] %vm596_vm8, %v969_v22  ;;  %v1818_v22 = vld [vmem:[%s6043_s6 + $0x28] sm:$0xff] }
 0x2ec   : > { %v953_v23 = vpop.permute.xlu0 %952  ;;  %v998_v26 = vld [vmem:[#allocation3] sm:$0xff] }
 0x2ed   : > { %990 = vst.msk [vmem:[#allocation3 + $0x20] sm:$0xff] %vm513_vm1, %v953_v23  ;;  %v955_v24 = vpop.permute.xlu1 %954 }
 0x2ee   : > { %v970_v25 = vsel %vm506_vm2, %v953_v23, %v955_v24  ;;  %v999_v27 = vld [vmem:[#allocation3 + $0x8] sm:$0xff] }
 0x2ef   : > { %991 = vst.msk [vmem:[#allocation3 + $0x28] sm:$0xff] %vm596_vm8, %v970_v25  ;;  %v5090_v28 = vpack.i.bf16 %v999_v27, %v998_v26 }
 0x2f0   : > { %v957_v29 = vpop.permute.xlu0 %956  ;;  %v1000_v31 = vld [vmem:[#allocation3 + $0x10] sm:$0xff] }
 0x2f1   : > { %992 = vst.msk [vmem:[#allocation3 + $0x30] sm:$0xff] %vm513_vm1, %v957_v29  ;;  %v959_v30 = vpop.permute.xlu1 %958  ;;  %4056 = vrot.lane.b32.xlu0 %v5090_v28, %s4728_s19  ;;  %v3554_v37 = vpack.c.bf16 %v1000_v31, %v998_v26 }
 0x2f2   : > { %v971_v32 = vsel %vm506_vm2, %v957_v29, %v959_v30  ;;  %v1001_v33 = vld [vmem:[#allocation3 + $0x18] sm:$0xff] }
 0x2f3   : > { %993 = vst.msk [vmem:[#allocation3 + $0x38] sm:$0xff] %vm596_vm8, %v971_v32  ;;  %v3552_v34 = vpack.c.bf16 %v1001_v33, %v999_v27  ;;  %v5097_v35 = vpack.i.bf16 %v1001_v33, %v1000_v31  ;;  %v1819_v27 = vld [vmem:[%s6043_s6 + $0x30] sm:$0xff] }
 0x2f4   : > { %v961_v36 = vpop.permute.xlu0 %960  ;;  %v1002_v40 = vld [vmem:[#allocation3 + $0x20] sm:$0xff] }
 0x2f5   : > { %994 = vst.msk [vmem:[#allocation3 + $0x40] sm:$0xff] %vm513_vm1, %v961_v36  ;;  %3553 = vmatprep.subr.bf16.mxu1 %v3552_v34  ;;  %v963_v38 = vpop.permute.xlu1 %962  ;;  %4061 = vrot.lane.b32.xlu1 %v5097_v35, %s4728_s19 }
 0x2f6   : > { %v972_v39 = vsel %vm506_vm2, %v961_v36, %v963_v38  ;;  %3555 = vmatpush1.bf16.msra.mxu1 %v3554_v37  ;;  %v1003_v41 = vld [vmem:[#allocation3 + $0x28] sm:$0xff] }
 0x2f7   : > { %995 = vst.msk [vmem:[#allocation3 + $0x48] sm:$0xff] %vm596_vm8, %v972_v39  ;;  %v5104_v42 = vpack.i.bf16 %v1003_v41, %v1002_v40  ;;  %v1820_v36 = vld [vmem:[%s6043_s6 + $0x38] sm:$0xff] }
 0x2f8   : > { %v965_v43 = vpop.permute.xlu0 %964  ;;  %v1004_v45 = vld [vmem:[#allocation3 + $0x30] sm:$0xff] }
 0x2f9   : > { %996 = vst.msk [vmem:[#allocation3 + $0x50] sm:$0xff] %vm513_vm1, %v965_v43  ;;  %4066 = vrot.lane.b32.xlu0 %v5104_v42, %s4728_s19  ;;  %v967_v44 = vpop.permute.xlu1 %966  ;;  %v3558_v50 = vpack.c.bf16 %v1004_v45, %v1002_v40  ;;  %vm1406_vm1 = vcmask 392192  }
 0x2fa   : > { %v973_v46 = vsel %vm506_vm2, %v965_v43, %v967_v44  ;;  %v1005_v47 = vld [vmem:[#allocation3 + $0x38] sm:$0xff] }
 0x2fb   : > { %997 = vst.msk [vmem:[#allocation3 + $0x58] sm:$0xff] %vm596_vm8, %v973_v46  ;;  %v3556_v48 = vpack.c.bf16 %v1005_v47, %v1003_v41  ;;  %v4070_v49 = vpack.i.bf16 %v1005_v47, %v1004_v45  ;;  %v1821_v45 = vld [vmem:[%s6043_s6 + $0x40] sm:$0xff]  ;;  %v1726_v46 = vld [vmem:[%s6042_s5 + $0x48] sm:$0xff] }
 0x2fc   : > { %v1006_v51 = vld [vmem:[#allocation3 + $0x40] sm:$0xff] }
 0x2fd   : > { %3557 = vmatprep.subr.bf16.mxu1 %v3556_v48  ;;  %4071 = vrot.lane.b32.xlu1 %v4070_v49, %s4728_s19 }
 0x2fe   : > { %3559 = vmatpush1.bf16.msra.mxu1 %v3558_v50  ;;  %v1007_v52 = vld [vmem:[#allocation3 + $0x48] sm:$0xff] }
 0x2ff   : > { %v4075_v53 = vpack.i.bf16 %v1007_v52, %v1006_v51 }
 0x300   : > { %v1008_v54 = vld [vmem:[#allocation3 + $0x50] sm:$0xff] }
 0x301   : > { %4076 = vrot.lane.b32.xlu0 %v4075_v53, %s4728_s19  ;;  %v3562_v58 = vpack.c.bf16 %v1008_v54, %v1006_v51 }
 0x302   : > { %v1009_v55 = vld [vmem:[#allocation3 + $0x58] sm:$0xff] }
 0x303   : > { %v4085_v56 = vpack.i.bf16 %v1009_v55, %v1008_v54  ;;  %v3560_v57 = vpack.c.bf16 %v1009_v55, %v1007_v52 }
 0x305   : > { %4081 = vrot.lane.b32.xlu0 %v5090_v28, %s4729_s17  ;;  %4086 = vrot.lane.b32.xlu1 %v4085_v56, %s4728_s19 }
 0x306   : > { %3561 = vmatprep.subr.bf16.mxu1 %v3560_v57  ;;  %v1822_v57 = vld [vmem:[%s6043_s6 + $0x48] sm:$0xff] }
 0x307   : > { %3563 = vmatpush1.bf16.msra.mxu1 %v3562_v58 }
 0x309   : > { %4096 = vrot.lane.b32.xlu0 %v5104_v42, %s4729_s17  ;;  %4091 = vrot.lane.b32.xlu1 %v5097_v35, %s4729_s17 }
 0x30d   : > { %4106 = vrot.lane.b32.xlu0 %v4075_v53, %s4729_s17  ;;  %4101 = vrot.lane.b32.xlu1 %v4070_v49, %s4729_s17 }
 0x311   : > { %4111 = vrot.lane.b32.xlu0 %v5090_v28, %s4730_s16  ;;  %4116 = vrot.lane.b32.xlu1 %v4085_v56, %s4729_s17 }
 0x315   : > { %4126 = vrot.lane.b32.xlu0 %v5104_v42, %s4730_s16  ;;  %4121 = vrot.lane.b32.xlu1 %v5097_v35, %s4730_s16 }
 0x319   : > { %4136 = vrot.lane.b32.xlu0 %v4075_v53, %s4730_s16  ;;  %4131 = vrot.lane.b32.xlu1 %v4070_v49, %s4730_s16 }
 0x31d   : > { %4141 = vrot.lane.b32.xlu0 %v5090_v28, %s4731_s24  ;;  %4146 = vrot.lane.b32.xlu1 %v4085_v56, %s4730_s16 }
 0x321   : > { %4156 = vrot.lane.b32.xlu0 %v5104_v42, %s4731_s24  ;;  %4151 = vrot.lane.b32.xlu1 %v5097_v35, %s4731_s24 }
 0x325   : > { %4166 = vrot.lane.b32.xlu0 %v4075_v53, %s4731_s24  ;;  %4161 = vrot.lane.b32.xlu1 %v4070_v49, %s4731_s24 }
 0x329   : > { %4171 = vrot.lane.b32.xlu0 %v5090_v28, %s4732_s15  ;;  %4176 = vrot.lane.b32.xlu1 %v4085_v56, %s4731_s24 }
 0x32d   : > { %4186 = vrot.lane.b32.xlu0 %v5104_v42, %s4732_s15  ;;  %4181 = vrot.lane.b32.xlu1 %v5097_v35, %s4732_s15 }
 0x331   : > { %4196 = vrot.lane.b32.xlu0 %v4075_v53, %s4732_s15  ;;  %4191 = vrot.lane.b32.xlu1 %v4070_v49, %s4732_s15 }
 0x335   : > { %4201 = vrot.lane.b32.xlu0 %v5090_v28, %s4733_s22  ;;  %4206 = vrot.lane.b32.xlu1 %v4085_v56, %s4732_s15  ;;  %s6095_s15 = smov 120  }
 0x339   : > { %4216 = vrot.lane.b32.xlu0 %v5104_v42, %s4733_s22  ;;  %4211 = vrot.lane.b32.xlu1 %v5097_v35, %s4733_s22 }
 0x33d   : > { %4226 = vrot.lane.b32.xlu0 %v4075_v53, %s4733_s22  ;;  %4221 = vrot.lane.b32.xlu1 %v4070_v49, %s4733_s22 }
 0x341   : > { %4231 = vrot.lane.b32.xlu0 %v5090_v28, %s6094_s21  ;;  %4236 = vrot.lane.b32.xlu1 %v4085_v56, %s4733_s22 }
 0x345   : > { %4246 = vrot.lane.b32.xlu0 %v5104_v42, %s6094_s21  ;;  %4241 = vrot.lane.b32.xlu1 %v5097_v35, %s6094_s21 }
 0x349   : > { %4256 = vrot.lane.b32.xlu0 %v4075_v53, %s6094_s21  ;;  %4251 = vrot.lane.b32.xlu1 %v4070_v49, %s6094_s21 }
 0x34d   : > { %4261 = vrot.lane.b32.xlu0 %v5090_v28, %s6095_s15  ;;  %4266 = vrot.lane.b32.xlu1 %v4085_v56, %s6094_s21  ;;  %v1724_v28 = vld [vmem:[%s6042_s5 + $0x38] sm:$0xff]  ;;  %s6105_s21 = sld [smem:[#allocation26_spill]] }
 0x351   : > { %4276 = vrot.lane.b32.xlu0 %v5104_v42, %s6095_s15  ;;  %4271 = vrot.lane.b32.xlu1 %v5097_v35, %s6095_s15  ;;  %v1725_v35 = vld [vmem:[%s6042_s5 + $0x40] sm:$0xff] }
 0x355   : > { %4286 = vrot.lane.b32.xlu0 %v4075_v53, %s6095_s15  ;;  %4281 = vrot.lane.b32.xlu1 %v4070_v49, %s6095_s15 }
 0x359   : > { %1731 = vperm.xlu0 %4054, %v1717_v60   ;;  %4291 = vrot.lane.b32.xlu1 %v4085_v56, %s6095_s15  ;;  %v1727_v56 = vld [vmem:[%s6042_s5 + $0x50] sm:$0xff] }
 0x35d   : > { %1827 = vperm.xlu0 %4054, %v1813_v61   ;;  %1736 = vperm.xlu1 %4053, %v1718_v62  }
 0x361   : > { %1741 = vperm.xlu0 %4054, %v1719_v63   ;;  %1832 = vperm.xlu1 %4053, %v1814_v1  }
 0x363   : > { %v4057_v4 = vpop.permute.xlu0 %4056 }
 0x364   : > { %v4059_v5 = vunpack.i.h.bf16 %v4057_v4  ;;  %v4058_v6 = vunpack.i.l.bf16 %v4057_v4 }
 0x365   : > { %1837 = vperm.xlu0 %4054, %v1815_v2   ;;  %1746 = vperm.xlu1 %4053, %v1720_v3  }
 0x366   : > { %v1046_v15 = vsel %vm515_vm3, %v4058_v6, %v4059_v5  ;;  %v1823_v6 = vld [vmem:[%s6043_s6 + $0x50] sm:$0xff] }
 0x367   : > { %v4062_v9 = vpop.permute.xlu1 %4061 }
 0x368   : > { %v4064_v10 = vunpack.i.h.bf16 %v4062_v9  ;;  %v4063_v11 = vunpack.i.l.bf16 %v4062_v9 }
 0x369   : > { %1751 = vperm.xlu0 %4054, %v1721_v7   ;;  %1842 = vperm.xlu1 %4053, %v1816_v8   ;;  %v1728_v7 = vld [vmem:[%s6042_s5 + $0x58] sm:$0xff] }
 0x36a   : > { %v3564_v12 = vpack.c.bf16 %v4064_v10, %v4059_v5  ;;  %v1047_v16 = vsel %vm515_vm3, %v4063_v11, %v4064_v10 }
 0x36b   : > { %v4067_v17 = vpop.permute.xlu0 %4066  ;;  %v3566_v18 = vpack.c.bf16 %v1047_v16, %v1046_v15 }
 0x36c   : > { %3565 = vmatprep.subr.bf16.mxu1 %v3564_v12  ;;  %v4069_v19 = vunpack.i.h.bf16 %v4067_v17  ;;  %v4068_v20 = vunpack.i.l.bf16 %v4067_v17  ;;  %v1824_v17 = vld [vmem:[%s6043_s6 + $0x58] sm:$0xff] }
 0x36d   : > { %1847 = vperm.xlu0 %4054, %v1817_v13   ;;  %1756 = vperm.xlu1 %4053, %v1722_v14  }
 0x36e   : > { %3567 = vmatpush1.bf16.msra.mxu1 %v3566_v18  ;;  %v1048_v29 = vsel %vm515_vm3, %v4068_v20, %v4069_v19 }
 0x36f   : > { %v4072_v23 = vpop.permute.xlu1 %4071 }
 0x370   : > { %v4074_v24 = vunpack.i.h.bf16 %v4072_v23  ;;  %v4073_v25 = vunpack.i.l.bf16 %v4072_v23 }
 0x371   : > { %1761 = vperm.xlu0 %4054, %v1723_v21   ;;  %1852 = vperm.xlu1 %4053, %v1818_v22  }
 0x372   : > { %v3568_v26 = vpack.c.bf16 %v4074_v24, %v4069_v19  ;;  %v1049_v30 = vsel %vm515_vm3, %v4073_v25, %v4074_v24 }
 0x373   : > { %v4077_v31 = vpop.permute.xlu0 %4076  ;;  %v3570_v32 = vpack.c.bf16 %v1049_v30, %v1048_v29 }
 0x374   : > { %3569 = vmatprep.subr.bf16.mxu1 %v3568_v26  ;;  %v4079_v33 = vunpack.i.h.bf16 %v4077_v31  ;;  %v4078_v34 = vunpack.i.l.bf16 %v4077_v31 }
 0x375   : > { %1857 = vperm.xlu0 %4054, %v1819_v27   ;;  %1766 = vperm.xlu1 %4053, %v1724_v28  }
 0x376   : > { %3571 = vmatpush1.bf16.msra.mxu1 %v3570_v32  ;;  %v1050_v41 = vsel %vm515_vm3, %v4078_v34, %v4079_v33 }
 0x377   : > { %v4082_v37 = vpop.permute.xlu0 %4081  ;;  %v4087_v38 = vpop.permute.xlu1 %4086 }
 0x378   : > { %v4089_v39 = vunpack.i.h.bf16 %v4087_v38  ;;  %v4088_v40 = vunpack.i.l.bf16 %v4087_v38  ;;  %v4084_v42 = vunpack.i.h.bf16 %v4082_v37  ;;  %v4083_v43 = vunpack.i.l.bf16 %v4082_v37 }
 0x379   : > { %1771 = vperm.xlu0 %4054, %v1725_v35   ;;  %1862 = vperm.xlu1 %4053, %v1820_v36  }
 0x37a   : > { %v3572_v44 = vpack.c.bf16 %v4089_v39, %v4079_v33  ;;  %v1051_v47 = vsel %vm515_vm3, %v4088_v40, %v4089_v39  ;;  %v1088_v58 = vsel %vm551_vm6, %v4083_v43, %v4084_v42 }
 0x37b   : > { %v4097_v48 = vpop.permute.xlu0 %4096  ;;  %v4092_v49 = vpop.permute.xlu1 %4091  ;;  %v3574_v50 = vpack.c.bf16 %v1051_v47, %v1050_v41 }
 0x37c   : > { %v4094_v51 = vunpack.i.h.bf16 %v4092_v49  ;;  %v4093_v52 = vunpack.i.l.bf16 %v4092_v49  ;;  %3573 = vmatprep.subr.bf16.mxu1 %v3572_v44  ;;  %v4099_v53 = vunpack.i.h.bf16 %v4097_v48  ;;  %v4098_v54 = vunpack.i.l.bf16 %v4097_v48 }
 0x37d   : > { %1867 = vperm.xlu0 %4054, %v1821_v45   ;;  %1776 = vperm.xlu1 %4053, %v1726_v46  }
 0x37e   : > { %3575 = vmatpush1.bf16.msra.mxu1 %v3574_v50  ;;  %v3576_v55 = vpack.c.bf16 %v4094_v51, %v4084_v42  ;;  %v1089_v59 = vsel %vm551_vm6, %v4093_v52, %v4094_v51  ;;  %v1090_v2 = vsel %vm551_vm6, %v4098_v54, %v4099_v53 }
 0x37f   : > { %v4107_v60 = vpop.permute.xlu0 %4106  ;;  %v4102_v61 = vpop.permute.xlu1 %4101  ;;  %v3578_v62 = vpack.c.bf16 %v1089_v59, %v1088_v58 }
 0x380   : > { %v4104_v63 = vunpack.i.h.bf16 %v4102_v61  ;;  %v4103_v1 = vunpack.i.l.bf16 %v4102_v61  ;;  %3577 = vmatprep.subr.bf16.mxu1 %v3576_v55  ;;  %v4109_v3 = vunpack.i.h.bf16 %v4107_v60  ;;  %v4108_v4 = vunpack.i.l.bf16 %v4107_v60 }
 0x381   : > { %1781 = vperm.xlu0 %4054, %v1727_v56   ;;  %1872 = vperm.xlu1 %4053, %v1822_v57  }
 0x382   : > { %3579 = vmatpush1.bf16.msra.mxu1 %v3578_v62  ;;  %v3580_v5 = vpack.c.bf16 %v4104_v63, %v4099_v53  ;;  %v1091_v8 = vsel %vm551_vm6, %v4103_v1, %v4104_v63  ;;  %v1092_v18 = vsel %vm551_vm6, %v4108_v4, %v4109_v3 }
 0x383   : > { %v4112_v9 = vpop.permute.xlu0 %4111  ;;  %v4117_v10 = vpop.permute.xlu1 %4116  ;;  %v3582_v11 = vpack.c.bf16 %v1091_v8, %v1090_v2 }
 0x384   : > { %v4119_v12 = vunpack.i.h.bf16 %v4117_v10  ;;  %v4118_v13 = vunpack.i.l.bf16 %v4117_v10  ;;  %3581 = vmatprep.subr.bf16.mxu1 %v3580_v5  ;;  %v4114_v14 = vunpack.i.h.bf16 %v4112_v9  ;;  %v4113_v15 = vunpack.i.l.bf16 %v4112_v9 }
 0x385   : > { %1877 = vperm.xlu0 %4054, %v1823_v6   ;;  %1786 = vperm.xlu1 %4053, %v1728_v7  }
 0x386   : > { %3583 = vmatpush1.bf16.msra.mxu1 %v3582_v11  ;;  %v3584_v16 = vpack.c.bf16 %v4119_v12, %v4109_v3  ;;  %v1093_v19 = vsel %vm551_vm6, %v4118_v13, %v4119_v12  ;;  %v1130_v25 = vsel %vm566_vm4, %v4113_v15, %v4114_v14 }
 0x387   : > { %v4127_v20 = vpop.permute.xlu0 %4126  ;;  %v4122_v21 = vpop.permute.xlu1 %4121  ;;  %v3586_v22 = vpack.c.bf16 %v1093_v19, %v1092_v18 }
 0x388   : > { %v4124_v23 = vunpack.i.h.bf16 %v4122_v21  ;;  %v4123_v24 = vunpack.i.l.bf16 %v4122_v21  ;;  %3585 = vmatprep.subr.bf16.mxu1 %v3584_v16  ;;  %v4129_v26 = vunpack.i.h.bf16 %v4127_v20  ;;  %v4128_v27 = vunpack.i.l.bf16 %v4127_v20 }
 0x389   : > { %1882 = vperm.xlu1 %4053, %v1824_v17  }
 0x38a   : > { %3587 = vmatpush1.bf16.msra.mxu1 %v3586_v22  ;;  %v3588_v28 = vpack.c.bf16 %v4124_v23, %v4114_v14  ;;  %v1131_v29 = vsel %vm566_vm4, %v4123_v24, %v4124_v23  ;;  %v1132_v38 = vsel %vm566_vm4, %v4128_v27, %v4129_v26 }
 0x38b   : > { %v4137_v30 = vpop.permute.xlu0 %4136  ;;  %v4132_v31 = vpop.permute.xlu1 %4131  ;;  %v3590_v32 = vpack.c.bf16 %v1131_v29, %v1130_v25 }
 0x38c   : > { %v4134_v33 = vunpack.i.h.bf16 %v4132_v31  ;;  %v4133_v34 = vunpack.i.l.bf16 %v4132_v31  ;;  %3589 = vmatprep.subr.bf16.mxu1 %v3588_v28  ;;  %v4139_v35 = vunpack.i.h.bf16 %v4137_v30  ;;  %v4138_v36 = vunpack.i.l.bf16 %v4137_v30 }
 0x38e   : > { %3591 = vmatpush1.bf16.msra.mxu1 %v3590_v32  ;;  %v3592_v37 = vpack.c.bf16 %v4134_v33, %v4129_v26  ;;  %v1133_v39 = vsel %vm566_vm4, %v4133_v34, %v4134_v33  ;;  %v1134_v45 = vsel %vm566_vm4, %v4138_v36, %v4139_v35  ;;  %v1358_v36 = vld [vmem:[%s6041_s4] sm:$0xff] }
 0x38f   : > { %v4142_v40 = vpop.permute.xlu0 %4141  ;;  %v4147_v41 = vpop.permute.xlu1 %4146  ;;  %v3594_v42 = vpack.c.bf16 %v1133_v39, %v1132_v38 }
 0x390   : > { %v4149_v43 = vunpack.i.h.bf16 %v4147_v41  ;;  %v4148_v44 = vunpack.i.l.bf16 %v4147_v41  ;;  %3593 = vmatprep.subr.bf16.mxu1 %v3592_v37  ;;  %v4144_v46 = vunpack.i.h.bf16 %v4142_v40  ;;  %v4143_v47 = vunpack.i.l.bf16 %v4142_v40  ;;  %v1363_v41 = vld [vmem:[%s6041_s4 + $0x28] sm:$0xff] }
 0x392   : > { %3595 = vmatpush1.bf16.msra.mxu1 %v3594_v42  ;;  %v3596_v48 = vpack.c.bf16 %v4149_v43, %v4139_v35  ;;  %v1135_v49 = vsel %vm566_vm4, %v4148_v44, %v4149_v43  ;;  %v1172_v58 = vsel %vm581_vm7, %v4143_v47, %v4144_v46 }
 0x393   : > { %v4157_v50 = vpop.permute.xlu0 %4156  ;;  %v4152_v51 = vpop.permute.xlu1 %4151  ;;  %v3598_v52 = vpack.c.bf16 %v1135_v49, %v1134_v45 }
 0x394   : > { %v4154_v53 = vunpack.i.h.bf16 %v4152_v51  ;;  %v4153_v54 = vunpack.i.l.bf16 %v4152_v51  ;;  %3597 = vmatprep.subr.bf16.mxu1 %v3596_v48  ;;  %v4159_v55 = vunpack.i.h.bf16 %v4157_v50  ;;  %v4158_v56 = vunpack.i.l.bf16 %v4157_v50  ;;  %v1362_v48 = vld [vmem:[%s6041_s4 + $0x20] sm:$0xff] }
 0x396   : > { %3599 = vmatpush1.bf16.msra.mxu1 %v3598_v52  ;;  %v3600_v57 = vpack.c.bf16 %v4154_v53, %v4144_v46  ;;  %v1173_v59 = vsel %vm581_vm7, %v4153_v54, %v4154_v53  ;;  %v1174_v2 = vsel %vm581_vm7, %v4158_v56, %v4159_v55  ;;  %v1367_v53 = vld [vmem:[%s6041_s4 + $0x48] sm:$0xff] }
 0x397   : > { %v4167_v60 = vpop.permute.xlu0 %4166  ;;  %v4162_v61 = vpop.permute.xlu1 %4161  ;;  %v3602_v62 = vpack.c.bf16 %v1173_v59, %v1172_v58 }
 0x398   : > { %v4164_v63 = vunpack.i.h.bf16 %v4162_v61  ;;  %v4163_v1 = vunpack.i.l.bf16 %v4162_v61  ;;  %3601 = vmatprep.subr.bf16.mxu1 %v3600_v57  ;;  %v4169_v3 = vunpack.i.h.bf16 %v4167_v60  ;;  %v4168_v4 = vunpack.i.l.bf16 %v4167_v60  ;;  %v1366_v60 = vld [vmem:[%s6041_s4 + $0x40] sm:$0xff] }
 0x39a   : > { %3603 = vmatpush1.bf16.msra.mxu1 %v3602_v62  ;;  %v3604_v5 = vpack.c.bf16 %v4164_v63, %v4159_v55  ;;  %v1175_v6 = vsel %vm581_vm7, %v4163_v1, %v4164_v63  ;;  %v1176_v15 = vsel %vm581_vm7, %v4168_v4, %v4169_v3 }
 0x39b   : > { %v4172_v7 = vpop.permute.xlu0 %4171  ;;  %v4177_v8 = vpop.permute.xlu1 %4176  ;;  %v3606_v9 = vpack.c.bf16 %v1175_v6, %v1174_v2  ;;  %v1371_v2 = vld [vmem:[%s6041_s4 + $0x68] sm:$0xff] }
 0x39c   : > { %v4179_v10 = vunpack.i.h.bf16 %v4177_v8  ;;  %v4178_v11 = vunpack.i.l.bf16 %v4177_v8  ;;  %3605 = vmatprep.subr.bf16.mxu1 %v3604_v5  ;;  %v4174_v12 = vunpack.i.h.bf16 %v4172_v7  ;;  %v4173_v13 = vunpack.i.l.bf16 %v4172_v7 }
 0x39e   : > { %3607 = vmatpush1.bf16.msra.mxu1 %v3606_v9  ;;  %v3608_v14 = vpack.c.bf16 %v4179_v10, %v4169_v3  ;;  %v1177_v16 = vsel %vm581_vm7, %v4178_v11, %v4179_v10  ;;  %v1214_v22 = vsel %vm596_vm8, %v4173_v13, %v4174_v12  ;;  %v1370_v9 = vld [vmem:[%s6041_s4 + $0x60] sm:$0xff] }
 0x39f   : > { %v4187_v17 = vpop.permute.xlu0 %4186  ;;  %v4182_v18 = vpop.permute.xlu1 %4181  ;;  %v3610_v19 = vpack.c.bf16 %v1177_v16, %v1176_v15 }
 0x3a0   : > { %v4184_v20 = vunpack.i.h.bf16 %v4182_v18  ;;  %v4183_v21 = vunpack.i.l.bf16 %v4182_v18  ;;  %3609 = vmatprep.subr.bf16.mxu1 %v3608_v14  ;;  %v4189_v23 = vunpack.i.h.bf16 %v4187_v17  ;;  %v4188_v24 = vunpack.i.l.bf16 %v4187_v17  ;;  %v1375_v14 = vld [vmem:[%s6041_s4 + $0x88] sm:$0xff] }
 0x3a2   : > { %3611 = vmatpush1.bf16.msra.mxu1 %v3610_v19  ;;  %v3612_v25 = vpack.c.bf16 %v4184_v20, %v4174_v12  ;;  %v1215_v26 = vsel %vm596_vm8, %v4183_v21, %v4184_v20  ;;  %v1216_v34 = vsel %vm596_vm8, %v4188_v24, %v4189_v23  ;;  %v1374_v21 = vld [vmem:[%s6041_s4 + $0x80] sm:$0xff] }
 0x3a3   : > { %v4197_v27 = vpop.permute.xlu0 %4196  ;;  %v4192_v28 = vpop.permute.xlu1 %4191  ;;  %v3614_v29 = vpack.c.bf16 %v1215_v26, %v1214_v22  ;;  %v1379_v26 = vld [vmem:[%s6041_s4 + $0xa8] sm:$0xff] }
 0x3a4   : > { %v4194_v30 = vunpack.i.h.bf16 %v4192_v28  ;;  %v4193_v31 = vunpack.i.l.bf16 %v4192_v28  ;;  %3613 = vmatprep.subr.bf16.mxu1 %v3612_v25  ;;  %v4199_v32 = vunpack.i.h.bf16 %v4197_v27  ;;  %v4198_v33 = vunpack.i.l.bf16 %v4197_v27 }
 0x3a6   : > { %v1217_v35 = vsel %vm596_vm8, %v4193_v31, %v4194_v30  ;;  %3615 = vmatpush1.bf16.msra.mxu1 %v3614_v29  ;;  %v3616_v37 = vpack.c.bf16 %v4194_v30, %v4189_v23  ;;  %v1218_v44 = vsel %vm596_vm8, %v4198_v33, %v4199_v32  ;;  %v1378_v33 = vld [vmem:[%s6041_s4 + $0xa0] sm:$0xff] }
 0x3a7   : > { %v4202_v38 = vpop.permute.xlu0 %4201  ;;  %v4207_v39 = vpop.permute.xlu1 %4206  ;;  %v3618_v40 = vpack.c.bf16 %v1217_v35, %v1216_v34 }
 0x3a8   : > { %v4209_v42 = vunpack.i.h.bf16 %v4207_v39  ;;  %v4208_v43 = vunpack.i.l.bf16 %v4207_v39  ;;  %3617 = vmatprep.subr.bf16.mxu1 %v3616_v37  ;;  %v4204_v45 = vunpack.i.h.bf16 %v4202_v38  ;;  %v4203_v46 = vunpack.i.l.bf16 %v4202_v38  ;;  %v1383_v38 = vld [vmem:[%s6041_s4 + $0xc8] sm:$0xff] }
 0x3a9   : > { %1508 = vmatmul.mubr.f32.vlgmr.msra.gmra.mrb[0].mxu1 %v1358_v36 }
 0x3aa   : > { %v1219_v47 = vsel %vm596_vm8, %v4208_v43, %v4209_v42  ;;  %3619 = vmatpush1.bf16.msra.mxu1 %v3618_v40  ;;  %1513 = vmatprep.mubr.f32.mxu1 %v1363_v41  ;;  %v3620_v49 = vpack.c.bf16 %v4209_v42, %v4199_v32  ;;  %v1256_v58 = vsel %vm611_vm9, %v4203_v46, %v4204_v45 }
 0x3ab   : > { %v4217_v50 = vpop.permute.xlu0 %4216  ;;  %v4212_v51 = vpop.permute.xlu1 %4211  ;;  %v3622_v52 = vpack.c.bf16 %v1219_v47, %v1218_v44 }
 0x3ac   : > { %v4214_v54 = vunpack.i.h.bf16 %v4212_v51  ;;  %v4213_v55 = vunpack.i.l.bf16 %v4212_v51  ;;  %3621 = vmatprep.subr.bf16.mxu1 %v3620_v49  ;;  %v4219_v56 = vunpack.i.h.bf16 %v4217_v50  ;;  %v4218_v57 = vunpack.i.l.bf16 %v4217_v50  ;;  %v1387_v50 = vld [vmem:[%s6041_s4 + $0xe8] sm:$0xff] }
 0x3ad   : > { %1514 = vmatmul.mubr.f32.gmra.mrb[2].mxu1 %v1362_v48 }
 0x3ae   : > { %v1257_v59 = vsel %vm611_vm9, %v4213_v55, %v4214_v54  ;;  %3623 = vmatpush1.bf16.msra.mxu1 %v3622_v52  ;;  %1519 = vmatprep.mubr.f32.mxu1 %v1367_v53  ;;  %v3624_v61 = vpack.c.bf16 %v4214_v54, %v4204_v45  ;;  %v1258_v5 = vsel %vm611_vm9, %v4218_v57, %v4219_v56  ;;  %v1382_v45 = vld [vmem:[%s6041_s4 + $0xc0] sm:$0xff] }
 0x3af   : > { %v4227_v62 = vpop.permute.xlu0 %4226  ;;  %v4222_v63 = vpop.permute.xlu1 %4221  ;;  %v3626_v1 = vpack.c.bf16 %v1257_v59, %v1256_v58  ;;  %v1386_v57 = vld [vmem:[%s6041_s4 + $0xe0] sm:$0xff] }
 0x3b0   : > { %v4224_v3 = vunpack.i.h.bf16 %v4222_v63  ;;  %v4223_v4 = vunpack.i.l.bf16 %v4222_v63  ;;  %3625 = vmatprep.subr.bf16.mxu1 %v3624_v61  ;;  %v4229_v6 = vunpack.i.h.bf16 %v4227_v62  ;;  %v4228_v7 = vunpack.i.l.bf16 %v4227_v62  ;;  %v1391_v62 = vld [vmem:[%s6041_s4 + $0x108] sm:$0xff] }
 0x3b1   : > { %1520 = vmatmul.mubr.f32.gmra.mrb[4].mxu1 %v1366_v60 }
 0x3b2   : > { %v1259_v8 = vsel %vm611_vm9, %v4223_v4, %v4224_v3  ;;  %3627 = vmatpush1.bf16.msra.mxu1 %v3626_v1  ;;  %1525 = vmatprep.mubr.f32.mxu1 %v1371_v2  ;;  %v3628_v10 = vpack.c.bf16 %v4224_v3, %v4219_v56  ;;  %v1260_v19 = vsel %vm611_vm9, %v4228_v7, %v4229_v6 }
 0x3b3   : > { %v4232_v11 = vpop.permute.xlu0 %4231  ;;  %v4237_v12 = vpop.permute.xlu1 %4236  ;;  %v3630_v13 = vpack.c.bf16 %v1259_v8, %v1258_v5 }
 0x3b4   : > { %v4239_v15 = vunpack.i.h.bf16 %v4237_v12  ;;  %v4238_v16 = vunpack.i.l.bf16 %v4237_v12  ;;  %3629 = vmatprep.subr.bf16.mxu1 %v3628_v10  ;;  %v4234_v17 = vunpack.i.h.bf16 %v4232_v11  ;;  %v4233_v18 = vunpack.i.l.bf16 %v4232_v11  ;;  %v1395_v11 = vld [vmem:[%s6041_s4 + $0x128] sm:$0xff] }
 0x3b5   : > { %1526 = vmatmul.mubr.f32.gmra.mrb[6].mxu1 %v1370_v9 }
 0x3b6   : > { %v1261_v20 = vsel %vm611_vm9, %v4238_v16, %v4239_v15  ;;  %3631 = vmatpush1.bf16.msra.mxu1 %v3630_v13  ;;  %1531 = vmatprep.mubr.f32.mxu1 %v1375_v14  ;;  %v3632_v22 = vpack.c.bf16 %v4239_v15, %v4229_v6  ;;  %v1298_v29 = vsel %vm626_vm10, %v4233_v18, %v4234_v17  ;;  %v1390_v6 = vld [vmem:[%s6041_s4 + $0x100] sm:$0xff] }
 0x3b7   : > { %v4247_v23 = vpop.permute.xlu0 %4246  ;;  %v4242_v24 = vpop.permute.xlu1 %4241  ;;  %v3634_v25 = vpack.c.bf16 %v1261_v20, %v1260_v19  ;;  %v1394_v18 = vld [vmem:[%s6041_s4 + $0x120] sm:$0xff] }
 0x3b8   : > { %v4244_v27 = vunpack.i.h.bf16 %v4242_v24  ;;  %v4243_v28 = vunpack.i.l.bf16 %v4242_v24  ;;  %3633 = vmatprep.subr.bf16.mxu1 %v3632_v22  ;;  %v4249_v30 = vunpack.i.h.bf16 %v4247_v23  ;;  %v4248_v31 = vunpack.i.l.bf16 %v4247_v23  ;;  %v1399_v22 = vld [vmem:[%s6041_s4 + $0x148] sm:$0xff] }
 0x3b9   : > { %1532 = vmatmul.mubr.f32.gmra.mrb[8].mxu1 %v1374_v21 }
 0x3ba   : > { %v1299_v32 = vsel %vm626_vm10, %v4243_v28, %v4244_v27  ;;  %3635 = vmatpush1.bf16.msra.mxu1 %v3634_v25  ;;  %1537 = vmatprep.mubr.f32.mxu1 %v1379_v26  ;;  %v3636_v34 = vpack.c.bf16 %v4244_v27, %v4234_v17  ;;  %v1300_v43 = vsel %vm626_vm10, %v4248_v31, %v4249_v30  ;;  %v1398_v27 = vld [vmem:[%s6041_s4 + $0x140] sm:$0xff] }
 0x3bb   : > { %v4257_v35 = vpop.permute.xlu0 %4256  ;;  %v4252_v36 = vpop.permute.xlu1 %4251  ;;  %v3638_v37 = vpack.c.bf16 %v1299_v32, %v1298_v29  ;;  %v1402_v31 = vld [vmem:[%s6041_s4 + $0x160] sm:$0xff]  ;;  %v1361_v32 = vld [vmem:[%s6041_s4 + $0x18] sm:$0xff] }
 0x3bc   : > { %v4254_v39 = vunpack.i.h.bf16 %v4252_v36  ;;  %v4253_v40 = vunpack.i.l.bf16 %v4252_v36  ;;  %3637 = vmatprep.subr.bf16.mxu1 %v3636_v34  ;;  %v4259_v41 = vunpack.i.h.bf16 %v4257_v35  ;;  %v4258_v42 = vunpack.i.l.bf16 %v4257_v35  ;;  %v1365_v34 = vld [vmem:[%s6041_s4 + $0x38] sm:$0xff]  ;;  %v1364_v35 = vld [vmem:[%s6041_s4 + $0x30] sm:$0xff] }
 0x3bd   : > { %1538 = vmatmul.mubr.f32.gmra.mrb[10].mxu1 %v1378_v33  ;;  %v1360_v33 = vld [vmem:[%s6041_s4 + $0x10] sm:$0xff]  ;;  %v1369_v36 = vld [vmem:[%s6041_s4 + $0x58] sm:$0xff] }
 0x3be   : > { %v1301_v44 = vsel %vm626_vm10, %v4253_v40, %v4254_v39  ;;  %3639 = vmatpush1.bf16.msra.mxu1 %v3638_v37  ;;  %1543 = vmatprep.mubr.f32.mxu1 %v1383_v38  ;;  %v3640_v46 = vpack.c.bf16 %v4254_v39, %v4249_v30  ;;  %v1302_v53 = vsel %vm626_vm10, %v4258_v42, %v4259_v41  ;;  %v1403_v30 = vld [vmem:[%s6041_s4 + $0x168] sm:$0xff]  ;;  %v1368_v37 = vld [vmem:[%s6041_s4 + $0x50] sm:$0xff]  ;;  %v1373_v38 = vld [vmem:[%s6041_s4 + $0x78] sm:$0xff] }
 0x3bf   : > { %v4262_v47 = vpop.permute.xlu0 %4261  ;;  %v4267_v48 = vpop.permute.xlu1 %4266  ;;  %v3642_v49 = vpack.c.bf16 %v1301_v44, %v1300_v43  ;;  %v1372_v39 = vld [vmem:[%s6041_s4 + $0x70] sm:$0xff]  ;;  %v1377_v40 = vld [vmem:[%s6041_s4 + $0x98] sm:$0xff] }
 0x3c0   : > { %v4269_v51 = vunpack.i.h.bf16 %v4267_v48  ;;  %v4268_v52 = vunpack.i.l.bf16 %v4267_v48  ;;  %3641 = vmatprep.subr.bf16.mxu1 %v3640_v46  ;;  %v4264_v54 = vunpack.i.h.bf16 %v4262_v47  ;;  %v4263_v55 = vunpack.i.l.bf16 %v4262_v47  ;;  %v1381_v42 = vld [vmem:[%s6041_s4 + $0xb8] sm:$0xff]  ;;  %v1380_v43 = vld [vmem:[%s6041_s4 + $0xb0] sm:$0xff] }
 0x3c1   : > { %1544 = vmatmul.mubr.f32.gmra.mrb[12].mxu1 %v1382_v45  ;;  %v1385_v44 = vld [vmem:[%s6041_s4 + $0xd8] sm:$0xff]  ;;  %v1384_v45 = vld [vmem:[%s6041_s4 + $0xd0] sm:$0xff] }
 0x3c2   : > { %v1303_v56 = vsel %vm626_vm10, %v4268_v52, %v4269_v51  ;;  %3643 = vmatpush1.bf16.msra.mxu1 %v3642_v49  ;;  %1549 = vmatprep.mubr.f32.mxu1 %v1387_v50  ;;  %v3644_v58 = vpack.c.bf16 %v4269_v51, %v4259_v41  ;;  %v1340_v4 = vsel %vm647_vm11, %v4263_v55, %v4264_v54  ;;  %v1376_v41 = vld [vmem:[%s6041_s4 + $0x90] sm:$0xff]  ;;  %v1389_v46 = vld [vmem:[%s6041_s4 + $0xf8] sm:$0xff] }
 0x3c3   : > { %v4277_v59 = vpop.permute.xlu0 %4276  ;;  %v4272_v60 = vpop.permute.xlu1 %4271  ;;  %v3646_v61 = vpack.c.bf16 %v1303_v56, %v1302_v53  ;;  %v1388_v47 = vld [vmem:[%s6041_s4 + $0xf0] sm:$0xff]  ;;  %v1393_v48 = vld [vmem:[%s6041_s4 + $0x118] sm:$0xff] }
 0x3c4   : > { %v4274_v63 = vunpack.i.h.bf16 %v4272_v60  ;;  %v4273_v1 = vunpack.i.l.bf16 %v4272_v60  ;;  %3645 = vmatprep.subr.bf16.mxu1 %v3644_v58  ;;  %v4279_v2 = vunpack.i.h.bf16 %v4277_v59  ;;  %v4278_v3 = vunpack.i.l.bf16 %v4277_v59  ;;  %v1392_v49 = vld [vmem:[%s6041_s4 + $0x110] sm:$0xff]  ;;  %v1397_v50 = vld [vmem:[%s6041_s4 + $0x138] sm:$0xff] }
 0x3c5   : > { %1550 = vmatmul.mubr.f32.gmra.mrb[14].mxu1 %v1386_v57  ;;  %v1396_v51 = vld [vmem:[%s6041_s4 + $0x130] sm:$0xff]  ;;  %v1401_v52 = vld [vmem:[%s6041_s4 + $0x158] sm:$0xff] }
 0x3c6   : > { %v1341_v5 = vsel %vm647_vm11, %v4273_v1, %v4274_v63  ;;  %3647 = vmatpush1.bf16.msra.mxu1 %v3646_v61  ;;  %1555 = vmatprep.mubr.f32.mxu1 %v1391_v62  ;;  %v3648_v7 = vpack.c.bf16 %v4274_v63, %v4264_v54  ;;  %v1342_v14 = vsel %vm647_vm11, %v4278_v3, %v4279_v2  ;;  %v1400_v53 = vld [vmem:[%s6041_s4 + $0x150] sm:$0xff]  ;;  %v1405_v54 = vld [vmem:[%s6041_s4 + $0x178] sm:$0xff] }
 0x3c7   : > { %v4287_v8 = vpop.permute.xlu0 %4286  ;;  %v4282_v9 = vpop.permute.xlu1 %4281  ;;  %v3650_v10 = vpack.c.bf16 %v1341_v5, %v1340_v4  ;;  %v1404_v55 = vld [vmem:[%s6041_s4 + $0x170] sm:$0xff] }
 0x3c8   : > { %v4284_v12 = vunpack.i.h.bf16 %v4282_v9  ;;  %v4283_v13 = vunpack.i.l.bf16 %v4282_v9  ;;  %3649 = vmatprep.subr.bf16.mxu1 %v3648_v7  ;;  %v4289_v15 = vunpack.i.h.bf16 %v4287_v8  ;;  %v4288_v16 = vunpack.i.l.bf16 %v4287_v8 }
 0x3c9   : > { %1556 = vmatmul.mubr.f32.gmra.mrb[16].mxu1 %v1390_v6 }
 0x3ca   : > { %v1343_v17 = vsel %vm647_vm11, %v4283_v13, %v4284_v12  ;;  %3651 = vmatpush1.bf16.msra.mxu1 %v3650_v10  ;;  %1561 = vmatprep.mubr.f32.mxu1 %v1395_v11  ;;  %v3652_v19 = vpack.c.bf16 %v4284_v12, %v4279_v2  ;;  %v1344_v25 = vsel %vm647_vm11, %v4288_v16, %v4289_v15 }
 0x3cb   : > { %v4292_v20 = vpop.permute.xlu1 %4291  ;;  %v3654_v21 = vpack.c.bf16 %v1343_v17, %v1342_v14 }
 0x3cc   : > { %v4294_v23 = vunpack.i.h.bf16 %v4292_v20  ;;  %v4293_v24 = vunpack.i.l.bf16 %v4292_v20  ;;  %3653 = vmatprep.subr.bf16.mxu1 %v3652_v19 }
 0x3cd   : > { %1562 = vmatmul.mubr.f32.gmra.mrb[18].mxu1 %v1394_v18 }
 0x3ce   : > { %v1345_v26 = vsel %vm647_vm11, %v4293_v24, %v4294_v23  ;;  %3655 = vmatpush1.bf16.msra.mxu1 %v3654_v21  ;;  %1567 = vmatprep.mubr.f32.mxu1 %v1399_v22  ;;  %v3656_v28 = vpack.c.bf16 %v4294_v23, %v4289_v15 }
 0x3cf   : > { %v3658_v29 = vpack.c.bf16 %v1345_v26, %v1344_v25 }
 0x3d0   : > { %3657 = vmatprep.subr.bf16.mxu1 %v3656_v28 }
 0x3d1   : > { %1568 = vmatmul.mubr.f32.gmra.mrb[20].mxu1 %v1398_v27 }
 0x3d2   : > { %3659 = vmatpush1.bf16.msra.mxu1 %v3658_v29  ;;  %1573 = vmatprep.mubr.f32.mxu1 %v1403_v30 }
 0x3d5   : > { %1574 = vmatmul.mubr.f32.gmra.mrb[22].mxu1 %v1402_v31 }
 0x3d6   : > { %3419 = vmatprep.mubr.msk.f32.mxu1 %vm1406_vm1, %v1361_v32 }
 0x3d8   : > { %v1732_v56 = vpop.permute.xlu0 %1731 }
 0x3d9   : > { %1645 = vmatmul.mubr.f32.vlgmr.msra.gmra.mrb[0].mxu1 %v1360_v33 }
 0x3da   : > { %3420 = vmatprep.mubr.msk.f32.mxu1 %vm1406_vm1, %v1365_v34 }
 0x3dc   : > { %v1737_v57 = vpop.permute.xlu1 %1736  ;;  %v1828_v58 = vpop.permute.xlu0 %1827 }
 0x3dd   : > { %1651 = vmatmul.mubr.f32.gmra.mrb[2].mxu1 %v1364_v35 }
 0x3de   : > { %3421 = vmatprep.mubr.msk.f32.mxu1 %vm1406_vm1, %v1369_v36 }
 0x3e0   : > { %v1833_v59 = vpop.permute.xlu1 %1832  ;;  %v1742_v60 = vpop.permute.xlu0 %1741 }
 0x3e1   : > { %1657 = vmatmul.mubr.f32.gmra.mrb[4].mxu1 %v1368_v37 }
 0x3e2   : > { %3422 = vmatprep.mubr.msk.f32.mxu1 %vm1406_vm1, %v1373_v38 }
 0x3e4   : > { %v1747_v61 = vpop.permute.xlu1 %1746  ;;  %v1838_v62 = vpop.permute.xlu0 %1837 }
 0x3e5   : > { %1663 = vmatmul.mubr.f32.gmra.mrb[6].mxu1 %v1372_v39 }
 0x3e6   : > { %3423 = vmatprep.mubr.msk.f32.mxu1 %vm1406_vm1, %v1377_v40 }
 0x3e8   : > { %v1843_v63 = vpop.permute.xlu1 %1842  ;;  %v1752_v2 = vpop.permute.xlu0 %1751 }
 0x3e9   : > { %1669 = vmatmul.mubr.f32.gmra.mrb[8].mxu1 %v1376_v41 }
 0x3ea   : > { %3424 = vmatprep.mubr.msk.f32.mxu1 %vm1406_vm1, %v1381_v42 }
 0x3ec   : > { %v5453_v6 = vpop.permute.xlu1 %1756  ;;  %v1848_v13 = vpop.permute.xlu0 %1847 }
 0x3ed   : > { %1675 = vmatmul.mubr.f32.gmra.mrb[10].mxu1 %v1380_v43 }
 0x3ee   : > { %3425 = vmatprep.mubr.msk.f32.mxu1 %vm1406_vm1, %v1385_v44 }
 0x3f0   : > { %v1853_v22 = vpop.permute.xlu1 %1852  ;;  %v1762_v31 = vpop.permute.xlu0 %1761 }
 0x3f1   : > { %1681 = vmatmul.mubr.f32.gmra.mrb[12].mxu1 %v1384_v45 }
 0x3f2   : > { %3426 = vmatprep.mubr.msk.f32.mxu1 %vm1406_vm1, %v1389_v46 }
 0x3f4   : > { %v1767_v39 = vpop.permute.xlu1 %1766 }
 0x3f5   : > { %1687 = vmatmul.mubr.f32.gmra.mrb[14].mxu1 %v1388_v47 }
 0x3f6   : > { %3427 = vmatprep.mubr.msk.f32.mxu1 %vm1406_vm1, %v1393_v48 }
 0x3f9   : > { %1693 = vmatmul.mubr.f32.gmra.mrb[16].mxu1 %v1392_v49  ;;  %v1858_v49 = vpop.permute.xlu0 %1857 }
 0x3fa   : > { %3428 = vmatprep.mubr.msk.f32.mxu1 %vm1406_vm1, %v1397_v50 }
 0x3fd   : > { %1699 = vmatmul.mubr.f32.gmra.mrb[18].mxu1 %v1396_v51 }
 0x3fe   : > { %3429 = vmatprep.mubr.msk.f32.mxu1 %vm1406_vm1, %v1401_v52 }
 0x401   : > { %1705 = vmatmul.mubr.f32.gmra.mrb[20].mxu1 %v1400_v53 }
 0x402   : > { %3430 = vmatprep.mubr.msk.f32.mxu1 %vm1406_vm1, %v1405_v54 }
 0x405   : > { %1711 = vmatmul.mubr.f32.gmra.mrb[22].mxu1 %v1404_v55 }
 0x4ac   : > { %v1646_v1 = vpop.f32.mrb[0].mxu1 }
 0x4ad   : > { %v1789_v3 = vmul.f32 %v1732_v56, %v1646_v1  ;;  %v1648_v4 = vpop.f32.mrb[1].mxu1 }
 0x4ae   : > { %v1790_v5 = vmul.f32 %v1732_v56, %v1648_v4 }
 0x4af   : > { %v1885_v7 = vadd.f32 %v1828_v58, %v1789_v3 }
 0x4b0   : > { %v1886_v8 = vadd.f32 %v1828_v58, %v1790_v5  ;;  %v1652_v9 = vpop.f32.mrb[2].mxu1  ;;  %v1772_v5 = vpop.permute.xlu0 %1771 }
 0x4b1   : > { %v1791_v10 = vmul.f32 %v1737_v57, %v1652_v9  ;;  %v1654_v11 = vpop.f32.mrb[3].mxu1  ;;  %v1933_v15 = vmul.f32 0.01, %v1885_v7  ;;  %vm1909_vm9 = vcmp.ge.f32.partialorder %v1885_v7, 0.0 }
 0x4b2   : > { %v1792_v12 = vmul.f32 %v1737_v57, %v1654_v11  ;;  %v1934_v16 = vmul.f32 0.01, %v1886_v8  ;;  %vm1910_vm2 = vcmp.ge.f32.partialorder %v1886_v8, 0.0 }
 0x4b3   : > { %v1887_v14 = vadd.f32 %v1833_v59, %v1791_v10  ;;  %v5461_v32 = vsel %vm1909_vm9, %v1885_v7, %v1933_v15 }
 0x4b4   : > { %v1888_v17 = vadd.f32 %v1833_v59, %v1792_v12  ;;  %v1658_v18 = vpop.f32.mrb[4].mxu1  ;;  %v5457_v29 = vsel %vm1910_vm2, %v1886_v8, %v1934_v16 }
 0x4b5   : > { %vm1911_vm8 = vcmp.ge.f32.partialorder %v1887_v14, 0.0  ;;  %v1935_v19 = vmul.f32 0.01, %v1887_v14  ;;  %v1793_v20 = vmul.f32 %v1742_v60, %v1658_v18  ;;  %v1660_v21 = vpop.f32.mrb[5].mxu1 }
 0x4b6   : > { %vm1912_vm11 = vcmp.ge.f32.partialorder %v1888_v17, 0.0  ;;  %v1936_v23 = vmul.f32 0.01, %v1888_v17  ;;  %v1794_v24 = vmul.f32 %v1742_v60, %v1660_v21  ;;  %v1863_v60 = vpop.permute.xlu1 %1862 }
 0x4b7   : > { %v5455_v25 = vsel %vm1911_vm8, %v1887_v14, %v1935_v19  ;;  %v1889_v26 = vadd.f32 %v1838_v62, %v1793_v20 }
 0x4b8   : > { %v1890_v27 = vadd.f32 %v1838_v62, %v1794_v24  ;;  %v1664_v28 = vpop.f32.mrb[6].mxu1  ;;  %v5459_v30 = vsel %vm1912_vm11, %v1888_v17, %v1936_v23  ;;  %v3662_v37 = vpack.c.bf16 %v5455_v25, %v5461_v32  ;;  %v1868_v24 = vpop.permute.xlu0 %1867 }
 0x4b9   : > { %v1795_v33 = vmul.f32 %v1747_v61, %v1664_v28  ;;  %v1666_v34 = vpop.f32.mrb[7].mxu1  ;;  %v3660_v35 = vpack.c.bf16 %v5459_v30, %v5457_v29  ;;  %v1937_v40 = vmul.f32 0.01, %v1889_v26  ;;  %vm1913_vm5 = vcmp.ge.f32.partialorder %v1889_v26, 0.0 }
 0x4ba   : > { %v1796_v36 = vmul.f32 %v1747_v61, %v1666_v34  ;;  %v1938_v41 = vmul.f32 0.01, %v1890_v27  ;;  %vm1914_vm14 = vcmp.ge.f32.partialorder %v1890_v27, 0.0  ;;  %v1777_v12 = vpop.permute.xlu1 %1776 }
 0x4bb   : > { %v1891_v38 = vadd.f32 %v1843_v63, %v1795_v33  ;;  %3661 = vmatprep.subr.bf16.mxu0 %v3660_v35  ;;  %v5473_v56 = vsel %vm1913_vm5, %v1889_v26, %v1937_v40 }
 0x4bc   : > { %v1892_v42 = vadd.f32 %v1843_v63, %v1796_v36  ;;  %v1670_v43 = vpop.f32.mrb[8].mxu1  ;;  %3663 = vmatpush1.bf16.msra.mxu0 %v3662_v37  ;;  %v5469_v54 = vsel %vm1914_vm14, %v1890_v27, %v1938_v41 }
 0x4bd   : > { %vm1915_vm15 = vcmp.ge.f32.partialorder %v1891_v38, 0.0  ;;  %v1939_v44 = vmul.f32 0.01, %v1891_v38  ;;  %v1797_v45 = vmul.f32 %v1752_v2, %v1670_v43  ;;  %v1672_v46 = vpop.f32.mrb[9].mxu1 }
 0x4be   : > { %vm1916_vm12 = vcmp.ge.f32.partialorder %v1892_v42, 0.0  ;;  %v1940_v47 = vmul.f32 0.01, %v1892_v42  ;;  %v1798_v48 = vmul.f32 %v1752_v2, %v1672_v46  ;;  %v1873_v37 = vpop.permute.xlu1 %1872  ;;  %v1782_v46 = vpop.permute.xlu0 %1781 }
 0x4bf   : > { %v5467_v50 = vsel %vm1915_vm15, %v1891_v38, %v1939_v44  ;;  %v1893_v51 = vadd.f32 %v1848_v13, %v1797_v45 }
 0x4c0   : > { %v1894_v52 = vadd.f32 %v1848_v13, %v1798_v48  ;;  %v1676_v53 = vpop.f32.mrb[10].mxu1  ;;  %v5471_v55 = vsel %vm1916_vm12, %v1892_v42, %v1940_v47  ;;  %v3666_v62 = vpack.c.bf16 %v5467_v50, %v5473_v56 }
 0x4c1   : > { %v1799_v57 = vmul.f32 %v5453_v6, %v1676_v53  ;;  %v1678_v58 = vpop.f32.mrb[11].mxu1  ;;  %v3664_v59 = vpack.c.bf16 %v5471_v55, %v5469_v54  ;;  %v1941_v1 = vmul.f32 0.01, %v1893_v51  ;;  %vm1917_vm2 = vcmp.ge.f32.partialorder %v1893_v51, 0.0 }
 0x4c2   : > { %v1800_v61 = vmul.f32 %v5453_v6, %v1678_v58  ;;  %v1942_v2 = vmul.f32 0.01, %v1894_v52  ;;  %vm1918_vm13 = vcmp.ge.f32.partialorder %v1894_v52, 0.0  ;;  %v1787_v58 = vpop.permute.xlu1 %1786 }
 0x4c3   : > { %v1895_v63 = vadd.f32 %v1853_v22, %v1799_v57  ;;  %3665 = vmatprep.subr.bf16.mxu0 %v3664_v59  ;;  %v5487_v18 = vsel %vm1917_vm2, %v1893_v51, %v1941_v1 }
 0x4c4   : > { %v1896_v3 = vadd.f32 %v1853_v22, %v1800_v61  ;;  %v1682_v4 = vpop.f32.mrb[12].mxu1  ;;  %3667 = vmatpush1.bf16.msra.mxu0 %v3666_v62  ;;  %v5483_v16 = vsel %vm1918_vm13, %v1894_v52, %v1942_v2 }
 0x4c5   : > { %vm1919_vm1 = vcmp.ge.f32.partialorder %v1895_v63, 0.0  ;;  %v1943_v7 = vmul.f32 0.01, %v1895_v63  ;;  %v1801_v8 = vmul.f32 %v1762_v31, %v1682_v4  ;;  %v1684_v9 = vpop.f32.mrb[13].mxu1 }
 0x4c6   : > { %vm1920_vm8 = vcmp.ge.f32.partialorder %v1896_v3, 0.0  ;;  %v1944_v10 = vmul.f32 0.01, %v1896_v3  ;;  %v1802_v6 = vmul.f32 %v1762_v31, %v1684_v9 }
 0x4c7   : > { %v5481_v11 = vsel %vm1919_vm1, %v1895_v63, %v1943_v7  ;;  %v1897_v13 = vadd.f32 %v1858_v49, %v1801_v8 }
 0x4c8   : > { %v1898_v14 = vadd.f32 %v1858_v49, %v1802_v6  ;;  %v1688_v15 = vpop.f32.mrb[14].mxu1  ;;  %v5485_v17 = vsel %vm1920_vm8, %v1896_v3, %v1944_v10  ;;  %v3670_v23 = vpack.c.bf16 %v5481_v11, %v5487_v18 }
 0x4c9   : > { %v1803_v19 = vmul.f32 %v1767_v39, %v1688_v15  ;;  %v1690_v20 = vpop.f32.mrb[15].mxu1  ;;  %v3668_v21 = vpack.c.bf16 %v5485_v17, %v5483_v16  ;;  %v1945_v27 = vmul.f32 0.01, %v1897_v13  ;;  %vm1921_vm14 = vcmp.ge.f32.partialorder %v1897_v13, 0.0 }
 0x4ca   : > { %v1804_v22 = vmul.f32 %v1767_v39, %v1690_v20  ;;  %v1946_v28 = vmul.f32 0.01, %v1898_v14  ;;  %vm1922_vm9 = vcmp.ge.f32.partialorder %v1898_v14, 0.0  ;;  %v1883_v20 = vpop.permute.xlu1 %1882 }
 0x4cb   : > { %v1899_v26 = vadd.f32 %v1863_v60, %v1803_v19  ;;  %3669 = vmatprep.subr.bf16.mxu0 %v3668_v21  ;;  %v5499_v47 = vsel %vm1921_vm14, %v1897_v13, %v1945_v27  ;;  %vm1993_vm14 = vcmask 785408  }
 0x4cc   : > { %v1900_v31 = vadd.f32 %v1863_v60, %v1804_v22  ;;  %v1694_v33 = vpop.f32.mrb[16].mxu1  ;;  %3671 = vmatpush1.bf16.msra.mxu0 %v3670_v23  ;;  %v5495_v44 = vsel %vm1922_vm9, %v1898_v14, %v1946_v28 }
 0x4cd   : > { %vm1923_vm11 = vcmp.ge.f32.partialorder %v1899_v26, 0.0  ;;  %v1947_v34 = vmul.f32 0.01, %v1899_v26  ;;  %v1805_v35 = vmul.f32 %v1772_v5, %v1694_v33  ;;  %v1696_v36 = vpop.f32.mrb[17].mxu1 }
 0x4ce   : > { %vm1924_vm15 = vcmp.ge.f32.partialorder %v1900_v31, 0.0  ;;  %v1948_v38 = vmul.f32 0.01, %v1900_v31  ;;  %v1806_v39 = vmul.f32 %v1772_v5, %v1696_v36  ;;  %v1878_v5 = vpop.permute.xlu0 %1877 }
 0x4cf   : > { %v5493_v40 = vsel %vm1923_vm11, %v1899_v26, %v1947_v34  ;;  %v1901_v41 = vadd.f32 %v1868_v24, %v1805_v35 }
 0x4d0   : > { %v1902_v42 = vadd.f32 %v1868_v24, %v1806_v39  ;;  %v1700_v43 = vpop.f32.mrb[18].mxu1  ;;  %v5497_v45 = vsel %vm1924_vm15, %v1900_v31, %v1948_v38  ;;  %v3674_v53 = vpack.c.bf16 %v5493_v40, %v5499_v47  ;;  %v1981_v39 = vld [vmem:[#allocation8] sm:$0xff]  ;;  %vm2203_vm15 = vcmask 957440  }
 0x4d1   : > { %v1807_v48 = vmul.f32 %v1777_v12, %v1700_v43  ;;  %v1702_v49 = vpop.f32.mrb[19].mxu1  ;;  %v3672_v51 = vpack.c.bf16 %v5497_v45, %v5495_v44  ;;  %v1949_v59 = vmul.f32 0.01, %v1901_v41  ;;  %vm1925_vm13 = vcmp.ge.f32.partialorder %v1901_v41, 0.0  ;;  %v1984_v43 = vld [vmem:[#allocation8 + $0x18] sm:$0xff] }
 0x4d2   : > { %v1808_v52 = vmul.f32 %v1777_v12, %v1702_v49  ;;  %v1950_v60 = vmul.f32 0.01, %v1902_v42  ;;  %vm1926_vm5 = vcmp.ge.f32.partialorder %v1902_v42, 0.0  ;;  %v1987_v49 = vld [vmem:[#allocation8 + $0x30] sm:$0xff] }
 0x4d3   : > { %v1903_v57 = vadd.f32 %v1873_v37, %v1807_v48  ;;  %3673 = vmatprep.subr.bf16.mxu0 %v3672_v51  ;;  %v5511_v12 = vsel %vm1925_vm13, %v1901_v41, %v1949_v59  ;;  %v1982_v41 = vld [vmem:[#allocation8 + $0x8] sm:$0xff]  ;;  %v1988_v51 = vld [vmem:[#allocation8 + $0x38] sm:$0xff]  ;;  %v6069_v59 = vlaneseq }
 0x4d4   : > { %v1904_v61 = vadd.f32 %v1873_v37, %v1808_v52  ;;  %v1706_v62 = vpop.f32.mrb[20].mxu1  ;;  %3675 = vmatpush1.bf16.msra.mxu0 %v3674_v53  ;;  %v5507_v10 = vsel %vm1926_vm5, %v1902_v42, %v1950_v60  ;;  %v1983_v42 = vld [vmem:[#allocation8 + $0x10] sm:$0xff]  ;;  %v1986_v48 = vld [vmem:[#allocation8 + $0x28] sm:$0xff]  ;;  %v1989_v52 = vld [vmem:[#allocation8 + $0x40] sm:$0xff] }
 0x4d5   : > { %vm1927_vm12 = vcmp.ge.f32.partialorder %v1903_v57, 0.0  ;;  %v1951_v63 = vmul.f32 0.01, %v1903_v57  ;;  %v1809_v1 = vmul.f32 %v1782_v46, %v1706_v62  ;;  %v1708_v2 = vpop.f32.mrb[21].mxu1  ;;  %v1990_v53 = vld [vmem:[#allocation8 + $0x48] sm:$0xff]  ;;  %v5553_v60 = vshrl.u32 %v6069_v59, 7 }
 0x4d6   : > { %vm1928_vm1 = vcmp.ge.f32.partialorder %v1904_v61, 0.0  ;;  %v1952_v3 = vmul.f32 0.01, %v1904_v61  ;;  %v1810_v4 = vmul.f32 %v1782_v46, %v1708_v2  ;;  %v1985_v46 = vld [vmem:[#allocation8 + $0x20] sm:$0xff]  ;;  %v2167_v62 = vld [vmem:[%s6045_s8] sm:$0x3] }
 0x4d7   : > { %v5505_v7 = vsel %vm1927_vm12, %v1903_v57, %v1951_v63  ;;  %v1905_v13 = vadd.f32 %v1878_v5, %v1809_v1  ;;  %v1991_v57 = vld [vmem:[#allocation8 + $0x50] sm:$0xff]  ;;  %6098 = vst [vmem:[#allocation24_spill] sm:$0xff] %v5553_v60  ;;  %v2171_v63 = vsub.s32 0, %v5553_v60 }
 0x4d8   : > { %v1906_v8 = vadd.f32 %v1878_v5, %v1810_v4  ;;  %v1712_v9 = vpop.f32.mrb[22].mxu1  ;;  %v5509_v6 = vsel %vm1928_vm1, %v1904_v61, %v1952_v3  ;;  %v3678_v22 = vpack.c.bf16 %v5505_v7, %v5511_v12  ;;  %v2175_v61 = vsub.s32 1, %v5553_v60 }
 0x4d9   : > { %v1811_v14 = vmul.f32 %v1787_v58, %v1712_v9  ;;  %v1714_v15 = vpop.f32.mrb[23].mxu1  ;;  %v3676_v19 = vpack.c.bf16 %v5509_v6, %v5507_v10  ;;  %v1953_v27 = vmul.f32 0.01, %v1905_v13  ;;  %vm1929_vm9 = vcmp.ge.f32.partialorder %v1905_v13, 0.0 }
 0x4da   : > { %v1812_v21 = vmul.f32 %v1787_v58, %v1714_v15  ;;  %v1954_v24 = vmul.f32 0.01, %v1906_v8  ;;  %vm1930_vm2 = vcmp.ge.f32.partialorder %v1906_v8, 0.0  ;;  %v1992_v58 = vld [vmem:[#allocation8 + $0x58] sm:$0xff]  ;;  %v5560_v1 = vrot.slane %v2167_v62, %v2175_v61 }
 0x4db   : > { %v1907_v23 = vadd.f32 %v1883_v20, %v1811_v14  ;;  %3677 = vmatprep.subr.bf16.mxu0 %v3676_v19  ;;  %v5523_v36 = vsel %vm1929_vm9, %v1905_v13, %v1953_v27  ;;  %v5562_v2 = vrot.slane %v2167_v62, %v2171_v63 }
 0x4dc   : > { %v1908_v26 = vadd.f32 %v1883_v20, %v1812_v21  ;;  %3679 = vmatpush1.bf16.msra.mxu0 %v3678_v22  ;;  %v5519_v34 = vsel %vm1930_vm2, %v1906_v8, %v1954_v24 }
 0x4dd   : > { %vm1931_vm8 = vcmp.ge.f32.partialorder %v1907_v23, 0.0  ;;  %v1955_v28 = vmul.f32 0.01, %v1907_v23 }
 0x4de   : > { %vm1932_vm11 = vcmp.ge.f32.partialorder %v1908_v26, 0.0  ;;  %v1956_v31 = vmul.f32 0.01, %v1908_v26 }
 0x4df   : > { %v5517_v33 = vsel %vm1931_vm8, %v1907_v23, %v1955_v28 }
 0x4e0   : > { %6096 = vst [vmem:[#allocation22_spill] sm:$0xff] %v5517_v33  ;;  %v5521_v35 = vsel %vm1932_vm11, %v1908_v26, %v1956_v31  ;;  %v3682_v38 = vpack.c.bf16 %v5517_v33, %v5523_v36 }
 0x4e1   : > { %6097 = vst [vmem:[#allocation23_spill] sm:$0xff] %v5521_v35  ;;  %v3680_v37 = vpack.c.bf16 %v5521_v35, %v5519_v34 }
 0x4e3   : > { %3681 = vmatprep.subr.bf16.mxu0 %v3680_v37 }
 0x4e4   : > { %3683 = vmatpush1.bf16.msra.mxu0 %v3682_v38 }
 0x4e7   : > { %3431 = vmatmul.mubr.msk.f32.vlgmr.msra.gmra.mrb[12].mxu0 %vm1993_vm14, %v1981_v39 }
 0x4e8   : > { %2100 = vmatprep.mubr.f32.mxu0 %v6067_v0 }
 0x4eb   : > { %3432 = vmatmul.mubr.msk.f32.gmra.mrb[14].mxu0 %vm1993_vm14, %v1982_v41 }
 0x4ec   : > { %2106 = vmatprep.mubr.f32.mxu0 %v6067_v0 }
 0x4ef   : > { %3433 = vmatmul.mubr.msk.f32.gmra.mrb[16].mxu0 %vm1993_vm14, %v1983_v42 }
 0x4f0   : > { %2112 = vmatprep.mubr.f32.mxu0 %v6067_v0 }
 0x4f3   : > { %3434 = vmatmul.mubr.msk.f32.gmra.mrb[18].mxu0 %vm1993_vm14, %v1984_v43 }
 0x4f4   : > { %2118 = vmatprep.mubr.f32.mxu0 %v6067_v0 }
 0x4f7   : > { %3435 = vmatmul.mubr.msk.f32.gmra.mrb[20].mxu0 %vm1993_vm14, %v1985_v46 }
 0x4f8   : > { %2124 = vmatprep.mubr.f32.mxu0 %v6067_v0 }
 0x4fb   : > { %3436 = vmatmul.mubr.msk.f32.gmra.mrb[22].mxu0 %vm1993_vm14, %v1986_v48 }
 0x4fc   : > { %2130 = vmatprep.mubr.f32.mxu0 %v6067_v0 }
 0x4ff   : > { %3437 = vmatmul.mubr.msk.f32.gmra.mrb[24].mxu0 %vm1993_vm14, %v1987_v49 }
 0x500   : > { %2136 = vmatprep.mubr.f32.mxu0 %v6067_v0 }
 0x503   : > { %3438 = vmatmul.mubr.msk.f32.gmra.mrb[26].mxu0 %vm1993_vm14, %v1988_v51 }
 0x504   : > { %2142 = vmatprep.mubr.f32.mxu0 %v6067_v0 }
 0x507   : > { %3439 = vmatmul.mubr.msk.f32.gmra.mrb[28].mxu0 %vm1993_vm14, %v1989_v52 }
 0x508   : > { %2148 = vmatprep.mubr.f32.mxu0 %v6067_v0 }
 0x50b   : > { %3440 = vmatmul.mubr.msk.f32.gmra.mrb[30].mxu0 %vm1993_vm14, %v1990_v53 }
 0x50c   : > { %2154 = vmatprep.mubr.f32.mxu0 %v6067_v0 }
 0x50f   : > { %3441 = vmatmul.mubr.msk.f32.gmra.mrb[32].mxu0 %vm1993_vm14, %v1991_v57 }
 0x510   : > { %2160 = vmatprep.mubr.f32.mxu0 %v6067_v0 }
 0x513   : > { %3442 = vmatmul.mubr.msk.f32.gmra.mrb[34].mxu0 %vm1993_vm14, %v1992_v58 }
 0x5ba   : > { %v2096_v3 = vpop.f32.mrb[12].mxu0 }
 0x5bb   : > { %v2098_v4 = vpop.f32.mrb[13].mxu0  ;;  %v2179_v8 = vmul.f32 %v5562_v2, %v2096_v3 }
 0x5bc   : > { %v2180_v5 = vmul.f32 %v5560_v1, %v2098_v4 }
 0x5be   : > { %v2204_v9 = vsel %vm2203_vm15, %v2180_v5, 0.0  ;;  %v2102_v13 = vpop.f32.mrb[14].mxu0 }
 0x5bf   : > { %v2205_v14 = vadd.f32 %v2204_v9, %v2179_v8  ;;  %v2104_v15 = vpop.f32.mrb[15].mxu0  ;;  %v2181_v20 = vmul.f32 %v5562_v2, %v2102_v13 }
 0x5c0   : > { %v2182_v19 = vmul.f32 %v5560_v1, %v2104_v15 }
 0x5c1   : > { %2206 = vadd.xlane.f32.xlu0 %v2205_v14 }
 0x5c2   : > { %v2208_v21 = vsel %vm2203_vm15, %v2182_v19, 0.0  ;;  %v2108_v22 = vpop.f32.mrb[16].mxu0 }
 0x5c3   : > { %v2209_v23 = vadd.f32 %v2208_v21, %v2181_v20  ;;  %v2110_v24 = vpop.f32.mrb[17].mxu0  ;;  %v2183_v27 = vmul.f32 %v5562_v2, %v2108_v22 }
 0x5c4   : > { %v2184_v26 = vmul.f32 %v5560_v1, %v2110_v24 }
 0x5c5   : > { %2210 = vadd.xlane.f32.xlu1 %v2209_v23 }
 0x5c6   : > { %v2212_v28 = vsel %vm2203_vm15, %v2184_v26, 0.0  ;;  %v2114_v31 = vpop.f32.mrb[18].mxu0 }
 0x5c7   : > { %v2213_v37 = vadd.f32 %v2212_v28, %v2183_v27  ;;  %v2116_v38 = vpop.f32.mrb[19].mxu0  ;;  %v2185_v41 = vmul.f32 %v5562_v2, %v2114_v31 }
 0x5c8   : > { %v2186_v39 = vmul.f32 %v5560_v1, %v2116_v38 }
 0x5c9   : > { %2214 = vadd.xlane.f32.xlu0 %v2213_v37 }
 0x5ca   : > { %v2216_v42 = vsel %vm2203_vm15, %v2186_v39, 0.0  ;;  %v2120_v43 = vpop.f32.mrb[20].mxu0 }
 0x5cb   : > { %v2217_v46 = vadd.f32 %v2216_v42, %v2185_v41  ;;  %v2122_v48 = vpop.f32.mrb[21].mxu0  ;;  %v2187_v51 = vmul.f32 %v5562_v2, %v2120_v43 }
 0x5cc   : > { %v2188_v49 = vmul.f32 %v5560_v1, %v2122_v48 }
 0x5cd   : > { %2218 = vadd.xlane.f32.xlu0 %v2217_v46 }
 0x5ce   : > { %v2220_v52 = vsel %vm2203_vm15, %v2188_v49, 0.0  ;;  %v2126_v53 = vpop.f32.mrb[22].mxu0 }
 0x5cf   : > { %v2221_v57 = vadd.f32 %v2220_v52, %v2187_v51  ;;  %v2128_v58 = vpop.f32.mrb[23].mxu0  ;;  %v2189_v62 = vmul.f32 %v5562_v2, %v2126_v53 }
 0x5d0   : > { %v2190_v61 = vmul.f32 %v5560_v1, %v2128_v58 }
 0x5d1   : > { %2222 = vadd.xlane.f32.xlu1 %v2221_v57 }
 0x5d2   : > { %v2224_v63 = vsel %vm2203_vm15, %v2190_v61, 0.0  ;;  %v2132_v3 = vpop.f32.mrb[24].mxu0 }
 0x5d3   : > { %v2225_v4 = vadd.f32 %v2224_v63, %v2189_v62  ;;  %v2134_v5 = vpop.f32.mrb[25].mxu0  ;;  %v2191_v9 = vmul.f32 %v5562_v2, %v2132_v3 }
 0x5d4   : > { %v2192_v8 = vmul.f32 %v5560_v1, %v2134_v5 }
 0x5d5   : > { %2226 = vadd.xlane.f32.xlu0 %v2225_v4 }
 0x5d6   : > { %v2228_v13 = vsel %vm2203_vm15, %v2192_v8, 0.0  ;;  %v2138_v14 = vpop.f32.mrb[26].mxu0 }
 0x5d7   : > { %v2229_v15 = vadd.f32 %v2228_v13, %v2191_v9  ;;  %v2140_v19 = vpop.f32.mrb[27].mxu0  ;;  %v2193_v21 = vmul.f32 %v5562_v2, %v2138_v14 }
 0x5d8   : > { %v2194_v20 = vmul.f32 %v5560_v1, %v2140_v19 }
 0x5d9   : > { %2230 = vadd.xlane.f32.xlu1 %v2229_v15 }
 0x5da   : > { %v2232_v22 = vsel %vm2203_vm15, %v2194_v20, 0.0  ;;  %v2144_v23 = vpop.f32.mrb[28].mxu0 }
 0x5db   : > { %v2233_v24 = vadd.f32 %v2232_v22, %v2193_v21  ;;  %v2146_v26 = vpop.f32.mrb[29].mxu0  ;;  %v2195_v28 = vmul.f32 %v5562_v2, %v2144_v23  ;;  %v2257_v21 = vld [vmem:[%s6046_s9 + $0x28] sm:$0xff]  ;;  %v2258_v22 = vld [vmem:[%s6046_s9 + $0x30] sm:$0xff]  ;;  %v2259_v23 = vld [vmem:[%s6046_s9 + $0x38] sm:$0xff] }
 0x5dc   : > { %v2196_v27 = vmul.f32 %v5560_v1, %v2146_v26  ;;  %v2261_v26 = vld [vmem:[%s6046_s9 + $0x48] sm:$0xff] }
 0x5dd   : > { %2234 = vadd.xlane.f32.xlu0 %v2233_v24 }
 0x5de   : > { %v2236_v31 = vsel %vm2203_vm15, %v2196_v27, 0.0  ;;  %v2150_v37 = vpop.f32.mrb[30].mxu0 }
 0x5df   : > { %v2237_v38 = vadd.f32 %v2236_v31, %v2195_v28  ;;  %v2152_v39 = vpop.f32.mrb[31].mxu0  ;;  %v2197_v42 = vmul.f32 %v5562_v2, %v2150_v37  ;;  %v2252_v28 = vld [vmem:[%s6046_s9] sm:$0xff]  ;;  %v2254_v31 = vld [vmem:[%s6046_s9 + $0x10] sm:$0xff] }
 0x5e0   : > { %v2198_v41 = vmul.f32 %v5560_v1, %v2152_v39  ;;  %v2255_v39 = vld [vmem:[%s6046_s9 + $0x18] sm:$0xff] }
 0x5e1   : > { %2238 = vadd.xlane.f32.xlu1 %v2237_v38 }
 0x5e2   : > { %v2240_v43 = vsel %vm2203_vm15, %v2198_v41, 0.0  ;;  %v2156_v46 = vpop.f32.mrb[32].mxu0  ;;  %v2260_v41 = vld [vmem:[%s6046_s9 + $0x40] sm:$0xff] }
 0x5e3   : > { %v2241_v48 = vadd.f32 %v2240_v43, %v2197_v42  ;;  %v2158_v49 = vpop.f32.mrb[33].mxu0  ;;  %v2199_v52 = vmul.f32 %v5562_v2, %v2156_v46  ;;  %v2262_v42 = vld [vmem:[%s6046_s9 + $0x50] sm:$0xff] }
 0x5e4   : > { %v2200_v51 = vmul.f32 %v5560_v1, %v2158_v49 }
 0x5e5   : > { %2242 = vadd.xlane.f32.xlu0 %v2241_v48 }
 0x5e6   : > { %v2244_v53 = vsel %vm2203_vm15, %v2200_v51, 0.0  ;;  %v2162_v57 = vpop.f32.mrb[34].mxu0 }
 0x5e7   : > { %v2245_v58 = vadd.f32 %v2244_v53, %v2199_v52  ;;  %v2164_v61 = vpop.f32.mrb[35].mxu0  ;;  %v2201_v63 = vmul.f32 %v5562_v2, %v2162_v57  ;;  %v2256_v2 = vld [vmem:[%s6046_s9 + $0x20] sm:$0xff] }
 0x5e8   : > { %v2202_v62 = vmul.f32 %v5560_v1, %v2164_v61  ;;  %v2253_v1 = vld [vmem:[%s6046_s9 + $0x8] sm:$0xff] }
 0x5e9   : > { %2246 = vadd.xlane.f32.xlu1 %v2245_v58 }
 0x5ea   : > { %v2248_v3 = vsel %vm2203_vm15, %v2202_v62, 0.0 }
 0x5eb   : > { %v2249_v4 = vadd.f32 %v2248_v3, %v2201_v63  ;;  %v2263_v3 = vld [vmem:[%s6046_s9 + $0x58] sm:$0xff] }
 0x5ed   : > { %2250 = vadd.xlane.f32.xlu0 %v2249_v4 }
 0x64e   : > { %v2207_v5 = vpop.xlane.xlu0 %2206 }
 0x64f   : > { %v2264_v51 = vadd.f32 %v2252_v28, %v2207_v5 }
 0x652   : > { %v2211_v9 = vpop.xlane.xlu1 %2210 }
 0x653   : > { %v2265_v38 = vadd.f32 %v2253_v1, %v2211_v9 }
 0x655   : > { %v2277_v63 = vsel %vm485_vm0, %v2265_v38, -inf }
 0x656   : > { %v2215_v8 = vpop.xlane.xlu0 %2214 }
 0x657   : > { %v2266_v52 = vadd.f32 %v2254_v31, %v2215_v8 }
 0x65a   : > { %v2219_v13 = vpop.xlane.xlu0 %2218 }
 0x65b   : > { %v2267_v57 = vadd.f32 %v2255_v39, %v2219_v13  ;;  %v2276_v13 = vsel %vm485_vm0, %v2264_v51, -inf }
 0x65e   : > { %v2223_v14 = vpop.xlane.xlu1 %2222 }
 0x65f   : > { %v2268_v43 = vadd.f32 %v2256_v2, %v2223_v14  ;;  %v2278_v14 = vsel %vm485_vm0, %v2266_v52, -inf }
 0x661   : > { %v2280_v4 = vsel %vm485_vm0, %v2268_v43, -inf }
 0x662   : > { %v2227_v15 = vpop.xlane.xlu0 %2226 }
 0x663   : > { %v5624_v37 = vadd.f32 %v2257_v21, %v2227_v15 }
 0x665   : > { %v2282_v58 = vsel %vm485_vm0, %v5624_v37, -inf }
 0x666   : > { %v2231_v19 = vpop.xlane.xlu1 %2230  ;;  %v2283_v15 = vmax.f32 %v2277_v63, %v2282_v58 }
 0x667   : > { %v2270_v46 = vadd.f32 %v2258_v22, %v2231_v19  ;;  %v2281_v22 = vmax.f32 %v2276_v13, %v2280_v4 }
 0x669   : > { %v2284_v9 = vsel %vm485_vm0, %v2270_v46, -inf }
 0x66a   : > { %v2235_v20 = vpop.xlane.xlu0 %2234 }
 0x66b   : > { %v5635_v48 = vadd.f32 %v2259_v23, %v2235_v20  ;;  %v2279_v20 = vsel %vm485_vm0, %v2267_v57, -inf  ;;  %v2285_v23 = vmax.f32 %v2278_v14, %v2284_v9 }
 0x66d   : > { %v2286_v5 = vsel %vm485_vm0, %v5635_v48, -inf }
 0x66e   : > { %v2239_v24 = vpop.xlane.xlu1 %2238 }
 0x66f   : > { %v2272_v61 = vadd.f32 %v2260_v41, %v2239_v24  ;;  %v2287_v24 = vmax.f32 %v2279_v20, %v2286_v5 }
 0x671   : > { %v2288_v21 = vsel %vm485_vm0, %v2272_v61, -inf }
 0x672   : > { %v2243_v27 = vpop.xlane.xlu0 %2242  ;;  %v2289_v28 = vmax.f32 %v2281_v22, %v2288_v21 }
 0x673   : > { %v5637_v49 = vadd.f32 %v2261_v26, %v2243_v27 }
 0x675   : > { %v2290_v8 = vsel %vm485_vm0, %v5637_v49, -inf }
 0x676   : > { %v2247_v53 = vpop.xlane.xlu1 %2246  ;;  %v2291_v26 = vmax.f32 %v2283_v15, %v2290_v8 }
 0x677   : > { %v5641_v62 = vadd.f32 %v2262_v42, %v2247_v53 }
 0x678   : > { %v2296_v41 = vmax.f32 %v2289_v28, %v2291_v26 }
 0x679   : > { %v2292_v1 = vsel %vm485_vm0, %v5641_v62, -inf }
 0x67a   : > { %v2251_v19 = vpop.xlane.xlu0 %2250  ;;  %v2293_v31 = vmax.f32 %v2285_v23, %v2292_v1 }
 0x67b   : > { %v2275_v2 = vadd.f32 %v2263_v3, %v2251_v19 }
 0x67d   : > { %v2294_v27 = vsel %vm485_vm0, %v2275_v2, -inf }
 0x67e   : > { %v2295_v39 = vmax.f32 %v2287_v24, %v2294_v27 }
 0x680   : > { %v2297_v42 = vmax.f32 %v2293_v31, %v2295_v39 }
 0x682   : > { %v2298_v53 = vmax.f32 %v2296_v41, %v2297_v42 }
 0x684   : > { %v2299_v58 = vrot.slane %v2298_v53, 4 }
 0x686   : > { %v2300_v63 = vmax.f32 %v2298_v53, %v2299_v58 }
 0x688   : > { %v2301_v0 = vrot.slane %v2300_v63, 2 }
 0x68a   : > { %v2302_v59 = vmax.f32 %v2300_v63, %v2301_v0 }
 0x68c   : > { %v2303_v60 = vrot.slane %v2302_v59, 1 }
 0x68e   : > { %v2304_v35 = vmax.f32 %v2302_v59, %v2303_v60 }
 0x690   : > { %v2305_v33 = vsub.f32 %v2264_v51, %v2304_v35  ;;  %v2306_v3 = vsub.f32 %v2265_v38, %v2304_v35  ;;  %v2307_v4 = vsub.f32 %v2266_v52, %v2304_v35  ;;  %v2308_v9 = vsub.f32 %v2267_v57, %v2304_v35 }
 0x691   : > { %v2309_v5 = vsub.f32 %v2268_v43, %v2304_v35  ;;  %v2310_v15 = vsub.f32 %v5624_v37, %v2304_v35  ;;  %v2311_v20 = vsub.f32 %v2270_v46, %v2304_v35  ;;  %v2312_v0 = vsub.f32 %v5635_v48, %v2304_v35 }
 0x692   : > { %v2317_v8 = vmul.f32 1.442695, %v2305_v33  ;;  %v2319_v13 = vmul.f32 1.442695, %v2306_v3  ;;  %v2321_v14 = vmul.f32 1.442695, %v2307_v4  ;;  %v2313_v60 = vsub.f32 %v2272_v61, %v2304_v35 }
 0x693   : > { %v2323_v19 = vmul.f32 1.442695, %v2308_v9  ;;  %v2325_v21 = vmul.f32 1.442695, %v2309_v5  ;;  %v2327_v59 = vmul.f32 1.442695, %v2310_v15  ;;  %v2314_v43 = vsub.f32 %v5637_v49, %v2304_v35 }
 0x694   : > { %4535 = vpow2.f32 %v2317_v8  ;;  %v2329_v38 = vmul.f32 1.442695, %v2311_v20  ;;  %v2331_v33 = vmul.f32 1.442695, %v2312_v0  ;;  %v2315_v51 = vsub.f32 %v5641_v62, %v2304_v35 }
 0x695   : > { %4537 = vpow2.f32 %v2319_v13  ;;  %v2333_v37 = vmul.f32 1.442695, %v2313_v60  ;;  %v2316_v57 = vsub.f32 %v2275_v2, %v2304_v35  ;;  %v2335_v1 = vmul.f32 1.442695, %v2314_v43 }
 0x696   : > { %4539 = vpow2.f32 %v2321_v14  ;;  %v2337_v24 = vmul.f32 1.442695, %v2315_v51 }
 0x697   : > { %4541 = vpow2.f32 %v2323_v19  ;;  %v2339_v62 = vmul.f32 1.442695, %v2316_v57 }
 0x698   : > { %4543 = vpow2.f32 %v2325_v21 }
 0x699   : > { %4545 = vpow2.f32 %v2327_v59 }
 0x69a   : > { %4547 = vpow2.f32 %v2329_v38 }
 0x69b   : > { %4549 = vpow2.f32 %v2331_v33 }
 0x69c   : > { %4551 = vpow2.f32 %v2333_v37 }
 0x69d   : > { %4553 = vpow2.f32 %v2335_v1 }
 0x69e   : > { %v4536_v52 = vpop.eup %4535  ;;  %4555 = vpow2.f32 %v2337_v24 }
 0x69f   : > { %v4538_v46 = vpop.eup %4537  ;;  %v2341_v48 = vsel %vm485_vm0, %v4536_v52, 0.0  ;;  %4557 = vpow2.f32 %v2339_v62 }
 0x6a0   : > { %v4540_v22 = vpop.eup %4539  ;;  %v2342_v61 = vsel %vm485_vm0, %v4538_v46, 0.0 }
 0x6a1   : > { %v4542_v23 = vpop.eup %4541  ;;  %v2343_v49 = vadd.f32 %v2342_v61, %v2341_v48  ;;  %v2344_v26 = vsel %vm485_vm0, %v4540_v22, 0.0 }
 0x6a2   : > { %v4544_v27 = vpop.eup %4543  ;;  %v2346_v31 = vsel %vm485_vm0, %v4542_v23, 0.0 }
 0x6a3   : > { %v2345_v28 = vadd.f32 %v2344_v26, %v2343_v49  ;;  %v4546_v35 = vpop.eup %4545  ;;  %v2348_v39 = vsel %vm485_vm0, %v4544_v27, 0.0 }
 0x6a4   : > { %v4548_v41 = vpop.eup %4547  ;;  %v2350_v53 = vsel %vm485_vm0, %v4546_v35, 0.0 }
 0x6a5   : > { %v2347_v2 = vadd.f32 %v2346_v31, %v2345_v28  ;;  %v4550_v58 = vpop.eup %4549  ;;  %v2352_v3 = vsel %vm485_vm0, %v4548_v41, 0.0 }
 0x6a6   : > { %v4552_v4 = vpop.eup %4551  ;;  %v2354_v5 = vsel %vm485_vm0, %v4550_v58, 0.0 }
 0x6a7   : > { %v2349_v42 = vadd.f32 %v2348_v39, %v2347_v2  ;;  %v4554_v8 = vpop.eup %4553  ;;  %v2356_v14 = vsel %vm485_vm0, %v4552_v4, 0.0 }
 0x6a8   : > { %v4556_v15 = vpop.eup %4555  ;;  %v2358_v20 = vsel %vm485_vm0, %v4554_v8, 0.0 }
 0x6a9   : > { %v2351_v63 = vadd.f32 %v2350_v53, %v2349_v42  ;;  %v4558_v21 = vpop.eup %4557  ;;  %v2360_v59 = vsel %vm485_vm0, %v4556_v15, 0.0 }
 0x6aa   : > { %v2362_v38 = vsel %vm485_vm0, %v4558_v21, 0.0 }
 0x6ab   : > { %v2353_v9 = vadd.f32 %v2352_v3, %v2351_v63 }
 0x6ad   : > { %v2355_v13 = vadd.f32 %v2354_v5, %v2353_v9 }
 0x6af   : > { %v2357_v19 = vadd.f32 %v2356_v14, %v2355_v13 }
 0x6b1   : > { %v2359_v0 = vadd.f32 %v2358_v20, %v2357_v19 }
 0x6b3   : > { %v2361_v60 = vadd.f32 %v2360_v59, %v2359_v0 }
 0x6b5   : > { %v2363_v43 = vadd.f32 %v2362_v38, %v2361_v60 }
 0x6b7   : > { %v2364_v33 = vrot.slane %v2363_v43, 4 }
 0x6b9   : > { %v2365_v51 = vadd.f32 %v2364_v33, %v2363_v43 }
 0x6bb   : > { %v2366_v37 = vrot.slane %v2365_v51, 2 }
 0x6bd   : > { %v2367_v57 = vadd.f32 %v2366_v37, %v2365_v51 }
 0x6bf   : > { %v2368_v1 = vrot.slane %v2367_v57, 1 }
 0x6c1   : > { %v2369_v48 = vadd.f32 %v2368_v1, %v2367_v57 }
 0x6c3   : > { %4559 = vrcp.f32 %v2369_v48 }
 0x6cd   : > { %v4560_v61 = vpop.eup %4559 }
 0x6ce   : > { %v2372_v24 = vmul.f32 %v4560_v61, %v4538_v46  ;;  %v2371_v49 = vmul.f32 %v4560_v61, %v4536_v52  ;;  %v2375_v26 = vmul.f32 %v4560_v61, %v4544_v27  ;;  %v2373_v62 = vmul.f32 %v4560_v61, %v4540_v22 }
 0x6cf   : > { %v2377_v28 = vmul.f32 %v4560_v61, %v4548_v41  ;;  %v2374_v31 = vmul.f32 %v4560_v61, %v4542_v23  ;;  %v2379_v2 = vmul.f32 %v4560_v61, %v4552_v4  ;;  %v2376_v39 = vmul.f32 %v4560_v61, %v4546_v35 }
 0x6d0   : > { %2390 = vperm.xlu0 %4054, %v2372_v24   ;;  %2385 = vperm.xlu1 %4053, %v2371_v49   ;;  %v2381_v42 = vmul.f32 %v4560_v61, %v4556_v15  ;;  %v2378_v53 = vmul.f32 %v4560_v61, %v4550_v58  ;;  %v2380_v46 = vmul.f32 %v4560_v61, %v4554_v8 }
 0x6d1   : > { %v2382_v52 = vmul.f32 %v4560_v61, %v4558_v21 }
 0x6d4   : > { %2405 = vperm.xlu0 %4054, %v2375_v26   ;;  %2395 = vperm.xlu1 %4053, %v2373_v62   ;;  %v6099_v26 = vld [vmem:[#allocation22_spill] sm:$0xff] }
 0x6d8   : > { %2415 = vperm.xlu0 %4054, %v2377_v28   ;;  %2400 = vperm.xlu1 %4053, %v2374_v31   ;;  %v6100_v28 = vld [vmem:[#allocation23_spill] sm:$0xff] }
 0x6dc   : > { %2425 = vperm.xlu0 %4054, %v2379_v2   ;;  %2410 = vperm.xlu1 %4053, %v2376_v39  }
 0x6e0   : > { %2435 = vperm.xlu0 %4054, %v2381_v42   ;;  %2420 = vperm.xlu1 %4053, %v2378_v53  }
 0x6e4   : > { %2430 = vperm.xlu1 %4053, %v2380_v46  }
 0x6e8   : > { %2440 = vperm.xlu1 %4053, %v2382_v52  }
 0x74f   : > { %v2391_v27 = vpop.permute.xlu0 %2390  ;;  %v2386_v22 = vpop.permute.xlu1 %2385 }
 0x750   : > { %v2445_v63 = vmul.f32 %v2391_v27, %v5455_v25  ;;  %v2446_v23 = vmul.f32 %v2391_v27, %v5459_v30  ;;  %v2443_v41 = vmul.f32 %v2386_v22, %v5461_v32  ;;  %v2444_v35 = vmul.f32 %v2386_v22, %v5457_v29 }
 0x752   : > { %2470 = vst.msk [vmem:[#allocation4 + $0x18] sm:$0xff] %vm2203_vm15, %v2446_v23  ;;  %2468 = vst.msk [vmem:[#allocation4 + $0x8] sm:$0xff] %vm2203_vm15, %v2444_v35  ;;  %v3686_v20 = vpack.c.bf16 %v2445_v63, %v2443_v41 }
 0x753   : > { %v2406_v58 = vpop.permute.xlu0 %2405  ;;  %v2396_v3 = vpop.permute.xlu1 %2395 }
 0x754   : > { %v5683_v4 = vmul.f32 %v2406_v58, %v5487_v18  ;;  %v2452_v9 = vmul.f32 %v2406_v58, %v5483_v16  ;;  %v2447_v5 = vmul.f32 %v2396_v3, %v5473_v56  ;;  %v2448_v25 = vmul.f32 %v2396_v3, %v5469_v54 }
 0x756   : > { %2476 = vst.msk [vmem:[#allocation4 + $0x48] sm:$0xff] %vm2203_vm15, %v2452_v9  ;;  %2472 = vst.msk [vmem:[#allocation4 + $0x28] sm:$0xff] %vm2203_vm15, %v2448_v25  ;;  %v3257_v25 = vld [vmem:[%s6048_s11] sm:$0xff] }
 0x757   : > { %v2416_v29 = vpop.permute.xlu0 %2415  ;;  %v2401_v30 = vpop.permute.xlu1 %2400 }
 0x758   : > { %v5691_v32 = vmul.f32 %v2416_v29, %v5499_v47  ;;  %v2456_v8 = vmul.f32 %v2416_v29, %v5495_v44  ;;  %v2449_v18 = vmul.f32 %v2401_v30, %v5467_v50  ;;  %v2450_v13 = vmul.f32 %v2401_v30, %v5471_v55  ;;  %v3258_v29 = vld [vmem:[%s6048_s11 + $0x8] sm:$0xff]  ;;  %v3271_v30 = vld [vmem:[%s6049_s12] sm:$0xff] }
 0x759   : > { %v2494_v16 = vld [vmem:[#allocation4 + $0x18] sm:$0xff]  ;;  %v2492_v14 = vld [vmem:[#allocation4 + $0x8] sm:$0xff] }
 0x75a   : > { %2480 = vst.msk [vmem:[#allocation4 + $0x68] sm:$0xff] %vm2203_vm15, %v2456_v8  ;;  %2474 = vst.msk [vmem:[#allocation4 + $0x38] sm:$0xff] %vm2203_vm15, %v2450_v13  ;;  %v5698_v54 = vpack.i.bf16 %v2494_v16, %v2445_v63  ;;  %v3684_v56 = vpack.c.bf16 %v2494_v16, %v2492_v14  ;;  %v5700_v15 = vpack.i.bf16 %v2492_v14, %v2443_v41  ;;  %v6101_v8 = vld [vmem:[#allocation24_spill] sm:$0xff]  ;;  %v6102_v13 = vlaneseq }
 0x75b   : > { %v2426_v19 = vpop.permute.xlu0 %2425  ;;  %v2411_v47 = vpop.permute.xlu1 %2410  ;;  %v4737_v14 = vmov 0.0|0.0  }
 0x75c   : > { %v5703_v44 = vmul.f32 %v2426_v19, %v5511_v12  ;;  %v2460_v50 = vmul.f32 %v2426_v19, %v5507_v10  ;;  %v2453_v55 = vmul.f32 %v2411_v47, %v5481_v11  ;;  %v2454_v21 = vmul.f32 %v2411_v47, %v5485_v17  ;;  %4301 = vrot.lane.b32.xlu1 %v5698_v54, %s4728_s19 }
 0x75d   : > { %3685 = vmatprep.subr.bf16.mxu0 %v3684_v56  ;;  %4296 = vrot.lane.b32.xlu0 %v5700_v15, %s4728_s19  ;;  %v2496_v0 = vld [vmem:[#allocation4 + $0x28] sm:$0xff]  ;;  %v3076_v16 = vand.u32 127, %v6102_v13  ;;  %v3047_v56 = vadd.s32 24, %v6101_v8  ;;  %v3048_v19 = vadd.s32 32, %v6101_v8  ;;  %v3049_v47 = vadd.s32 40, %v6101_v8 }
 0x75e   : > { %2484 = vst.msk [vmem:[#allocation4 + $0x88] sm:$0xff] %vm2203_vm15, %v2460_v50  ;;  %2478 = vst.msk [vmem:[#allocation4 + $0x58] sm:$0xff] %vm2203_vm15, %v2454_v21  ;;  %3687 = vmatpush1.bf16.msra.mxu0 %v3686_v20  ;;  %v5714_v12 = vpack.i.bf16 %v2496_v0, %v2447_v5  ;;  %v2500_v43 = vld [vmem:[#allocation4 + $0x48] sm:$0xff]  ;;  %3804 = vmatprep.subr.bf16.mxu1 %v4737_v14  ;;  %v4738_v20 = vmov 1.0|1.0   ;;  %v3051_v50 = vadd.s32 56, %v6101_v8 }
 0x75f   : > { %v2436_v10 = vpop.permute.xlu0 %2435  ;;  %v2421_v59 = vpop.permute.xlu1 %2420  ;;  %v3052_v21 = vadd.s32 64, %v6101_v8 }
 0x760   : > { %v2463_v11 = vmul.f32 %v2436_v10, %v5523_v36  ;;  %v2464_v17 = vmul.f32 %v2436_v10, %v5519_v34  ;;  %v2457_v60 = vmul.f32 %v2421_v59, %v5493_v40  ;;  %v2458_v38 = vmul.f32 %v2421_v59, %v5497_v45 }
 0x761   : > { %4306 = vrot.lane.b32.xlu0 %v5714_v12, %s4728_s19  ;;  %v2498_v33 = vld [vmem:[#allocation4 + $0x38] sm:$0xff]  ;;  %v5727_v36 = vpack.i.bf16 %v2500_v43, %v5683_v4  ;;  %v3690_v34 = vpack.c.bf16 %v2449_v18, %v2447_v5  ;;  %v2504_v1 = vld [vmem:[#allocation4 + $0x68] sm:$0xff] }
 0x762   : > { %2488 = vst.msk [vmem:[#allocation4 + $0xa8] sm:$0xff] %vm2203_vm15, %v2464_v17  ;;  %2482 = vst.msk [vmem:[#allocation4 + $0x78] sm:$0xff] %vm2203_vm15, %v2458_v38  ;;  %v3688_v51 = vpack.c.bf16 %v2498_v33, %v2496_v0  ;;  %v5724_v37 = vpack.i.bf16 %v2498_v33, %v2449_v18  ;;  %v3698_v52 = vpack.c.bf16 %v2457_v60, %v5691_v32  ;;  %v2876_v5 = vld [vmem:[#allocation10 + $0x8] sm:$0xff]  ;;  %v3045_v18 = vadd.s32 8, %v6101_v8 }
 0x763   : > { %v2431_v57 = vpop.permute.xlu1 %2430  ;;  %2953 = vmatprep.mubr.f32.mxu0 %v2876_v5  ;;  %v3053_v0 = vadd.s32 72, %v6101_v8  ;;  %v3054_v33 = vadd.s32 80, %v6101_v8 }
 0x764   : > { %v2461_v40 = vmul.f32 %v2431_v57, %v5505_v7  ;;  %v2462_v45 = vmul.f32 %v2431_v57, %v5509_v6  ;;  %3689 = vmatprep.subr.bf16.mxu0 %v3688_v51  ;;  %4311 = vrot.lane.b32.xlu1 %v5724_v37, %s4728_s19  ;;  %v5739_v7 = vpack.i.bf16 %v2504_v1, %v5691_v32  ;;  %v3272_v32 = vld [vmem:[%s6049_s12 + $0x8] sm:$0xff]  ;;  %v3055_v57 = vadd.s32 88, %v6101_v8 }
 0x765   : > { %4316 = vrot.lane.b32.xlu0 %v5727_v36, %s4728_s19  ;;  %3691 = vmatpush1.bf16.msra.mxu0 %v3690_v34  ;;  %v2502_v48 = vld [vmem:[#allocation4 + $0x58] sm:$0xff]  ;;  %v3694_v6 = vpack.c.bf16 %v2453_v55, %v5683_v4  ;;  %v2508_v2 = vld [vmem:[#allocation4 + $0x88] sm:$0xff] }
 0x766   : > { %2486 = vst.msk [vmem:[#allocation4 + $0x98] sm:$0xff] %vm2203_vm15, %v2462_v45  ;;  %v3692_v61 = vpack.c.bf16 %v2502_v48, %v2500_v43  ;;  %v5736_v24 = vpack.i.bf16 %v2502_v48, %v2453_v55  ;;  %v4335_v46 = vpack.i.bf16 %v2508_v2, %v5703_v44  ;;  %v3702_v35 = vpack.c.bf16 %v2461_v40, %v5703_v44 }
 0x767   : > { %v2441_v49 = vpop.permute.xlu1 %2440  ;;  %v3050_v44 = vadd.s32 48, %v6101_v8  ;;  %v3056_v45 = vadd.s32 96, %v6101_v8 }
 0x768   : > { %v2465_v62 = vmul.f32 %v2441_v49, %v6099_v26  ;;  %v2466_v31 = vmul.f32 %v2441_v49, %v6100_v28  ;;  %3693 = vmatprep.subr.bf16.mxu0 %v3692_v61  ;;  %4321 = vrot.lane.b32.xlu1 %v5736_v24, %s4728_s19 }
 0x769   : > { %4326 = vrot.lane.b32.xlu0 %v5739_v7, %s4728_s19  ;;  %3695 = vmatpush1.bf16.msra.mxu0 %v3694_v6  ;;  %v2506_v39 = vld [vmem:[#allocation4 + $0x78] sm:$0xff]  ;;  %v2512_v27 = vld [vmem:[#allocation4 + $0xa8] sm:$0xff] }
 0x76a   : > { %2490 = vst.msk [vmem:[#allocation4 + $0xb8] sm:$0xff] %vm2203_vm15, %v2466_v31  ;;  %v3696_v42 = vpack.c.bf16 %v2506_v39, %v2504_v1  ;;  %v4330_v53 = vpack.i.bf16 %v2506_v39, %v2457_v60  ;;  %v4345_v41 = vpack.i.bf16 %v2512_v27, %v2463_v11  ;;  %v3706_v9 = vpack.c.bf16 %v2465_v62, %v2463_v11 }
 0x76c   : > { %3697 = vmatprep.subr.bf16.mxu0 %v3696_v42  ;;  %4331 = vrot.lane.b32.xlu1 %v4330_v53, %s4728_s19 }
 0x76d   : > { %4336 = vrot.lane.b32.xlu0 %v4335_v46, %s4728_s19  ;;  %3699 = vmatpush1.bf16.msra.mxu0 %v3698_v52  ;;  %v2510_v22 = vld [vmem:[#allocation4 + $0x98] sm:$0xff] }
 0x76e   : > { %v3700_v63 = vpack.c.bf16 %v2510_v22, %v2508_v2  ;;  %v4340_v23 = vpack.i.bf16 %v2510_v22, %v2461_v40  ;;  %v3058_v2 = vadd.s32 112, %v6101_v8 }
 0x770   : > { %3701 = vmatprep.subr.bf16.mxu0 %v3700_v63  ;;  %4341 = vrot.lane.b32.xlu1 %v4340_v23, %s4728_s19 }
 0x771   : > { %4346 = vrot.lane.b32.xlu0 %v4345_v41, %s4728_s19  ;;  %3703 = vmatpush1.bf16.msra.mxu0 %v3702_v35  ;;  %v2514_v58 = vld [vmem:[#allocation4 + $0xb8] sm:$0xff] }
 0x772   : > { %v3704_v3 = vpack.c.bf16 %v2514_v58, %v2512_v27  ;;  %v4350_v4 = vpack.i.bf16 %v2514_v58, %v2465_v62  ;;  %v3060_v58 = vadd.s32 128, %v6101_v8 }
 0x774   : > { %3705 = vmatprep.subr.bf16.mxu0 %v3704_v3  ;;  %4351 = vrot.lane.b32.xlu1 %v4350_v4, %s4728_s19  ;;  %v3061_v3 = vadd.s32 136, %v6101_v8  ;;  %s5991_s19 = scalar_lea.hbm %s6105_s21, %s3515_s13 }
 0x775   : > { %4356 = vrot.lane.b32.xlu0 %v5700_v15, %s4729_s17  ;;  %3707 = vmatpush1.bf16.msra.mxu0 %v3706_v9 }
 0x778   : > { %4361 = vrot.lane.b32.xlu1 %v5698_v54, %s4729_s17 }
 0x779   : > { %4366 = vrot.lane.b32.xlu0 %v5714_v12, %s4729_s17 }
 0x77c   : > { %4371 = vrot.lane.b32.xlu1 %v5724_v37, %s4729_s17 }
 0x77d   : > { %4376 = vrot.lane.b32.xlu0 %v5727_v36, %s4729_s17 }
 0x780   : > { %4381 = vrot.lane.b32.xlu1 %v5736_v24, %s4729_s17 }
 0x781   : > { %4386 = vrot.lane.b32.xlu0 %v5739_v7, %s4729_s17 }
 0x784   : > { %4391 = vrot.lane.b32.xlu1 %v4330_v53, %s4729_s17 }
 0x785   : > { %4396 = vrot.lane.b32.xlu0 %v4335_v46, %s4729_s17 }
 0x788   : > { %4401 = vrot.lane.b32.xlu1 %v4340_v23, %s4729_s17 }
 0x789   : > { %4406 = vrot.lane.b32.xlu0 %v4345_v41, %s4729_s17 }
 0x78c   : > { %4411 = vrot.lane.b32.xlu1 %v4350_v4, %s4729_s17 }
 0x78d   : > { %4416 = vrot.lane.b32.xlu0 %v5700_v15, %s4730_s16 }
 0x790   : > { %4421 = vrot.lane.b32.xlu1 %v5698_v54, %s4730_s16 }
 0x791   : > { %4426 = vrot.lane.b32.xlu0 %v5714_v12, %s4730_s16 }
 0x794   : > { %4431 = vrot.lane.b32.xlu1 %v5724_v37, %s4730_s16 }
 0x795   : > { %4436 = vrot.lane.b32.xlu0 %v5727_v36, %s4730_s16 }
 0x798   : > { %4441 = vrot.lane.b32.xlu1 %v5736_v24, %s4730_s16 }
 0x799   : > { %4446 = vrot.lane.b32.xlu0 %v5739_v7, %s4730_s16 }
 0x79c   : > { %4451 = vrot.lane.b32.xlu1 %v4330_v53, %s4730_s16 }
 0x79d   : > { %4456 = vrot.lane.b32.xlu0 %v4335_v46, %s4730_s16 }
 0x7a0   : > { %4461 = vrot.lane.b32.xlu1 %v4340_v23, %s4730_s16 }
 0x7a1   : > { %4466 = vrot.lane.b32.xlu0 %v4345_v41, %s4730_s16 }
 0x7a4   : > { %4471 = vrot.lane.b32.xlu1 %v4350_v4, %s4730_s16  ;;  %s4739_s16 = smov [#allocation11]  }
 0x7a5   : > { %4476 = vrot.lane.b32.xlu0 %v5700_v15, %s4731_s24  ;;  %v5831_v15 = vmul.u32 2, %v3076_v16  ;;  %s4649_s15 = sshll.u32 %s4739_s16, 4  ;;  %s4650_s15 = int_to_ptr.vmem [resolvable:$false] %s4649_s15 }
 0x7a6   : > { %s4651_s22 = scalar_lea.vmem %s4650_s15, 512 }
 0x7a7   : > { %vm3078_vm0 = vcmp.eq.s32.totalorder %v6101_v8, %v5831_v15  ;;  %vm3079_vm5 = vcmp.eq.s32.totalorder %v3045_v18, %v5831_v15  ;;  %vm3081_vm13 = vcmp.eq.s32.totalorder %v3047_v56, %v5831_v15  ;;  %vm3082_vm8 = vcmp.eq.s32.totalorder %v3048_v19, %v5831_v15 }
 0x7a8   : > { %4481 = vrot.lane.b32.xlu1 %v5698_v54, %s4731_s24  ;;  %v3046_v54 = vadd.s32 16, %v6101_v8  ;;  %vm3805_vm1 = vmpackc.low %vm3079_vm5, %vm3078_vm0  ;;  %vm3083_vm9 = vcmp.eq.s32.totalorder %v3049_v47, %v5831_v15  ;;  %vm3084_vm15 = vcmp.eq.s32.totalorder %v3050_v44, %v5831_v15  ;;  %vm3085_vm0 = vcmp.eq.s32.totalorder %v3051_v50, %v5831_v15 }
 0x7a9   : > { %4486 = vrot.lane.b32.xlu0 %v5714_v12, %s4731_s24  ;;  %3806 = vmatpush1.bf16.msk.msra.mxu1 %vm3805_vm1, %v4738_v20  ;;  %vm3811_vm11 = vmpackc.low %vm3083_vm9, %vm3082_vm8  ;;  %vm3089_vm8 = vcmp.eq.s32.totalorder %v3055_v57, %v5831_v15  ;;  %v3063_v56 = vadd.s32 152, %v6101_v8 }
 0x7aa   : > { %vm3080_vm12 = vcmp.eq.s32.totalorder %v3046_v54, %v5831_v15  ;;  %3807 = vmatprep.subr.bf16.mxu1 %v4737_v14  ;;  %vm3814_vm5 = vmpackc.low %vm3085_vm0, %vm3084_vm15  ;;  %v3062_v54 = vadd.s32 144, %v6101_v8 }
 0x7ab   : > { %vm3808_vm2 = vmpackc.low %vm3081_vm13, %vm3080_vm12  ;;  %vm3086_vm12 = vcmp.eq.s32.totalorder %v3052_v21, %v5831_v15  ;;  %vm3087_vm13 = vcmp.eq.s32.totalorder %v3053_v0, %v5831_v15 }
 0x7ac   : > { %4491 = vrot.lane.b32.xlu1 %v5724_v37, %s4731_s24  ;;  %vm3817_vm1 = vmpackc.low %vm3087_vm13, %vm3086_vm12 }
 0x7ad   : > { %4496 = vrot.lane.b32.xlu0 %v5727_v36, %s4731_s24  ;;  %3809 = vmatpush1.bf16.msk.msra.mxu1 %vm3808_vm2, %v4738_v20  ;;  %vm3088_vm2 = vcmp.eq.s32.totalorder %v3054_v33, %v5831_v15 }
 0x7ae   : > { %3810 = vmatprep.subr.bf16.mxu1 %v4737_v14  ;;  %vm3820_vm9 = vmpackc.low %vm3089_vm8, %vm3088_vm2  ;;  %vm3095_vm2 = vcmp.eq.s32.totalorder %v3061_v3, %v5831_v15 }
 0x7b0   : > { %4501 = vrot.lane.b32.xlu1 %v5736_v24, %s4731_s24  ;;  %v3057_v24 = vadd.s32 104, %v6101_v8 }
 0x7b1   : > { %4506 = vrot.lane.b32.xlu0 %v5739_v7, %s4731_s24  ;;  %3812 = vmatpush1.bf16.msk.msra.mxu1 %vm3811_vm11, %v4738_v20  ;;  %vm3090_vm11 = vcmp.eq.s32.totalorder %v3056_v45, %v5831_v15  ;;  %v3066_v45 = vadd.s32 176, %v6101_v8 }
 0x7b2   : > { %3813 = vmatprep.subr.bf16.mxu1 %v4737_v14  ;;  %vm3091_vm15 = vcmp.eq.s32.totalorder %v3057_v24, %v5831_v15  ;;  %v3067_v24 = vadd.s32 184, %v6101_v8 }
 0x7b3   : > { %vm3823_vm0 = vmpackc.low %vm3091_vm15, %vm3090_vm11  ;;  %vm3097_vm11 = vcmp.eq.s32.totalorder %v3063_v56, %v5831_v15  ;;  %v3073_v56 = vadd.s32 232, %v6101_v8 }
 0x7b4   : > { %4511 = vrot.lane.b32.xlu1 %v4330_v53, %s4731_s24 }
 0x7b5   : > { %4516 = vrot.lane.b32.xlu0 %v4335_v46, %s4731_s24  ;;  %3815 = vmatpush1.bf16.msk.msra.mxu1 %vm3814_vm5, %v4738_v20  ;;  %v3059_v46 = vadd.s32 120, %v6101_v8  ;;  %vm3092_vm5 = vcmp.eq.s32.totalorder %v3058_v2, %v5831_v15  ;;  %v3068_v2 = vadd.s32 192, %v6101_v8 }
 0x7b6   : > { %3816 = vmatprep.subr.bf16.mxu1 %v4737_v14 }
 0x7b7   : > { %vm3093_vm12 = vcmp.eq.s32.totalorder %v3059_v46, %v5831_v15 }
 0x7b8   : > { %4521 = vrot.lane.b32.xlu1 %v4340_v23, %s4731_s24  ;;  %vm3826_vm13 = vmpackc.low %vm3093_vm12, %vm3092_vm5  ;;  %vm3100_vm12 = vcmp.eq.s32.totalorder %v3066_v45, %v5831_v15 }
 0x7b9   : > { %4526 = vrot.lane.b32.xlu0 %v4345_v41, %s4731_s24  ;;  %3818 = vmatpush1.bf16.msk.msra.mxu1 %vm3817_vm1, %v4738_v20  ;;  %vm3094_vm1 = vcmp.eq.s32.totalorder %v3060_v58, %v5831_v15 }
 0x7ba   : > { %3819 = vmatprep.subr.bf16.mxu1 %v4737_v14  ;;  %vm3829_vm8 = vmpackc.low %vm3095_vm2, %vm3094_vm1  ;;  %vm3102_vm2 = vcmp.eq.s32.totalorder %v3068_v2, %v5831_v15 }
 0x7bc   : > { %4531 = vrot.lane.b32.xlu1 %v4350_v4, %s4731_s24  ;;  %s475_s24 = sand.u32 1, %s4707_s26  }
 0x7bd   : > { %3261 = vperm.xlu0 %4054, %v3257_v25   ;;  %3821 = vmatpush1.bf16.msk.msra.mxu1 %vm3820_vm9, %v4738_v20  ;;  %vm3096_vm9 = vcmp.eq.s32.totalorder %v3062_v54, %v5831_v15  ;;  %v3072_v54 = vadd.s32 224, %v6101_v8  ;;  %s3410_s28 = sshll.u32 %s475_s24, 4  ;;  %s5996_s29 = scalar_lea.sflag [#allocation7], %s475_s24 }
 0x7be   : > { %3822 = vmatprep.subr.bf16.mxu1 %v4737_v14  ;;  %vm3832_vm15 = vmpackc.low %vm3097_vm11, %vm3096_vm9  ;;  %s477_s7 = scalar_lea.vmem [#allocation11], %s3410_s28 }
 0x7bf   : > { %s3307_s20 = sshll.u32 %s477_s7, 4  ;;  %s5993_s20 = int_to_ptr.vmem [resolvable:$true] %s3307_s20 }
 0x7c0   : > { %3266 = vperm.xlu1 %4053, %v3258_v29   ;;  %s4645_s17 = scalar_lea.vmem %s5993_s20, 256  ;;  %p4652_p4 = scmp.lt.s32.totalorder %s5993_s20, %s4650_s15 }
 0x7c1   : > { %3275 = vperm.xlu0 %4054, %v3271_v30   ;;  %3824 = vmatpush1.bf16.msk.msra.mxu1 %vm3823_vm0, %v4738_v20  ;;  %p4646_p12 = scmp.ne.s32.totalorder %s5993_s20, %s4645_s17  ;;  %p4653_p7 = scmp.lt.s32.totalorder %s4651_s22, %s4645_s17 }
 0x7c2   : > { %3825 = vmatprep.subr.bf16.mxu1 %v4737_v14 }
 0x7c3   : > { %p4647_p2 = pnand %p4646_p12, %p6106_p1  ;;  %p4654_p8 = por %p4653_p7, %p4652_p4 }
 0x7c4   : > { %3280 = vperm.xlu1 %4053, %v3272_v32  }
 0x7c5   : > { %3827 = vmatpush1.bf16.msk.msra.mxu1 %vm3826_vm13, %v4738_v20  ;;  %vm3101_vm13 = vcmp.eq.s32.totalorder %v3067_v24, %v5831_v15  ;;  %p4648_p3 = pneg %p4647_p2 }
 0x7c6   : > { %3828 = vmatprep.subr.bf16.mxu1 %v4737_v14  ;;  %vm3838_vm1 = vmpackc.low %vm3101_vm13, %vm3100_vm12 }
 0x7c7   : > { %p4655_p11 = pnand %p4654_p8, %p4648_p3 }
 0x7c9   : > { %3830 = vmatpush1.bf16.msk.msra.mxu1 %vm3829_vm8, %v4738_v20 }
 0x7ca   : > { %3831 = vmatprep.subr.bf16.mxu1 %v4737_v14 }
 0x7cd   : > { %3833 = vmatpush1.bf16.msk.msra.mxu1 %vm3832_vm15, %v4738_v20 }
 0x7ce   : > { %v4302_v55 = vpop.permute.xlu1 %4301  ;;  %3834 = vmatprep.subr.bf16.mxu1 %v4737_v14 }
 0x7cf   : > { %v4297_v12 = vpop.permute.xlu0 %4296  ;;  %v4304_v10 = vunpack.i.h.bf16 %v4302_v55  ;;  %v4303_v59 = vunpack.i.l.bf16 %v4302_v55 }
 0x7d0   : > { %v4299_v11 = vunpack.i.h.bf16 %v4297_v12  ;;  %v4298_v17 = vunpack.i.l.bf16 %v4297_v12 }
 0x7d1   : > { %v2588_v60 = vsel %vm515_vm3, %v4303_v59, %v4304_v10 }
 0x7d2   : > { %v2587_v38 = vsel %vm515_vm3, %v4298_v17, %v4299_v11  ;;  %v3708_v43 = vpack.c.bf16 %v4304_v10, %v4299_v11  ;;  %v3064_v11 = vadd.s32 160, %v6101_v8 }
 0x7d3   : > { %v3710_v51 = vpack.c.bf16 %v2588_v60, %v2587_v38  ;;  %v4307_v37 = vpop.permute.xlu0 %4306 }
 0x7d4   : > { %3709 = vmatprep.subr.bf16.mxu0 %v3708_v43  ;;  %v4309_v36 = vunpack.i.h.bf16 %v4307_v37  ;;  %v4308_v34 = vunpack.i.l.bf16 %v4307_v37  ;;  %v3065_v43 = vadd.s32 168, %v6101_v8  ;;  %vm3098_vm0 = vcmp.eq.s32.totalorder %v3064_v11, %v5831_v15 }
 0x7d5   : > { %3711 = vmatpush1.bf16.msra.mxu0 %v3710_v51 }
 0x7d6   : > { %v4312_v40 = vpop.permute.xlu1 %4311  ;;  %v2589_v6 = vsel %vm515_vm3, %v4308_v34, %v4309_v36  ;;  %vm3099_vm5 = vcmp.eq.s32.totalorder %v3065_v43, %v5831_v15  ;;  %v2875_v43 = vld [vmem:[#allocation10] sm:$0xff] }
 0x7d7   : > { %v4317_v1 = vpop.permute.xlu0 %4316  ;;  %v4314_v48 = vunpack.i.h.bf16 %v4312_v40  ;;  %v4313_v61 = vunpack.i.l.bf16 %v4312_v40 }
 0x7d8   : > { %v4319_v49 = vunpack.i.h.bf16 %v4317_v1  ;;  %v4318_v7 = vunpack.i.l.bf16 %v4317_v1 }
 0x7d9   : > { %v3712_v26 = vpack.c.bf16 %v4314_v48, %v4309_v36  ;;  %v2590_v62 = vsel %vm515_vm3, %v4313_v61, %v4314_v48 }
 0x7da   : > { %v3714_v28 = vpack.c.bf16 %v2590_v62, %v2589_v6  ;;  %v4322_v31 = vpop.permute.xlu1 %4321  ;;  %v2591_v52 = vsel %vm515_vm3, %v4318_v7, %v4319_v49 }
 0x7db   : > { %v4327_v39 = vpop.permute.xlu0 %4326  ;;  %v4324_v42 = vunpack.i.h.bf16 %v4322_v31  ;;  %v4323_v53 = vunpack.i.l.bf16 %v4322_v31  ;;  %3713 = vmatprep.subr.bf16.mxu0 %v3712_v26 }
 0x7dc   : > { %3715 = vmatpush1.bf16.msra.mxu0 %v3714_v28  ;;  %v4329_v27 = vunpack.i.h.bf16 %v4327_v39  ;;  %v4328_v22 = vunpack.i.l.bf16 %v4327_v39  ;;  %v3069_v39 = vadd.s32 200, %v6101_v8 }
 0x7dd   : > { %v3716_v63 = vpack.c.bf16 %v4324_v42, %v4319_v49  ;;  %v2592_v23 = vsel %vm515_vm3, %v4323_v53, %v4324_v42 }
 0x7de   : > { %v3718_v41 = vpack.c.bf16 %v2592_v23, %v2591_v52  ;;  %v4332_v35 = vpop.permute.xlu1 %4331  ;;  %v2593_v30 = vsel %vm515_vm3, %v4328_v22, %v4329_v27  ;;  %vm3103_vm8 = vcmp.eq.s32.totalorder %v3069_v39, %v5831_v15 }
 0x7df   : > { %v4337_v4 = vpop.permute.xlu0 %4336  ;;  %v4334_v9 = vunpack.i.h.bf16 %v4332_v35  ;;  %v4333_v5 = vunpack.i.l.bf16 %v4332_v35  ;;  %3717 = vmatprep.subr.bf16.mxu0 %v3716_v63  ;;  %vm3841_vm9 = vmpackc.low %vm3103_vm8, %vm3102_vm2 }
 0x7e0   : > { %v4339_v25 = vunpack.i.h.bf16 %v4337_v4  ;;  %v4338_v29 = vunpack.i.l.bf16 %v4337_v4  ;;  %3719 = vmatpush1.bf16.msra.mxu0 %v3718_v41 }
 0x7e1   : > { %v3720_v32 = vpack.c.bf16 %v4334_v9, %v4329_v27  ;;  %v2594_v18 = vsel %vm515_vm3, %v4333_v5, %v4334_v9  ;;  %v3070_v9 = vadd.s32 208, %v6101_v8  ;;  %v3071_v5 = vadd.s32 216, %v6101_v8 }
 0x7e2   : > { %v3722_v13 = vpack.c.bf16 %v2594_v18, %v2593_v30  ;;  %v4342_v16 = vpop.permute.xlu1 %4341  ;;  %v2595_v50 = vsel %vm515_vm3, %v4338_v29, %v4339_v25 }
 0x7e3   : > { %v4347_v19 = vpop.permute.xlu0 %4346  ;;  %v4344_v47 = vunpack.i.h.bf16 %v4342_v16  ;;  %v4343_v44 = vunpack.i.l.bf16 %v4342_v16  ;;  %3721 = vmatprep.subr.bf16.mxu0 %v3720_v32  ;;  %vm3104_vm11 = vcmp.eq.s32.totalorder %v3070_v9, %v5831_v15  ;;  %vm3105_vm15 = vcmp.eq.s32.totalorder %v3071_v5, %v5831_v15 }
 0x7e4   : > { %3723 = vmatpush1.bf16.msra.mxu0 %v3722_v13  ;;  %v4349_v55 = vunpack.i.h.bf16 %v4347_v19  ;;  %v4348_v21 = vunpack.i.l.bf16 %v4347_v19 }
 0x7e5   : > { %v3724_v0 = vpack.c.bf16 %v4344_v47, %v4339_v25  ;;  %v2596_v12 = vsel %vm515_vm3, %v4343_v44, %v4344_v47 }
 0x7e6   : > { %v3726_v10 = vpack.c.bf16 %v2596_v12, %v2595_v50  ;;  %v4352_v59 = vpop.permute.xlu1 %4351  ;;  %v2597_v37 = vsel %vm515_vm3, %v4348_v21, %v4349_v55 }
 0x7e7   : > { %v4357_v17 = vpop.permute.xlu0 %4356  ;;  %v4354_v60 = vunpack.i.h.bf16 %v4352_v59  ;;  %v4353_v38 = vunpack.i.l.bf16 %v4352_v59  ;;  %3725 = vmatprep.subr.bf16.mxu0 %v3724_v0 }
 0x7e8   : > { %v4359_v33 = vunpack.i.h.bf16 %v4357_v17  ;;  %v4358_v51 = vunpack.i.l.bf16 %v4357_v17  ;;  %3727 = vmatpush1.bf16.msra.mxu0 %v3726_v10 }
 0x7e9   : > { %v3728_v57 = vpack.c.bf16 %v4354_v60, %v4349_v55  ;;  %v2598_v36 = vsel %vm515_vm3, %v4353_v38, %v4354_v60  ;;  %vm3835_vm3 = vmpackc.low %vm3099_vm5, %vm3098_vm0  ;;  %vm3106_vm5 = vcmp.eq.s32.totalorder %v3072_v54, %v5831_v15 }
 0x7ea   : > { %v3730_v34 = vpack.c.bf16 %v2598_v36, %v2597_v37  ;;  %v4362_v40 = vpop.permute.xlu1 %4361  ;;  %v2671_v49 = vsel %vm551_vm6, %v4358_v51, %v4359_v33  ;;  %3836 = vmatpush1.bf16.msk.msra.mxu1 %vm3835_vm3, %v4738_v20  ;;  %vm3844_vm0 = vmpackc.low %vm3105_vm15, %vm3104_vm11  ;;  %vm3107_vm3 = vcmp.eq.s32.totalorder %v3073_v56, %v5831_v15  ;;  %v2880_v36 = vld [vmem:[#allocation10 + $0x28] sm:$0xff] }
 0x7eb   : > { %v4367_v1 = vpop.permute.xlu0 %4366  ;;  %v4364_v48 = vunpack.i.h.bf16 %v4362_v40  ;;  %v4363_v61 = vunpack.i.l.bf16 %v4362_v40  ;;  %3729 = vmatprep.subr.bf16.mxu0 %v3728_v57  ;;  %3837 = vmatprep.subr.bf16.mxu1 %v4737_v14  ;;  %vm3847_vm12 = vmpackc.low %vm3107_vm3, %vm3106_vm5 }
 0x7ec   : > { %3731 = vmatpush1.bf16.msra.mxu0 %v3730_v34  ;;  %v4369_v7 = vunpack.i.h.bf16 %v4367_v1  ;;  %v4368_v6 = vunpack.i.l.bf16 %v4367_v1 }
 0x7ed   : > { %v3732_v26 = vpack.c.bf16 %v4364_v48, %v4359_v33  ;;  %v2672_v62 = vsel %vm551_vm6, %v4363_v61, %v4364_v48 }
 0x7ee   : > { %v3734_v28 = vpack.c.bf16 %v2672_v62, %v2671_v49  ;;  %v4372_v31 = vpop.permute.xlu1 %4371  ;;  %v2673_v22 = vsel %vm551_vm6, %v4368_v6, %v4369_v7  ;;  %3839 = vmatpush1.bf16.msk.msra.mxu1 %vm3838_vm1, %v4738_v20  ;;  %v2879_v49 = vld [vmem:[#allocation10 + $0x20] sm:$0xff]  ;;  %v2878_v62 = vld [vmem:[#allocation10 + $0x18] sm:$0xff] }
 0x7ef   : > { %v4377_v42 = vpop.permute.xlu0 %4376  ;;  %v4374_v53 = vunpack.i.h.bf16 %v4372_v31  ;;  %v4373_v46 = vunpack.i.l.bf16 %v4372_v31  ;;  %3733 = vmatprep.subr.bf16.mxu0 %v3732_v26  ;;  %3840 = vmatprep.subr.bf16.mxu1 %v4737_v14  ;;  %v6103_v31 = vmov 0.0  }
 0x7f0   : > { %v4379_v52 = vunpack.i.h.bf16 %v4377_v42  ;;  %v4378_v27 = vunpack.i.l.bf16 %v4377_v42  ;;  %3735 = vmatpush1.bf16.msra.mxu0 %v3734_v28 }
 0x7f1   : > { %v3736_v63 = vpack.c.bf16 %v4374_v53, %v4369_v7  ;;  %v2674_v23 = vsel %vm551_vm6, %v4373_v46, %v4374_v53 }
 0x7f2   : > { %v3738_v41 = vpack.c.bf16 %v2674_v23, %v2673_v22  ;;  %v4382_v35 = vpop.permute.xlu1 %4381  ;;  %v2675_v25 = vsel %vm551_vm6, %v4378_v27, %v4379_v52  ;;  %3842 = vmatpush1.bf16.msk.msra.mxu1 %vm3841_vm9, %v4738_v20 }
 0x7f3   : > { %v4387_v58 = vpop.permute.xlu0 %4386  ;;  %v4384_v3 = vunpack.i.h.bf16 %v4382_v35  ;;  %v4383_v4 = vunpack.i.l.bf16 %v4382_v35  ;;  %3737 = vmatprep.subr.bf16.mxu0 %v3736_v63  ;;  %3843 = vmatprep.subr.bf16.mxu1 %v4737_v14 }
 0x7f4   : > { %3739 = vmatpush1.bf16.msra.mxu0 %v3738_v41  ;;  %v4389_v29 = vunpack.i.h.bf16 %v4387_v58  ;;  %v4388_v30 = vunpack.i.l.bf16 %v4387_v58 }
 0x7f5   : > { %v3740_v32 = vpack.c.bf16 %v4384_v3, %v4379_v52  ;;  %v2676_v18 = vsel %vm551_vm6, %v4383_v4, %v4384_v3 }
 0x7f6   : > { %v3742_v13 = vpack.c.bf16 %v2676_v18, %v2675_v25  ;;  %v4392_v16 = vpop.permute.xlu1 %4391  ;;  %v2677_v21 = vsel %vm551_vm6, %v4388_v30, %v4389_v29  ;;  %3845 = vmatpush1.bf16.msk.msra.mxu1 %vm3844_vm0, %v4738_v20 }
 0x7f7   : > { %v4397_v19 = vpop.permute.xlu0 %4396  ;;  %v4394_v47 = vunpack.i.h.bf16 %v4392_v16  ;;  %v4393_v44 = vunpack.i.l.bf16 %v4392_v16  ;;  %3741 = vmatprep.subr.bf16.mxu0 %v3740_v32  ;;  %3846 = vmatprep.subr.bf16.mxu1 %v4737_v14 }
 0x7f8   : > { %v4399_v50 = vunpack.i.h.bf16 %v4397_v19  ;;  %v4398_v55 = vunpack.i.l.bf16 %v4397_v19  ;;  %3743 = vmatpush1.bf16.msra.mxu0 %v3742_v13 }
 0x7f9   : > { %v3744_v0 = vpack.c.bf16 %v4394_v47, %v4389_v29  ;;  %v2678_v12 = vsel %vm551_vm6, %v4393_v44, %v4394_v47 }
 0x7fa   : > { %v3746_v10 = vpack.c.bf16 %v2678_v12, %v2677_v21  ;;  %v4402_v59 = vpop.permute.xlu1 %4401  ;;  %v2679_v38 = vsel %vm551_vm6, %v4398_v55, %v4399_v50  ;;  %3848 = vmatpush1.bf16.msk.msra.mxu1 %vm3847_vm12, %v4738_v20 }
 0x7fb   : > { %v4407_v11 = vpop.permute.xlu0 %4406  ;;  %v4404_v17 = vunpack.i.h.bf16 %v4402_v59  ;;  %v4403_v60 = vunpack.i.l.bf16 %v4402_v59  ;;  %3745 = vmatprep.subr.bf16.mxu0 %v3744_v0  ;;  %3242 = vmatprep.subr.mxu1 %v6103_v31 }
 0x7fc   : > { %3747 = vmatpush1.bf16.msra.mxu0 %v3746_v10  ;;  %v4409_v33 = vunpack.i.h.bf16 %v4407_v11  ;;  %v4408_v51 = vunpack.i.l.bf16 %v4407_v11 }
 0x7fd   : > { %v3748_v37 = vpack.c.bf16 %v4404_v17, %v4399_v50  ;;  %v2680_v57 = vsel %vm551_vm6, %v4403_v60, %v4404_v17 }
 0x7fe   : > { %v3750_v34 = vpack.c.bf16 %v2680_v57, %v2679_v38  ;;  %v4412_v40 = vpop.permute.xlu1 %4411  ;;  %v2681_v7 = vsel %vm551_vm6, %v4408_v51, %v4409_v33 }
 0x7ff   : > { %v4417_v45 = vpop.permute.xlu0 %4416  ;;  %v4414_v1 = vunpack.i.h.bf16 %v4412_v40  ;;  %v4413_v48 = vunpack.i.l.bf16 %v4412_v40  ;;  %3749 = vmatprep.subr.bf16.mxu0 %v3748_v37  ;;  %2954 = vmatmul.mubr.f32.vlgmr.msra.gmra.mrb[36].mxu0 %v2875_v43 }
 0x800   : > { %v4419_v61 = vunpack.i.h.bf16 %v4417_v45  ;;  %v4418_v24 = vunpack.i.l.bf16 %v4417_v45  ;;  %3751 = vmatpush1.bf16.msra.mxu0 %v3750_v34  ;;  %2959 = vmatprep.mubr.f32.mxu0 %v2880_v36 }
 0x801   : > { %v3752_v6 = vpack.c.bf16 %v4414_v1, %v4409_v33  ;;  %v2682_v26 = vsel %vm551_vm6, %v4413_v48, %v4414_v1 }
 0x802   : > { %v3754_v14 = vpack.c.bf16 %v2682_v26, %v2681_v7  ;;  %v4422_v28 = vpop.permute.xlu1 %4421  ;;  %v2755_v53 = vsel %vm566_vm4, %v4418_v24, %v4419_v61 }
 0x803   : > { %v4427_v2 = vpop.permute.xlu0 %4426  ;;  %v4424_v39 = vunpack.i.h.bf16 %v4422_v28  ;;  %v4423_v42 = vunpack.i.l.bf16 %v4422_v28  ;;  %3753 = vmatprep.subr.bf16.mxu0 %v3752_v6  ;;  %2960 = vmatmul.mubr.f32.gmra.mrb[38].mxu0 %v2879_v49 }
 0x804   : > { %3755 = vmatpush1.bf16.msra.mxu0 %v3754_v14  ;;  %3443 = vmatprep.mubr.msk.f32.mxu0 %vm1993_vm14, %v2878_v62  ;;  %v4429_v46 = vunpack.i.h.bf16 %v4427_v2  ;;  %v4428_v52 = vunpack.i.l.bf16 %v4427_v2 }
 0x805   : > { %v3756_v27 = vpack.c.bf16 %v4424_v39, %v4419_v61  ;;  %v2756_v22 = vsel %vm566_vm4, %v4423_v42, %v4424_v39 }
 0x806   : > { %v3758_v20 = vpack.c.bf16 %v2756_v22, %v2755_v53  ;;  %v4432_v63 = vpop.permute.xlu1 %4431  ;;  %v2757_v4 = vsel %vm566_vm4, %v4428_v52, %v4429_v46 }
 0x807   : > { %v4437_v23 = vpop.permute.xlu0 %4436  ;;  %v4434_v41 = vunpack.i.h.bf16 %v4432_v63  ;;  %v4433_v35 = vunpack.i.l.bf16 %v4432_v63  ;;  %3757 = vmatprep.subr.bf16.mxu0 %v3756_v27 }
 0x808   : > { %v4439_v58 = vunpack.i.h.bf16 %v4437_v23  ;;  %v4438_v3 = vunpack.i.l.bf16 %v4437_v23  ;;  %3759 = vmatpush1.bf16.msra.mxu0 %v3758_v20 }
 0x809   : > { %v3760_v9 = vpack.c.bf16 %v4434_v41, %v4429_v46  ;;  %v2758_v5 = vsel %vm566_vm4, %v4433_v35, %v4434_v41 }
 0x80a   : > { %v3762_v25 = vpack.c.bf16 %v2758_v5, %v2757_v4  ;;  %v4442_v29 = vpop.permute.xlu1 %4441  ;;  %v2759_v13 = vsel %vm566_vm4, %v4438_v3, %v4439_v58 }
 0x80b   : > { %v4447_v30 = vpop.permute.xlu0 %4446  ;;  %v4444_v32 = vunpack.i.h.bf16 %v4442_v29  ;;  %v4443_v18 = vunpack.i.l.bf16 %v4442_v29  ;;  %3761 = vmatprep.subr.bf16.mxu0 %v3760_v9 }
 0x80c   : > { %3763 = vmatpush1.bf16.msra.mxu0 %v3762_v25  ;;  %v4449_v16 = vunpack.i.h.bf16 %v4447_v30  ;;  %v4448_v54 = vunpack.i.l.bf16 %v4447_v30 }
 0x80d   : > { %v3764_v56 = vpack.c.bf16 %v4444_v32, %v4439_v58  ;;  %v2760_v19 = vsel %vm566_vm4, %v4443_v18, %v4444_v32 }
 0x80e   : > { %v3766_v47 = vpack.c.bf16 %v2760_v19, %v2759_v13  ;;  %v4452_v44 = vpop.permute.xlu1 %4451  ;;  %v2761_v10 = vsel %vm566_vm4, %v4448_v54, %v4449_v16 }
 0x80f   : > { %v4457_v50 = vpop.permute.xlu0 %4456  ;;  %v4454_v55 = vunpack.i.h.bf16 %v4452_v44  ;;  %v4453_v21 = vunpack.i.l.bf16 %v4452_v44  ;;  %3765 = vmatprep.subr.bf16.mxu0 %v3764_v56 }
 0x810   : > { %v4459_v0 = vunpack.i.h.bf16 %v4457_v50  ;;  %v4458_v12 = vunpack.i.l.bf16 %v4457_v50  ;;  %3767 = vmatpush1.bf16.msra.mxu0 %v3766_v47 }
 0x811   : > { %v3768_v59 = vpack.c.bf16 %v4454_v55, %v4449_v16  ;;  %v2762_v11 = vsel %vm566_vm4, %v4453_v21, %v4454_v55 }
 0x812   : > { %v3770_v17 = vpack.c.bf16 %v2762_v11, %v2761_v10  ;;  %v4462_v60 = vpop.permute.xlu1 %4461  ;;  %v2763_v51 = vsel %vm566_vm4, %v4458_v12, %v4459_v0 }
 0x813   : > { %v4467_v38 = vpop.permute.xlu0 %4466  ;;  %v4464_v43 = vunpack.i.h.bf16 %v4462_v60  ;;  %v4463_v33 = vunpack.i.l.bf16 %v4462_v60  ;;  %3769 = vmatprep.subr.bf16.mxu0 %v3768_v59 }
 0x814   : > { %3771 = vmatpush1.bf16.msra.mxu0 %v3770_v17  ;;  %v4469_v37 = vunpack.i.h.bf16 %v4467_v38  ;;  %v4468_v57 = vunpack.i.l.bf16 %v4467_v38 }
 0x815   : > { %v3772_v36 = vpack.c.bf16 %v4464_v43, %v4459_v0  ;;  %v2764_v34 = vsel %vm566_vm4, %v4463_v33, %v4464_v43 }
 0x816   : > { %v3774_v40 = vpack.c.bf16 %v2764_v34, %v2763_v51  ;;  %v4472_v45 = vpop.permute.xlu1 %4471  ;;  %v2765_v7 = vsel %vm566_vm4, %v4468_v57, %v4469_v37 }
 0x817   : > { %v4477_v1 = vpop.permute.xlu0 %4476  ;;  %v4474_v48 = vunpack.i.h.bf16 %v4472_v45  ;;  %v4473_v61 = vunpack.i.l.bf16 %v4472_v45  ;;  %3773 = vmatprep.subr.bf16.mxu0 %v3772_v36 }
 0x818   : > { %v4479_v24 = vunpack.i.h.bf16 %v4477_v1  ;;  %v4478_v49 = vunpack.i.l.bf16 %v4477_v1  ;;  %3775 = vmatpush1.bf16.msra.mxu0 %v3774_v40 }
 0x819   : > { %v3776_v6 = vpack.c.bf16 %v4474_v48, %v4469_v37  ;;  %v2766_v26 = vsel %vm566_vm4, %v4473_v61, %v4474_v48  ;;  %vm3178_vm4 = vcmask 1040384  }
 0x81a   : > { %v3778_v62 = vpack.c.bf16 %v2766_v26, %v2765_v7  ;;  %v4482_v14 = vpop.permute.xlu1 %4481  ;;  %v2839_v42 = vsel %vm581_vm7, %v4478_v49, %v4479_v24  ;;  %v2877_v7 = vld [vmem:[#allocation10 + $0x10] sm:$0xff] }
 0x81b   : > { %v4487_v28 = vpop.permute.xlu0 %4486  ;;  %v4484_v2 = vunpack.i.h.bf16 %v4482_v14  ;;  %v4483_v39 = vunpack.i.l.bf16 %v4482_v14  ;;  %3777 = vmatprep.subr.bf16.mxu0 %v3776_v6  ;;  %v2882_v6 = vld [vmem:[#allocation10 + $0x38] sm:$0xff]  ;;  %v2881_v26 = vld [vmem:[#allocation10 + $0x30] sm:$0xff] }
 0x81c   : > { %3779 = vmatpush1.bf16.msra.mxu0 %v3778_v62  ;;  %v4489_v53 = vunpack.i.h.bf16 %v4487_v28  ;;  %v4488_v46 = vunpack.i.l.bf16 %v4487_v28  ;;  %v3074_v62 = vadd.s32 240, %v6101_v8 }
 0x81d   : > { %v3780_v52 = vpack.c.bf16 %v4484_v2, %v4479_v24  ;;  %v2840_v27 = vsel %vm581_vm7, %v4483_v39, %v4484_v2 }
 0x81e   : > { %v3782_v22 = vpack.c.bf16 %v2840_v27, %v2839_v42  ;;  %v4492_v20 = vpop.permute.xlu1 %4491  ;;  %v2841_v3 = vsel %vm581_vm7, %v4488_v46, %v4489_v53  ;;  %vm3108_vm6 = vcmp.eq.s32.totalorder %v3074_v62, %v5831_v15 }
 0x81f   : > { %v4497_v63 = vpop.permute.xlu0 %4496  ;;  %v4494_v23 = vunpack.i.h.bf16 %v4492_v20  ;;  %v4493_v41 = vunpack.i.l.bf16 %v4492_v20  ;;  %3781 = vmatprep.subr.bf16.mxu0 %v3780_v52  ;;  %v3475_v14 = vsel %vm3108_vm6, 1.0, %v6103_v31 }
 0x820   : > { %v4499_v35 = vunpack.i.h.bf16 %v4497_v63  ;;  %v4498_v58 = vunpack.i.l.bf16 %v4497_v63  ;;  %3783 = vmatpush1.bf16.msra.mxu0 %v3782_v22  ;;  %3506 = vmatpush1.msk.msra.mxu1 %vm3178_vm4, %v3475_v14 }
 0x821   : > { %v3784_v4 = vpack.c.bf16 %v4494_v23, %v4489_v53  ;;  %v2842_v9 = vsel %vm581_vm7, %v4493_v41, %v4494_v23 }
 0x822   : > { %v3786_v5 = vpack.c.bf16 %v2842_v9, %v2841_v3  ;;  %v4502_v25 = vpop.permute.xlu1 %4501  ;;  %v2843_v18 = vsel %vm581_vm7, %v4498_v58, %v4499_v35 }
 0x823   : > { %v4507_v29 = vpop.permute.xlu0 %4506  ;;  %v4504_v30 = vunpack.i.h.bf16 %v4502_v25  ;;  %v4503_v32 = vunpack.i.l.bf16 %v4502_v25  ;;  %3785 = vmatprep.subr.bf16.mxu0 %v3784_v4 }
 0x824   : > { %3787 = vmatpush1.bf16.msra.mxu0 %v3786_v5  ;;  %v4509_v13 = vunpack.i.h.bf16 %v4507_v29  ;;  %v4508_v16 = vunpack.i.l.bf16 %v4507_v29 }
 0x825   : > { %v3788_v54 = vpack.c.bf16 %v4504_v30, %v4499_v35  ;;  %v2844_v56 = vsel %vm581_vm7, %v4503_v32, %v4504_v30 }
 0x826   : > { %v3790_v19 = vpack.c.bf16 %v2844_v56, %v2843_v18  ;;  %v4512_v47 = vpop.permute.xlu1 %4511  ;;  %v2845_v12 = vsel %vm581_vm7, %v4508_v16, %v4509_v13 }
 0x827   : > { %v4517_v44 = vpop.permute.xlu0 %4516  ;;  %v4514_v50 = vunpack.i.h.bf16 %v4512_v47  ;;  %v4513_v55 = vunpack.i.l.bf16 %v4512_v47  ;;  %3789 = vmatprep.subr.bf16.mxu0 %v3788_v54 }
 0x828   : > { %v4519_v21 = vunpack.i.h.bf16 %v4517_v44  ;;  %v4518_v0 = vunpack.i.l.bf16 %v4517_v44  ;;  %3791 = vmatpush1.bf16.msra.mxu0 %v3790_v19 }
 0x829   : > { %v3792_v10 = vpack.c.bf16 %v4514_v50, %v4509_v13  ;;  %v2846_v59 = vsel %vm581_vm7, %v4513_v55, %v4514_v50 }
 0x82a   : > { %v3794_v11 = vpack.c.bf16 %v2846_v59, %v2845_v12  ;;  %v4522_v17 = vpop.permute.xlu1 %4521  ;;  %v2847_v33 = vsel %vm581_vm7, %v4518_v0, %v4519_v21 }
 0x82b   : > { %v4527_v60 = vpop.permute.xlu0 %4526  ;;  %v4524_v38 = vunpack.i.h.bf16 %v4522_v17  ;;  %v4523_v43 = vunpack.i.l.bf16 %v4522_v17  ;;  %3793 = vmatprep.subr.bf16.mxu0 %v3792_v10 }
 0x82c   : > { %3795 = vmatpush1.bf16.msra.mxu0 %v3794_v11  ;;  %v4529_v51 = vunpack.i.h.bf16 %v4527_v60  ;;  %v4528_v37 = vunpack.i.l.bf16 %v4527_v60 }
 0x82d   : > { %v3796_v57 = vpack.c.bf16 %v4524_v38, %v4519_v21  ;;  %v2848_v36 = vsel %vm581_vm7, %v4523_v43, %v4524_v38 }
 0x82e   : > { %v3798_v34 = vpack.c.bf16 %v2848_v36, %v2847_v33  ;;  %v4532_v40 = vpop.permute.xlu1 %4531  ;;  %v2849_v48 = vsel %vm581_vm7, %v4528_v37, %v4529_v51 }
 0x82f   : > { %v4534_v45 = vunpack.i.h.bf16 %v4532_v40  ;;  %v4533_v1 = vunpack.i.l.bf16 %v4532_v40  ;;  %3797 = vmatprep.subr.bf16.mxu0 %v3796_v57 }
 0x830   : > { %3799 = vmatpush1.bf16.msra.mxu0 %v3798_v34 }
 0x831   : > { %v3800_v61 = vpack.c.bf16 %v4534_v45, %v4529_v51  ;;  %v2850_v24 = vsel %vm581_vm7, %v4533_v1, %v4534_v45  ;;  %vm3171_vm7 = vcmask 924672  }
 0x832   : > { %v3802_v49 = vpack.c.bf16 %v2850_v24, %v2849_v48 }
 0x833   : > { %3801 = vmatprep.subr.bf16.mxu0 %v3800_v61 }
 0x834   : > { %3803 = vmatpush1.bf16.msra.mxu0 %v3802_v49 }
 0x837   : > { %3031 = vmatmul.mubr.f32.vlgmr.msra.gmra.mrb[36].mxu0 %v2877_v7 }
 0x838   : > { %3444 = vmatprep.mubr.msk.f32.mxu0 %vm1993_vm14, %v2882_v6 }
 0x83b   : > { %3037 = vmatmul.mubr.f32.gmra.mrb[38].mxu0 %v2881_v26 }
 0x83c   : > { %v3262_v53 = vpop.permute.xlu0 %3261 }
 0x83f   : > { %v3267_v46 = vpop.permute.xlu1 %3266 }
 0x840   : > { %v3276_v15 = vpop.permute.xlu0 %3275 }
 0x843   : > { %v3281_v41 = vpop.permute.xlu1 %3280 }
 0x90a   : > { %v3032_v28 = vpop.f32.mrb[36].mxu0 }
 0x90b   : > { %v3034_v2 = vpop.f32.mrb[37].mxu0 }
 0x90c   : > { %3507 = vmatprep.mubr.msk.f32.mxu1 %vm3171_vm7, %v3034_v2 }
 0x90d   : > { %3247 = vmatmul.mubr.f32.vlgmr.msra.gmra.mrb[24].mxu1 %v3032_v28 }
 0x90e   : > { %v3038_v39 = vpop.f32.mrb[38].mxu0 }
 0x90f   : > { %v3040_v42 = vpop.f32.mrb[39].mxu0 }
 0x910   : > { %3508 = vmatprep.mubr.msk.f32.mxu1 %vm3171_vm7, %v3040_v42 }
 0x911   : > { %3252 = vmatmul.mubr.f32.gmra.mrb[26].mxu1 %v3038_v39 }
 0x9e0   : > { %v3248_v8 = vpop.f32.mrb[24].mxu1 }
 0x9e1   : > { %v3269_v52 = vmul.f32 %v3262_v53, %v3248_v8  ;;  %v3250_v27 = vpop.f32.mrb[25].mxu1 }
 0x9e3   : > { %v3283_v31 = vadd.f32 %v3276_v15, %v3269_v52 }
 0x9e4   : > { %v3253_v22 = vpop.f32.mrb[26].mxu1 }
 0x9e5   : > { %vm3285_vm14 = vcmp.ge.f32.partialorder %v3283_v31, 0.0  ;;  %v3287_v20 = vmul.f32 0.01, %v3283_v31  ;;  %v3270_v63 = vmul.f32 %v3267_v46, %v3253_v22  ;;  %v3255_v23 = vpop.f32.mrb[27].mxu1 }
 0x9e7   : > { %v3289_v35 = vsel %vm3285_vm14, %v3283_v31, %v3287_v20  ;;  %v3284_v58 = vadd.f32 %v3281_v41, %v3270_v63 }
 0x9e8   : > { %3291 = vst.msk [vmem:[%s477_s7] sm:$0xff] %vm626_vm10, %v3289_v35 }
 0x9e9   : > { %vm3286_vm13 = vcmp.ge.f32.partialorder %v3284_v58, 0.0  ;;  %v3288_v3 = vmul.f32 0.01, %v3284_v58 }
 0x9eb   : > { %v3290_v4 = vsel %vm3286_vm13, %v3284_v58, %v3288_v3 }
 0x9ec   : > { %3292 = vst.msk [vmem:[%s477_s7 + $0x8] sm:$0xff] %vm626_vm10, %v3290_v4 }
 0x9ed   : > { %4658 = shalt.err (!%p4655_p11)
}
 0x9ee   : > { %s4659_s18 = scalar_lea.hbm %s5991_s19, 256  ;;  %s4663_s24 = scalar_lea.hbm %s6105_s21, 512 }
 0x9ef   : > { %p4660_p13 = scmp.ne.s32.totalorder %s5991_s19, %s4659_s18  ;;  %p4664_p6 = scmp.lt.u32.totalorder %s5991_s19, %s6105_s21 }
 0x9f0   : > { %p4665_p9 = scmp.lt.u32.totalorder %s4663_s24, %s4659_s18  ;;  %p4667_p12 = scmp.lt.u32.totalorder %s4659_s18, %s5991_s19 }
 0x9f1   : > { %p4661_p5 = pnand %p4660_p13, %p6106_p1 }
 0x9f2   : > { %p4666_p10 = por %p4665_p9, %p4664_p6 }
 0x9f3   : > { %p4662_p0 = pneg %p4661_p5 }
 0x9f4   : > { %p4668_p2 = por %p4667_p12, %p4666_p10 }
 0x9f6   : > { %p4669_p3 = pnand %p4668_p2, %p4662_p0 }
 0x9f8   : > { %4672 = shalt.err (!%p4669_p3)
}
 0x9f9   : > { %s4740_s7 = smov 128   ;;  %s4741_s14 = smov 8  }
 0x9fa   : > { %3889 = dma.vmem_to_hbm [thread:$0]  (%p6106_p1), %s5993_s20, 256, %s5991_s19, %s5996_s29, %s4740_s7, %s4740_s7, %s4741_s14  }
 0x9fb PF: > { %s6107_s23 = sld [smem:[#allocation17_spill]]  ;;  %s6108_s17 = sld [smem:[#allocation15_spill]] }
 0x9fc   : > { %s6109_s16 = sld [smem:[#allocation21_spill]] }
 0xa01   : > { %p3911_p4 = scmp.ge.s32.totalorder %s6107_s23, 2  ;;  %s3322_s15 = sand.u32 1, %s6108_s17  }
 0xa02   : > { %p6110_p7 = scmp.ne.s32.totalorder %s6109_s16, 0  ;;  %s3323_s22 = scalar_lea.sflag [#allocation7], %s3322_s15 }
 0xa04   : > { %p3902_p8 = pnand %p3911_p4, %p6110_p7 }
 0xa06   : > { %4698 = dma.done.wait (!%p3902_p8), %s3323_s22, 256  }
 0xa07   : > { %4700 = vsyncadd (!%p3902_p8), %s3323_s22, 4294967040  ;;  %s6111_s28 = sld [smem:[#allocation18_spill]]  ;;  %s6112_s18 = sld [smem:[#allocation16_spill]] }
 0xa08   : > { %s6113_s27 = sld [smem:[#allocation19_spill]]  ;;  %s6114_s25 = smov %s4707_s26 }
 0xa0d   : > { %p25_p11 = scmp.ge.s32.totalorder %s6111_s28, 4   ;;  %s6115_s26 = smov %s6112_s18 }
 0xa0f   :  { %27 = sbr.rel (!%p25_p11) target bundleno = 8 (0x8), region = 120 }
 0xa16   :  { %3328 = vsyncpa [#allocation6], 1 }
 0xa17   :  { %3330 = vsyncpa [#allocation6 + $0x1], 1 }
 0xa18   :  { %3331 = vsyncpa [#allocation9], 1 }
 0xa19   :  { %3332 = vsyncpa [#allocation7], 1 }
 0xa1a   :  { %3334 = vsyncpa [#allocation7 + $0x1], 1 }

</bundles_post_ra>
